<compile_context>
chip_gen: v6e
topology: v6e:2x2x1
jax: 0.10.0
libtpu: 0.0.40
codegen_flags: <defaults>
</compile_context>

<pallas_src>
import functools

import jax
import jax.numpy as jnp
import numpy as np
from jax.experimental import pallas as pl
from jax.experimental.pallas import tpu as pltpu

_CompilerParamsCls = getattr(pltpu, "CompilerParams", None) or getattr(
    pltpu, "TPUCompilerParams", None)
_CostEstimateCls = getattr(pl, "CostEstimate", None)


def _vmem_budget_bytes():
    """Per-chip VMEM budget for tiling (static fallback if query unavailable)."""
    try:
        cap = int(pltpu.get_tpu_info().vmem_capacity_bytes)
        # ~75% of physical VMEM, capped at 96 MiB (v5e/v6e: 128 MiB, v7x: 64 MiB).
        return int(min(cap * 3 // 4, 96 * 1024 * 1024))
    except Exception:
        # Safe static fallback: fits v7x's 64 MiB physical VMEM, well above the
        # default 16/32 MiB scoped limit.
        return 48 * 1024 * 1024


def _compiler_params(vmem_limit_bytes):
    if _CompilerParamsCls is None:
        return None
    try:
        return _CompilerParamsCls(
            dimension_semantics=("parallel", "parallel"),
            vmem_limit_bytes=int(vmem_limit_bytes))
    except TypeError:
        return _CompilerParamsCls(dimension_semantics=("parallel", "parallel"))


def _pick_tile_h(H, W, Cin, Cmid, Cout, out_bytes, budget_bytes, n_batch,
                 tile_h=None):
    """Largest TH (multiple of 4) whose per-step VMEM footprint fits the budget."""

    def footprint(th):
        rows1 = th + 2
        b = 2 * th * (W + 2) * Cin * 2          # main input block (x2 buffers)
        b += 2 * 4 * (W + 2) * Cin * 2          # 4-row halo block (x2 buffers)
        b += 2 * th * W * Cout * out_bytes      # output block (x2 buffers)
        b += 2 * 2 * 9 * (Cin * Cmid + Cmid * Cout)   # bf16 weights (x2 buffers)
        b += (th + 4) * W * 3 * Cin * 2         # xw1_m + xw1_t (dx-merged, bf16)
        b += rows1 * W * Cmid * 4               # conv1 f32 accumulator scratch
        b += rows1 * (W + 2) * Cmid * 2         # y1p (padded conv1 output, bf16)
        b += rows1 * W * 3 * Cmid * 2           # xw2 (dx-merged, bf16)
        b += th * W * Cout * 4                  # conv2 f32 accumulator
        return b

    cap = 256 if tile_h is None else int(tile_h)
    cap = max(4, min(cap, -(-H // 4) * 4))
    th = 4
    for cand in range(4, cap + 1, 4):
        if footprint(cand) <= int(budget_bytes * 0.8):   # headroom
            th = cand
        else:
            break
    # Megacore (v7x): keep at least 2 grid tiles so both TensorCores get work.
    if n_batch * (-(-H // th)) < 2:
        th_cap = ((H - 1) // 4) * 4
        if th_cap >= 4:
            th = min(th, th_cap)
    return th


# ---------------------------------------------------------------------------
# Fused DoubleConv Pallas kernel
# ---------------------------------------------------------------------------
def _double_conv_kernel(x_main_ref, x_tail_ref, w1_ref, s1_ref, t1_ref,
                        w2_ref, s2_ref, t2_ref, out_ref, acc_ref, *, true_h):
    """One (n, h) tile of DoubleConv.

    x_main_ref: (1, TH,  W+2, Cin)  rows [h*TH, h*TH+TH) of the padded input
    x_tail_ref: (1, 4,   W+2, Cin)  rows [h*TH+TH, h*TH+TH+4)   (halo)
    w1_ref    : (3, 3*Cin,  Cmid)   conv1 weights, dx-merged per dy (bf16)
    w2_ref    : (3, 3*Cmid, Cout)   conv2 weights, dx-merged per dy (bf16)
    s*/t*     : (1, C)              folded BN scale / shift (f32)
    out_ref   : (1, TH, W, Cout)
    acc_ref   : (TH+2, W, Cmid)     f32 conv1 accumulator (VMEM scratch)
    """
    _, TH, Wp2, Cin = x_main_ref.shape
    W = Wp2 - 2
    Cmid = w1_ref.shape[-1]
    Cout = out_ref.shape[-1]
    rows1 = TH + 2                  # conv1 rows kept (TH outputs + conv2 halo)
    h = pl.program_id(1)

    xm = x_main_ref[0]              # (TH, W+2, Cin)
    xt = x_tail_ref[0]              # (4,  W+2, Cin)

    # dx-merged windows built straight from the two input views (no (TH+4,W+2)
    # intermediate copy): main (TH, W, 3*Cin), tail (4, W, 3*Cin).
    xw1_m = jnp.concatenate(
        [xm[:, 0:W, :], xm[:, 1:W + 1, :], xm[:, 2:W + 2, :]], axis=-1)
    xw1_t = jnp.concatenate(
        [xt[:, 0:W, :], xt[:, 1:W + 1, :], xt[:, 2:W + 2, :]], axis=-1)

    # ---- conv1: 3 dy taps, K = 3*Cin, f32 accumulation in VMEM scratch.
    # For tap dy: main rows [dy, TH) feed output rows [0, TH-dy); the 4 halo
    # rows feed output rows [TH-dy, TH+2).  Row-range stores keep everything
    # in-place (no full-tile concatenate / copy).
    K1 = 3 * Cin
    for dy in range(3):
        m_rows = TH - dy
        t_rows = dy + 2
        pm = jnp.dot(xw1_m[dy:TH].reshape(m_rows * W, K1), w1_ref[dy],
                     preferred_element_type=jnp.float32)
        pm = pm.reshape(m_rows, W, Cmid)
        pt = jnp.dot(xw1_t[0:t_rows].reshape(t_rows * W, K1), w1_ref[dy],
                     preferred_element_type=jnp.float32)
        pt = pt.reshape(t_rows, W, Cmid)
        if dy == 0:
            acc_ref[0:TH] = pm
            acc_ref[TH:rows1] = pt
        else:
            acc_ref[0:m_rows] += pm
            acc_ref[m_rows:rows1] += pt

    # Folded BN (eval) + conv bias + ReLU, f32 epilogue.
    acc1 = acc_ref[...].reshape(rows1 * W, Cmid)
    y1 = jnp.maximum(acc1 * s1_ref[...] + t1_ref[...], 0.0)
    y1 = y1.reshape(rows1, W, Cmid)

    # Rows outside the image correspond to conv2's zero padding -> mask them.
    j = jax.lax.broadcasted_iota(jnp.int32, (rows1, 1, 1), 0)
    grow = h * TH - 1 + j
    y1 = jnp.where((grow >= 0) & (grow < true_h), y1, 0.0).astype(jnp.bfloat16)

    # Zero-pad y1 in W and merge the dx taps -> (rows1, W, 3*Cmid).
    zcol = jnp.zeros((rows1, 1, Cmid), jnp.bfloat16)
    y1p = jnp.concatenate([zcol, y1, zcol], axis=1)
    xw2 = jnp.concatenate(
        [y1p[:, 0:W, :], y1p[:, 1:W + 1, :], y1p[:, 2:W + 2, :]], axis=-1)

    # ---- conv2: 3 MXU matmuls, K = 3*Cmid.
    K2 = 3 * Cmid
    acc2 = jnp.dot(xw2[0:TH].reshape(TH * W, K2), w2_ref[0],
                   preferred_element_type=jnp.float32)
    for dy in (1, 2):
        acc2 = acc2 + jnp.dot(
            xw2[dy:dy + TH].reshape(TH * W, K2), w2_ref[dy],
            preferred_element_type=jnp.float32)

    y2 = jnp.maximum(acc2 * s2_ref[...] + t2_ref[...], 0.0)
    out_ref[0] = y2.reshape(TH, W, Cout).astype(out_ref.dtype)


def fold_bn(gamma, beta, running_mean, running_var, conv_bias, eps=1e-5):
    """Fold BatchNorm2d (eval) + conv bias into per-channel (scale, shift)."""
    scale = gamma / jnp.sqrt(running_var + eps)
    shift = beta + scale * (conv_bias - running_mean)
    c = scale.shape[0]
    return (scale.reshape(1, c).astype(jnp.float32),
            shift.reshape(1, c).astype(jnp.float32))


def double_conv_pallas(x_nhwc, params, *, tile_h=None, out_dtype=jnp.bfloat16):
    """Fused DoubleConv on NHWC input, tiled over (N, H)."""
    N, H, W, Cin = x_nhwc.shape
    w1, w2 = params["w1"], params["w2"]
    Cmid, Cout = w1.shape[-1], w2.shape[-1]
    assert w1.shape == (3, 3, Cin, Cmid) and w2.shape == (3, 3, Cmid, Cout)

    s1, t1 = fold_bn(params["bn1_gamma"], params["bn1_beta"],
                     params["bn1_mean"], params["bn1_var"], params["b1"])
    s2, t2 = fold_bn(params["bn2_gamma"], params["bn2_beta"],
                     params["bn2_mean"], params["bn2_var"], params["b2"])

    out_bytes = jnp.dtype(out_dtype).itemsize
    budget = _vmem_budget_bytes()
    TH = _pick_tile_h(H, W, Cin, Cmid, Cout, out_bytes, budget, N, tile_h)
    nH = -(-H // TH)
    H_pad = nH * TH

    # Pre-pad: 2 rows top / 2(+align) rows bottom (covers both convs' padding
    # plus the halo reach), 1 column left/right.  Input is already bf16 so this
    # fuses with the upstream concat producer (single 2 B/elem materialization).
    xpp = jnp.pad(x_nhwc.astype(jnp.bfloat16),
                  ((0, 0), (2, 2 + H_pad - H), (1, 1), (0, 0)))

    # dx-merged weights: (3, 3*Cin, Cmid) / (3, 3*Cmid, Cout), bf16.
    w1r = jnp.reshape(w1, (3, 3 * Cin, Cmid)).astype(jnp.bfloat16)
    w2r = jnp.reshape(w2, (3, 3 * Cmid, Cout)).astype(jnp.bfloat16)

    cost = None
    if _CostEstimateCls is not None:
        flops = 2 * N * H_pad * W * 9 * (Cin * Cmid + Cmid * Cout)
        in_bytes = int(xpp.size * 2 * (1.0 + 4.0 / TH))        # incl. halo re-read
        bytes_accessed = (in_bytes + w1r.size * 2 + w2r.size * 2
                          + N * H_pad * W * Cout * out_bytes
                          + 2 * (Cmid + Cout) * 4)
        cost = _CostEstimateCls(flops=int(flops), transcendentals=0,
                                bytes_accessed=int(bytes_accessed))

    th4 = TH // 4
    kernel = functools.partial(_double_conv_kernel, true_h=H)

    out = pl.pallas_call(
        kernel,
        grid=(N, nH),
        in_specs=[
            # main TH-row window of the padded input
            pl.BlockSpec((1, TH, W + 2, Cin), lambda n, h: (n, h, 0, 0)),
            # 4-row bottom halo of the same array (second view, non-overlapping)
            pl.BlockSpec((1, 4, W + 2, Cin),
                         lambda n, h: (n, (h + 1) * th4, 0, 0)),
            pl.BlockSpec((3, 3 * Cin, Cmid), lambda n, h: (0, 0, 0)),
            pl.BlockSpec((1, Cmid), lambda n, h: (0, 0)),
            pl.BlockSpec((1, Cmid), lambda n, h: (0, 0)),
            pl.BlockSpec((3, 3 * Cmid, Cout), lambda n, h: (0, 0, 0)),
            pl.BlockSpec((1, Cout), lambda n, h: (0, 0)),
            pl.BlockSpec((1, Cout), lambda n, h: (0, 0)),
        ],
        out_specs=pl.BlockSpec((1, TH, W, Cout), lambda n, h: (n, h, 0, 0)),
        out_shape=jax.ShapeDtypeStruct((N, H_pad, W, Cout), out_dtype),
        scratch_shapes=[pltpu.VMEM((TH + 2, W, Cmid), jnp.float32)],
        compiler_params=_compiler_params(budget),
        cost_estimate=cost,
    )(xpp, xpp, w1r, s1, t1, w2r, s2, t2)

    return out[:, :H] if H_pad != H else out


# ---------------------------------------------------------------------------
# Up wrapper: bilinear 2x upsample (align_corners=True) + pad + concat + conv
# ---------------------------------------------------------------------------
def _bilinear_upsample_x2_align_corners(x_nhwc):
    """nn.Upsample(scale_factor=2, mode='bilinear', align_corners=True)."""
    N, H, W, C = x_nhwc.shape
    Ho, Wo = 2 * H, 2 * W
    dt = x_nhwc.dtype

    def _src(n_in, n_out):
        if n_in == 1:
            pos = jnp.zeros((n_out,), jnp.float32)
        else:
            pos = jnp.arange(n_out, dtype=jnp.float32) * ((n_in - 1) / (n_out - 1))
        i0 = jnp.clip(jnp.floor(pos).astype(jnp.int32), 0, n_in - 1)
        i1 = jnp.clip(i0 + 1, 0, n_in - 1)
        return i0, i1, (pos - i0.astype(jnp.float32)).astype(dt)

    hi0, hi1, hf = _src(H, Ho)
    wi0, wi1, wf = _src(W, Wo)
    xr = (x_nhwc[:, hi0] * (1.0 - hf)[None, :, None, None]
          + x_nhwc[:, hi1] * hf[None, :, None, None])
    return (xr[:, :, wi0] * (1.0 - wf)[None, None, :, None]
            + xr[:, :, wi1] * wf[None, None, :, None])


def _upsample_pad_concat(x1_nhwc, x2_nhwc, dtype=jnp.bfloat16):
    """Upsample x1, pad to x2's spatial size, concat channels (x2 first).

    Done in bf16 so the concat (the DoubleConv input) is materialized in HBM
    exactly once at 2 B/elem and feeds the MXU directly.
    """
    x1 = x1_nhwc.astype(dtype)
    x2 = x2_nhwc.astype(dtype)
    x1 = _bilinear_upsample_x2_align_corners(x1)
    dY = x2.shape[1] - x1.shape[1]
    dX = x2.shape[2] - x1.shape[2]
    x1 = jnp.pad(x1, ((0, 0), (dY // 2, dY - dY // 2),
                      (dX // 2, dX - dX // 2), (0, 0)))
    return jnp.concatenate([x2, x1], axis=-1)   # == torch.cat([x2, x1], dim=1)


@functools.partial(jax.jit, static_argnames=("tile_h", "out_dtype"))
def up_forward_nhwc(x1_nhwc, x2_nhwc, params, *, tile_h=None,
                    out_dtype=jnp.bfloat16):
    """NHWC end-to-end Up.forward (no layout transposes)."""
    x = _upsample_pad_concat(x1_nhwc, x2_nhwc)
    return double_conv_pallas(x, params, tile_h=tile_h, out_dtype=out_dtype)


@functools.partial(jax.jit, static_argnames=("tile_h", "out_dtype"))
def up_forward(x1_nchw, x2_nchw, params, *, tile_h=None, out_dtype=jnp.bfloat16):
    """Up.forward with the PyTorch NCHW contract.

    x1 (N,C1,h,w), x2 (N,C2,2h,2w) -> (N, Cout, 2h, 2w).  Use up_forward_nhwc
    inside an NHWC pipeline to avoid the boundary transposes entirely.
    Pass out_dtype=jnp.float32 for bit-compatible PyTorch output dtype.
    """
    x1 = jnp.transpose(x1_nchw, (0, 2, 3, 1))
    x2 = jnp.transpose(x2_nchw, (0, 2, 3, 1))
    x = _upsample_pad_concat(x1, x2)                      # NHWC bf16
    y = double_conv_pallas(x, params, tile_h=tile_h, out_dtype=out_dtype)
    return jnp.transpose(y, (0, 3, 1, 2))                 # NHWC -> NCHW


# ---------------------------------------------------------------------------
# Parameter init (mirrors Up(in_channels, out_channels, bilinear=True))
# ---------------------------------------------------------------------------
def init_up_params(key, in_channels, out_channels):
    mid_channels = in_channels // 2     # DoubleConv(in, out, in // 2)
    ks = jax.random.split(key, 10)

    def conv_w(k, cout, cin):
        fan_in = cin * 9
        w = jax.random.normal(k, (cout, cin, 3, 3), jnp.float32) / np.sqrt(fan_in)
        return jnp.transpose(w, (2, 3, 1, 0))  # OIHW -> HWIO

    return {
        "w1": conv_w(ks[0], mid_channels, in_channels),
        "b1": 0.1 * jax.random.normal(ks[1], (mid_channels,), jnp.float32),
        "bn1_gamma": 1.0 + 0.1 * jax.random.normal(ks[2], (mid_channels,), jnp.float32),
        "bn1_beta": 0.1 * jax.random.normal(ks[3], (mid_channels,), jnp.float32),
        "bn1_mean": 0.05 * jax.random.normal(ks[4], (mid_channels,), jnp.float32),
        "bn1_var": 1.0 + 0.1 * jax.random.uniform(ks[5], (mid_channels,), jnp.float32),
        "w2": conv_w(ks[6], out_channels, mid_channels),
        "b2": 0.1 * jax.random.normal(ks[7], (out_channels,), jnp.float32),
        "bn2_gamma": 1.0 + 0.1 * jax.random.normal(ks[8], (out_channels,), jnp.float32),
        "bn2_beta": 0.1 * jax.random.normal(ks[9], (out_channels,), jnp.float32),
        "bn2_mean": jnp.zeros((out_channels,), jnp.float32),
        "bn2_var": jnp.ones((out_channels,), jnp.float32),
    }


# ---------------------------------------------------------------------------
# Plain-JAX reference (lax conv), precision-matched (same bf16 inputs)
# ---------------------------------------------------------------------------
@jax.jit
def _reference_forward(x1_nchw, x2_nchw, params):
    x1 = jnp.transpose(x1_nchw, (0, 2, 3, 1))
    x2 = jnp.transpose(x2_nchw, (0, 2, 3, 1))
    x = _upsample_pad_concat(x1, x2)

    def stage(x, w, s, t):
        y = jax.lax.conv_general_dilated(
            x.astype(jnp.bfloat16), w.astype(jnp.bfloat16),
            window_strides=(1, 1), padding="SAME",
            dimension_numbers=("NHWC", "HWIO", "NHWC"),
            preferred_element_type=jnp.float32)
        return jnp.maximum(y * s.reshape(1, 1, 1, -1) + t.reshape(1, 1, 1, -1), 0.0)

    s1, t1 = fold_bn(params["bn1_gamma"], params["bn1_beta"],
                     params["bn1_mean"], params["bn1_var"], params["b1"])
    s2, t2 = fold_bn(params["bn2_gamma"], params["bn2_beta"],
                     params["bn2_mean"], params["bn2_var"], params["b2"])
    y = stage(stage(x, params["w1"], s1, t1), params["w2"], s2, t2)
    return jnp.transpose(y, (0, 3, 1, 2))


if __name__ == "__main__":
    key = jax.random.PRNGKey(0)
    k1, k2, kp = jax.random.split(key, 3)

    in_channels, out_channels = 8, 8        # concat of two 4-channel inputs
    N, H, W = 2, 16, 16
    c_half = in_channels // 2

    x1 = jax.random.normal(k1, (N, c_half, H // 2, W // 2), jnp.float32)  # deep feature
    x2 = jax.random.normal(k2, (N, c_half, H, W), jnp.float32)            # skip feature
    params = init_up_params(kp, in_channels, out_channels)

    out = jax.block_until_ready(up_forward(x1, x2, params))
    assert out.shape == (N, out_channels, H, W), out.shape

    ref = jax.block_until_ready(_reference_forward(x1, x2, params))
    # Kernel output is bf16 (perf default); tolerances cover the final rounding.
    np.testing.assert_allclose(np.asarray(out.astype(jnp.float32)),
                               np.asarray(ref), rtol=1e-2, atol=1e-2)

    print("KERNEL_OK")
</pallas_src>

<mosaic_0001>
module attributes {stable_mosaic.version = 11 : i64} {
  func.func @_double_conv_kernel(%arg0: i32, %arg1: i32, %arg2: memref<1x16x18x8xbf16, #tpu.memory_space<vmem>>, %arg3: memref<1x4x18x8xbf16, #tpu.memory_space<vmem>>, %arg4: memref<3x24x4xbf16, #tpu.memory_space<vmem>>, %arg5: memref<1x4xf32, #tpu.memory_space<vmem>>, %arg6: memref<1x4xf32, #tpu.memory_space<vmem>>, %arg7: memref<3x12x8xbf16, #tpu.memory_space<vmem>>, %arg8: memref<1x8xf32, #tpu.memory_space<vmem>>, %arg9: memref<1x8xf32, #tpu.memory_space<vmem>>, %arg10: memref<1x16x16x8xbf16, #tpu.memory_space<vmem>>, %arg11: memref<18x16x4xf32, #tpu.memory_space<vmem>>) attributes {dimension_semantics = [#tpu.dimension_semantics<parallel>, #tpu.dimension_semantics<parallel>], iteration_bounds = array<i64: 2, 1>, scalar_prefetch = 0 : i64, scratch_operands = 1 : i64, tpu.core_type = #tpu.core_type<tc>, window_params = [{transform_indices = @transform_0, window_bounds = array<i64: 1, 16, 18, 8>}, {transform_indices = @transform_1, window_bounds = array<i64: 1, 4, 18, 8>}, {pipeline_mode = #tpu.pipeline_mode<synchronous>, transform_indices = @transform_2, window_bounds = array<i64: 3, 24, 4>}, {pipeline_mode = #tpu.pipeline_mode<synchronous>, transform_indices = @transform_3, window_bounds = array<i64: 1, 4>}, {pipeline_mode = #tpu.pipeline_mode<synchronous>, transform_indices = @transform_4, window_bounds = array<i64: 1, 4>}, {pipeline_mode = #tpu.pipeline_mode<synchronous>, transform_indices = @transform_5, window_bounds = array<i64: 3, 12, 8>}, {pipeline_mode = #tpu.pipeline_mode<synchronous>, transform_indices = @transform_6, window_bounds = array<i64: 1, 8>}, {pipeline_mode = #tpu.pipeline_mode<synchronous>, transform_indices = @transform_7, window_bounds = array<i64: 1, 8>}, {transform_indices = @transform_8, window_bounds = array<i64: 1, 16, 16, 8>}]} {
    %c0 = arith.constant 0 : index
    %c0_0 = arith.constant 0 : index
    %c0_1 = arith.constant 0 : index
    %c0_2 = arith.constant 0 : index
    %0 = vector.load %arg2[%c0, %c0_0, %c0_1, %c0_2] : memref<1x16x18x8xbf16, #tpu.memory_space<vmem>>, vector<1x16x18x8xbf16>
    %1 = vector.shape_cast %0 : vector<1x16x18x8xbf16> to vector<16x18x8xbf16>
    %c0_3 = arith.constant 0 : index
    %c0_4 = arith.constant 0 : index
    %c0_5 = arith.constant 0 : index
    %c0_6 = arith.constant 0 : index
    %2 = vector.load %arg3[%c0_3, %c0_4, %c0_5, %c0_6] : memref<1x4x18x8xbf16, #tpu.memory_space<vmem>>, vector<1x4x18x8xbf16>
    %3 = vector.shape_cast %2 : vector<1x4x18x8xbf16> to vector<4x18x8xbf16>
    %4 = vector.extract_strided_slice %1 {offsets = [0, 0, 0], sizes = [16, 16, 8], strides = [1, 1, 1]} : vector<16x18x8xbf16> to vector<16x16x8xbf16>
    %5 = vector.extract_strided_slice %1 {offsets = [0, 1, 0], sizes = [16, 16, 8], strides = [1, 1, 1]} : vector<16x18x8xbf16> to vector<16x16x8xbf16>
    %6 = vector.extract_strided_slice %1 {offsets = [0, 2, 0], sizes = [16, 16, 8], strides = [1, 1, 1]} : vector<16x18x8xbf16> to vector<16x16x8xbf16>
    %7 = tpu.concatenate %4, %5, %6 in 2 : vector<16x16x8xbf16>, vector<16x16x8xbf16>, vector<16x16x8xbf16> -> vector<16x16x24xbf16>
    %8 = vector.extract_strided_slice %3 {offsets = [0, 0, 0], sizes = [4, 16, 8], strides = [1, 1, 1]} : vector<4x18x8xbf16> to vector<4x16x8xbf16>
    %9 = vector.extract_strided_slice %3 {offsets = [0, 1, 0], sizes = [4, 16, 8], strides = [1, 1, 1]} : vector<4x18x8xbf16> to vector<4x16x8xbf16>
    %10 = vector.extract_strided_slice %3 {offsets = [0, 2, 0], sizes = [4, 16, 8], strides = [1, 1, 1]} : vector<4x18x8xbf16> to vector<4x16x8xbf16>
    %11 = tpu.concatenate %8, %9, %10 in 2 : vector<4x16x8xbf16>, vector<4x16x8xbf16>, vector<4x16x8xbf16> -> vector<4x16x24xbf16>
    %12 = vector.shape_cast %7 : vector<16x16x24xbf16> to vector<256x24xbf16>
    %c0_7 = arith.constant 0 : index
    %c0_8 = arith.constant 0 : index
    %c0_9 = arith.constant 0 : index
    %13 = vector.load %arg4[%c0_7, %c0_8, %c0_9] : memref<3x24x4xbf16, #tpu.memory_space<vmem>>, vector<1x24x4xbf16>
    %14 = vector.shape_cast %13 : vector<1x24x4xbf16> to vector<24x4xbf16>
    %cst = arith.constant dense<0.000000e+00> : vector<256x4xf32>
    %15 = tpu.matmul %12, %14, %cst {dimension_numbers = #tpu.dot_dimension_numbers<[1], [0], [0], [1], [0, 0, 1, 1], [], []>} : vector<256x24xbf16>, vector<24x4xbf16>, vector<256x4xf32> -> vector<256x4xf32>
    %16 = vector.shape_cast %15 : vector<256x4xf32> to vector<16x16x4xf32>
    %17 = vector.extract_strided_slice %11 {offsets = [0, 0, 0], sizes = [2, 16, 24], strides = [1, 1, 1]} : vector<4x16x24xbf16> to vector<2x16x24xbf16>
    %18 = vector.shape_cast %17 : vector<2x16x24xbf16> to vector<32x24xbf16>
    %c0_10 = arith.constant 0 : index
    %c0_11 = arith.constant 0 : index
    %c0_12 = arith.constant 0 : index
    %19 = vector.load %arg4[%c0_10, %c0_11, %c0_12] : memref<3x24x4xbf16, #tpu.memory_space<vmem>>, vector<1x24x4xbf16>
    %20 = vector.shape_cast %19 : vector<1x24x4xbf16> to vector<24x4xbf16>
    %cst_13 = arith.constant dense<0.000000e+00> : vector<32x4xf32>
    %21 = tpu.matmul %18, %20, %cst_13 {dimension_numbers = #tpu.dot_dimension_numbers<[1], [0], [0], [1], [0, 0, 1, 1], [], []>} : vector<32x24xbf16>, vector<24x4xbf16>, vector<32x4xf32> -> vector<32x4xf32>
    %22 = vector.shape_cast %21 : vector<32x4xf32> to vector<2x16x4xf32>
    %c0_14 = arith.constant 0 : index
    %c0_15 = arith.constant 0 : index
    %c0_16 = arith.constant 0 : index
    %23 = vector.load %arg11[%c0_14, %c0_15, %c0_16] : memref<18x16x4xf32, #tpu.memory_space<vmem>>, vector<16x16x4xf32>
    tpu.vector_store %arg11[%c0_14, %c0_15, %c0_16], %16 {strides = array<i32>} : memref<18x16x4xf32, #tpu.memory_space<vmem>>, vector<16x16x4xf32>,
    %c16 = arith.constant 16 : index
    %c0_17 = arith.constant 0 : index
    %c0_18 = arith.constant 0 : index
    %24 = vector.load %arg11[%c16, %c0_17, %c0_18] : memref<18x16x4xf32, #tpu.memory_space<vmem>>, vector<2x16x4xf32>
    tpu.vector_store %arg11[%c16, %c0_17, %c0_18], %22 {strides = array<i32>} : memref<18x16x4xf32, #tpu.memory_space<vmem>>, vector<2x16x4xf32>,
    %25 = vector.extract_strided_slice %7 {offsets = [1, 0, 0], sizes = [15, 16, 24], strides = [1, 1, 1]} : vector<16x16x24xbf16> to vector<15x16x24xbf16>
    %26 = vector.shape_cast %25 : vector<15x16x24xbf16> to vector<240x24xbf16>
    %c1 = arith.constant 1 : index
    %c0_19 = arith.constant 0 : index
    %c0_20 = arith.constant 0 : index
    %27 = vector.load %arg4[%c1, %c0_19, %c0_20] : memref<3x24x4xbf16, #tpu.memory_space<vmem>>, vector<1x24x4xbf16>
    %28 = vector.shape_cast %27 : vector<1x24x4xbf16> to vector<24x4xbf16>
    %cst_21 = arith.constant dense<0.000000e+00> : vector<240x4xf32>
    %29 = tpu.matmul %26, %28, %cst_21 {dimension_numbers = #tpu.dot_dimension_numbers<[1], [0], [0], [1], [0, 0, 1, 1], [], []>} : vector<240x24xbf16>, vector<24x4xbf16>, vector<240x4xf32> -> vector<240x4xf32>
    %30 = vector.shape_cast %29 : vector<240x4xf32> to vector<15x16x4xf32>
    %31 = vector.extract_strided_slice %11 {offsets = [0, 0, 0], sizes = [3, 16, 24], strides = [1, 1, 1]} : vector<4x16x24xbf16> to vector<3x16x24xbf16>
    %32 = vector.shape_cast %31 : vector<3x16x24xbf16> to vector<48x24xbf16>
    %c1_22 = arith.constant 1 : index
    %c0_23 = arith.constant 0 : index
    %c0_24 = arith.constant 0 : index
    %33 = vector.load %arg4[%c1_22, %c0_23, %c0_24] : memref<3x24x4xbf16, #tpu.memory_space<vmem>>, vector<1x24x4xbf16>
    %34 = vector.shape_cast %33 : vector<1x24x4xbf16> to vector<24x4xbf16>
    %cst_25 = arith.constant dense<0.000000e+00> : vector<48x4xf32>
    %35 = tpu.matmul %32, %34, %cst_25 {dimension_numbers = #tpu.dot_dimension_numbers<[1], [0], [0], [1], [0, 0, 1, 1], [], []>} : vector<48x24xbf16>, vector<24x4xbf16>, vector<48x4xf32> -> vector<48x4xf32>
    %36 = vector.shape_cast %35 : vector<48x4xf32> to vector<3x16x4xf32>
    %c0_26 = arith.constant 0 : index
    %c0_27 = arith.constant 0 : index
    %c0_28 = arith.constant 0 : index
    %37 = vector.load %arg11[%c0_26, %c0_27, %c0_28] : memref<18x16x4xf32, #tpu.memory_space<vmem>>, vector<15x16x4xf32>
    %38 = arith.addf %37, %30 : vector<15x16x4xf32>
    %c0_29 = arith.constant 0 : index
    %c0_30 = arith.constant 0 : index
    %c0_31 = arith.constant 0 : index
    %39 = vector.load %arg11[%c0_29, %c0_30, %c0_31] : memref<18x16x4xf32, #tpu.memory_space<vmem>>, vector<15x16x4xf32>
    tpu.vector_store %arg11[%c0_29, %c0_30, %c0_31], %38 {strides = array<i32>} : memref<18x16x4xf32, #tpu.memory_space<vmem>>, vector<15x16x4xf32>,
    %c15 = arith.constant 15 : index
    %c0_32 = arith.constant 0 : index
    %c0_33 = arith.constant 0 : index
    %40 = vector.load %arg11[%c15, %c0_32, %c0_33] : memref<18x16x4xf32, #tpu.memory_space<vmem>>, vector<3x16x4xf32>
    %41 = arith.addf %40, %36 : vector<3x16x4xf32>
    %c15_34 = arith.constant 15 : index
    %c0_35 = arith.constant 0 : index
    %c0_36 = arith.constant 0 : index
    %42 = vector.load %arg11[%c15_34, %c0_35, %c0_36] : memref<18x16x4xf32, #tpu.memory_space<vmem>>, vector<3x16x4xf32>
    tpu.vector_store %arg11[%c15_34, %c0_35, %c0_36], %41 {strides = array<i32>} : memref<18x16x4xf32, #tpu.memory_space<vmem>>, vector<3x16x4xf32>,
    %43 = vector.extract_strided_slice %7 {offsets = [2, 0, 0], sizes = [14, 16, 24], strides = [1, 1, 1]} : vector<16x16x24xbf16> to vector<14x16x24xbf16>
    %44 = vector.shape_cast %43 : vector<14x16x24xbf16> to vector<224x24xbf16>
    %c2 = arith.constant 2 : index
    %c0_37 = arith.constant 0 : index
    %c0_38 = arith.constant 0 : index
    %45 = vector.load %arg4[%c2, %c0_37, %c0_38] : memref<3x24x4xbf16, #tpu.memory_space<vmem>>, vector<1x24x4xbf16>
    %46 = vector.shape_cast %45 : vector<1x24x4xbf16> to vector<24x4xbf16>
    %cst_39 = arith.constant dense<0.000000e+00> : vector<224x4xf32>
    %47 = tpu.matmul %44, %46, %cst_39 {dimension_numbers = #tpu.dot_dimension_numbers<[1], [0], [0], [1], [0, 0, 1, 1], [], []>} : vector<224x24xbf16>, vector<24x4xbf16>, vector<224x4xf32> -> vector<224x4xf32>
    %48 = vector.shape_cast %47 : vector<224x4xf32> to vector<14x16x4xf32>
    %49 = vector.shape_cast %11 : vector<4x16x24xbf16> to vector<64x24xbf16>
    %c2_40 = arith.constant 2 : index
    %c0_41 = arith.constant 0 : index
    %c0_42 = arith.constant 0 : index
    %50 = vector.load %arg4[%c2_40, %c0_41, %c0_42] : memref<3x24x4xbf16, #tpu.memory_space<vmem>>, vector<1x24x4xbf16>
    %51 = vector.shape_cast %50 : vector<1x24x4xbf16> to vector<24x4xbf16>
    %cst_43 = arith.constant dense<0.000000e+00> : vector<64x4xf32>
    %52 = tpu.matmul %49, %51, %cst_43 {dimension_numbers = #tpu.dot_dimension_numbers<[1], [0], [0], [1], [0, 0, 1, 1], [], []>} : vector<64x24xbf16>, vector<24x4xbf16>, vector<64x4xf32> -> vector<64x4xf32>
    %53 = vector.shape_cast %52 : vector<64x4xf32> to vector<4x16x4xf32>
    %c0_44 = arith.constant 0 : index
    %c0_45 = arith.constant 0 : index
    %c0_46 = arith.constant 0 : index
    %54 = vector.load %arg11[%c0_44, %c0_45, %c0_46] : memref<18x16x4xf32, #tpu.memory_space<vmem>>, vector<14x16x4xf32>
    %55 = arith.addf %54, %48 : vector<14x16x4xf32>
    %c0_47 = arith.constant 0 : index
    %c0_48 = arith.constant 0 : index
    %c0_49 = arith.constant 0 : index
    %56 = vector.load %arg11[%c0_47, %c0_48, %c0_49] : memref<18x16x4xf32, #tpu.memory_space<vmem>>, vector<14x16x4xf32>
    tpu.vector_store %arg11[%c0_47, %c0_48, %c0_49], %55 {strides = array<i32>} : memref<18x16x4xf32, #tpu.memory_space<vmem>>, vector<14x16x4xf32>,
    %c14 = arith.constant 14 : index
    %c0_50 = arith.constant 0 : index
    %c0_51 = arith.constant 0 : index
    %57 = vector.load %arg11[%c14, %c0_50, %c0_51] : memref<18x16x4xf32, #tpu.memory_space<vmem>>, vector<4x16x4xf32>
    %58 = arith.addf %57, %53 : vector<4x16x4xf32>
    %c14_52 = arith.constant 14 : index
    %c0_53 = arith.constant 0 : index
    %c0_54 = arith.constant 0 : index
    %59 = vector.load %arg11[%c14_52, %c0_53, %c0_54] : memref<18x16x4xf32, #tpu.memory_space<vmem>>, vector<4x16x4xf32>
    tpu.vector_store %arg11[%c14_52, %c0_53, %c0_54], %58 {strides = array<i32>} : memref<18x16x4xf32, #tpu.memory_space<vmem>>, vector<4x16x4xf32>,
    %c0_55 = arith.constant 0 : index
    %c0_56 = arith.constant 0 : index
    %c0_57 = arith.constant 0 : index
    %60 = vector.load %arg11[%c0_55, %c0_56, %c0_57] : memref<18x16x4xf32, #tpu.memory_space<vmem>>, vector<18x16x4xf32>
    %61 = vector.shape_cast %60 : vector<18x16x4xf32> to vector<288x4xf32>
    %c0_58 = arith.constant 0 : index
    %c0_59 = arith.constant 0 : index
    %62 = vector.load %arg5[%c0_58, %c0_59] : memref<1x4xf32, #tpu.memory_space<vmem>>, vector<1x4xf32>
    %63 = vector.broadcast %62 : vector<1x4xf32> to vector<288x4xf32>
    %64 = arith.mulf %61, %63 : vector<288x4xf32>
    %c0_60 = arith.constant 0 : index
    %c0_61 = arith.constant 0 : index
    %65 = vector.load %arg6[%c0_60, %c0_61] : memref<1x4xf32, #tpu.memory_space<vmem>>, vector<1x4xf32>
    %66 = vector.broadcast %65 : vector<1x4xf32> to vector<288x4xf32>
    %67 = arith.addf %64, %66 : vector<288x4xf32>
    %cst_62 = arith.constant 0.000000e+00 : f32
    %68 = vector.broadcast %cst_62 : f32 to vector<288x4xf32>
    %69 = arith.maximumf %67, %68 : vector<288x4xf32>
    %70 = vector.shape_cast %69 : vector<288x4xf32> to vector<18x16x4xf32>
    %71 = tpu.iota {dimensions = array<i32: 0>} : vector<18x1x1xi32>
    %c16_i32 = arith.constant 16 : i32
    %72 = arith.muli %arg1, %c16_i32 : i32
    %c1_i32 = arith.constant 1 : i32
    %73 = arith.subi %72, %c1_i32 : i32
    %74 = vector.broadcast %73 : i32 to vector<18x1x1xi32>
    %75 = arith.addi %74, %71 : vector<18x1x1xi32>
    %c0_i32 = arith.constant 0 : i32
    %76 = vector.broadcast %c0_i32 : i32 to vector<18x1x1xi32>
    %77 = arith.cmpi sge, %75, %76 : vector<18x1x1xi32>
    %c16_i32_63 = arith.constant 16 : i32
    %78 = vector.broadcast %c16_i32_63 : i32 to vector<18x1x1xi32>
    %79 = arith.cmpi slt, %75, %78 : vector<18x1x1xi32>
    %80 = arith.andi %77, %79 : vector<18x1x1xi1>
    %cst_64 = arith.constant 0.000000e+00 : f32
    %81 = vector.shape_cast %80 : vector<18x1x1xi1> to vector<18x1x1xi1>
    %82 = vector.broadcast %81 : vector<18x1x1xi1> to vector<18x16x4xi1>
    %83 = vector.broadcast %cst_64 : f32 to vector<18x16x4xf32>
    %84 = arith.select %82, %70, %83 : vector<18x16x4xi1>, vector<18x16x4xf32>
    %85 = arith.truncf %84 : vector<18x16x4xf32> to vector<18x16x4xbf16>
    %cst_65 = arith.constant 0.000000e+00 : bf16
    %86 = vector.broadcast %cst_65 : bf16 to vector<18x1x4xbf16>
    %87 = tpu.concatenate %86, %85, %86 in 1 : vector<18x1x4xbf16>, vector<18x16x4xbf16>, vector<18x1x4xbf16> -> vector<18x18x4xbf16>
    %88 = vector.extract_strided_slice %87 {offsets = [0, 0, 0], sizes = [18, 16, 4], strides = [1, 1, 1]} : vector<18x18x4xbf16> to vector<18x16x4xbf16>
    %89 = vector.extract_strided_slice %87 {offsets = [0, 1, 0], sizes = [18, 16, 4], strides = [1, 1, 1]} : vector<18x18x4xbf16> to vector<18x16x4xbf16>
    %90 = vector.extract_strided_slice %87 {offsets = [0, 2, 0], sizes = [18, 16, 4], strides = [1, 1, 1]} : vector<18x18x4xbf16> to vector<18x16x4xbf16>
    %91 = tpu.concatenate %88, %89, %90 in 2 : vector<18x16x4xbf16>, vector<18x16x4xbf16>, vector<18x16x4xbf16> -> vector<18x16x12xbf16>
    %92 = vector.extract_strided_slice %91 {offsets = [0, 0, 0], sizes = [16, 16, 12], strides = [1, 1, 1]} : vector<18x16x12xbf16> to vector<16x16x12xbf16>
    %93 = vector.shape_cast %92 : vector<16x16x12xbf16> to vector<256x12xbf16>
    %c0_66 = arith.constant 0 : index
    %c0_67 = arith.constant 0 : index
    %c0_68 = arith.constant 0 : index
    %94 = vector.load %arg7[%c0_66, %c0_67, %c0_68] : memref<3x12x8xbf16, #tpu.memory_space<vmem>>, vector<1x12x8xbf16>
    %95 = vector.shape_cast %94 : vector<1x12x8xbf16> to vector<12x8xbf16>
    %cst_69 = arith.constant dense<0.000000e+00> : vector<256x8xf32>
    %96 = tpu.matmul %93, %95, %cst_69 {dimension_numbers = #tpu.dot_dimension_numbers<[1], [0], [0], [1], [0, 0, 1, 1], [], []>} : vector<256x12xbf16>, vector<12x8xbf16>, vector<256x8xf32> -> vector<256x8xf32>
    %97 = vector.extract_strided_slice %91 {offsets = [1, 0, 0], sizes = [16, 16, 12], strides = [1, 1, 1]} : vector<18x16x12xbf16> to vector<16x16x12xbf16>
    %98 = vector.shape_cast %97 : vector<16x16x12xbf16> to vector<256x12xbf16>
    %c1_70 = arith.constant 1 : index
    %c0_71 = arith.constant 0 : index
    %c0_72 = arith.constant 0 : index
    %99 = vector.load %arg7[%c1_70, %c0_71, %c0_72] : memref<3x12x8xbf16, #tpu.memory_space<vmem>>, vector<1x12x8xbf16>
    %100 = vector.shape_cast %99 : vector<1x12x8xbf16> to vector<12x8xbf16>
    %cst_73 = arith.constant dense<0.000000e+00> : vector<256x8xf32>
    %101 = tpu.matmul %98, %100, %cst_73 {dimension_numbers = #tpu.dot_dimension_numbers<[1], [0], [0], [1], [0, 0, 1, 1], [], []>} : vector<256x12xbf16>, vector<12x8xbf16>, vector<256x8xf32> -> vector<256x8xf32>
    %102 = arith.addf %96, %101 : vector<256x8xf32>
    %103 = vector.extract_strided_slice %91 {offsets = [2, 0, 0], sizes = [16, 16, 12], strides = [1, 1, 1]} : vector<18x16x12xbf16> to vector<16x16x12xbf16>
    %104 = vector.shape_cast %103 : vector<16x16x12xbf16> to vector<256x12xbf16>
    %c2_74 = arith.constant 2 : index
    %c0_75 = arith.constant 0 : index
    %c0_76 = arith.constant 0 : index
    %105 = vector.load %arg7[%c2_74, %c0_75, %c0_76] : memref<3x12x8xbf16, #tpu.memory_space<vmem>>, vector<1x12x8xbf16>
    %106 = vector.shape_cast %105 : vector<1x12x8xbf16> to vector<12x8xbf16>
    %cst_77 = arith.constant dense<0.000000e+00> : vector<256x8xf32>
    %107 = tpu.matmul %104, %106, %cst_77 {dimension_numbers = #tpu.dot_dimension_numbers<[1], [0], [0], [1], [0, 0, 1, 1], [], []>} : vector<256x12xbf16>, vector<12x8xbf16>, vector<256x8xf32> -> vector<256x8xf32>
    %108 = arith.addf %102, %107 : vector<256x8xf32>
    %c0_78 = arith.constant 0 : index
    %c0_79 = arith.constant 0 : index
    %109 = vector.load %arg8[%c0_78, %c0_79] : memref<1x8xf32, #tpu.memory_space<vmem>>, vector<1x8xf32>
    %110 = vector.broadcast %109 : vector<1x8xf32> to vector<256x8xf32>
    %111 = arith.mulf %108, %110 : vector<256x8xf32>
    %c0_80 = arith.constant 0 : index
    %c0_81 = arith.constant 0 : index
    %112 = vector.load %arg9[%c0_80, %c0_81] : memref<1x8xf32, #tpu.memory_space<vmem>>, vector<1x8xf32>
    %113 = vector.broadcast %112 : vector<1x8xf32> to vector<256x8xf32>
    %114 = arith.addf %111, %113 : vector<256x8xf32>
    %cst_82 = arith.constant 0.000000e+00 : f32
    %115 = vector.broadcast %cst_82 : f32 to vector<256x8xf32>
    %116 = arith.maximumf %114, %115 : vector<256x8xf32>
    %117 = vector.shape_cast %116 : vector<256x8xf32> to vector<16x16x8xf32>
    %118 = arith.truncf %117 : vector<16x16x8xf32> to vector<16x16x8xbf16>
    %c0_83 = arith.constant 0 : index
    %c0_84 = arith.constant 0 : index
    %c0_85 = arith.constant 0 : index
    %c0_86 = arith.constant 0 : index
    %119 = vector.load %arg10[%c0_83, %c0_84, %c0_85, %c0_86] : memref<1x16x16x8xbf16, #tpu.memory_space<vmem>>, vector<1x16x16x8xbf16>
    %120 = vector.shape_cast %119 : vector<1x16x16x8xbf16> to vector<16x16x8xbf16>
    %121 = vector.shape_cast %118 : vector<16x16x8xbf16> to vector<1x16x16x8xbf16>
    tpu.vector_store %arg10[%c0_83, %c0_84, %c0_85, %c0_86], %121 {strides = array<i32>} : memref<1x16x16x8xbf16, #tpu.memory_space<vmem>>, vector<1x16x16x8xbf16>,
    return
  }
  func.func @transform_0(%arg0: i32, %arg1: i32) -> (i32, i32, i32, i32) {
    %c0_i32 = arith.constant 0 : i32
    %c0_i32_0 = arith.constant 0 : i32
    %c0_i32_1 = arith.constant 0 : i32
    return %arg0, %arg1, %c0_i32, %c0_i32_0 : i32, i32, i32, i32
  }
  func.func @transform_1(%arg0: i32, %arg1: i32) -> (i32, i32, i32, i32) {
    %c1_i32 = arith.constant 1 : i32
    %0 = arith.addi %arg1, %c1_i32 : i32
    %c4_i32 = arith.constant 4 : i32
    %1 = arith.muli %0, %c4_i32 : i32
    %c0_i32 = arith.constant 0 : i32
    %c0_i32_0 = arith.constant 0 : i32
    %c0_i32_1 = arith.constant 0 : i32
    return %arg0, %1, %c0_i32, %c0_i32_0 : i32, i32, i32, i32
  }
  func.func @transform_2(%arg0: i32, %arg1: i32) -> (i32, i32, i32) {
    %c0_i32 = arith.constant 0 : i32
    %c0_i32_0 = arith.constant 0 : i32
    %c0_i32_1 = arith.constant 0 : i32
    %c0_i32_2 = arith.constant 0 : i32
    return %c0_i32, %c0_i32_0, %c0_i32_1 : i32, i32, i32
  }
  func.func @transform_3(%arg0: i32, %arg1: i32) -> (i32, i32) {
    %c0_i32 = arith.constant 0 : i32
    %c0_i32_0 = arith.constant 0 : i32
    %c0_i32_1 = arith.constant 0 : i32
    return %c0_i32, %c0_i32_0 : i32, i32
  }
  func.func @transform_4(%arg0: i32, %arg1: i32) -> (i32, i32) {
    %c0_i32 = arith.constant 0 : i32
    %c0_i32_0 = arith.constant 0 : i32
    %c0_i32_1 = arith.constant 0 : i32
    return %c0_i32, %c0_i32_0 : i32, i32
  }
  func.func @transform_5(%arg0: i32, %arg1: i32) -> (i32, i32, i32) {
    %c0_i32 = arith.constant 0 : i32
    %c0_i32_0 = arith.constant 0 : i32
    %c0_i32_1 = arith.constant 0 : i32
    %c0_i32_2 = arith.constant 0 : i32
    return %c0_i32, %c0_i32_0, %c0_i32_1 : i32, i32, i32
  }
  func.func @transform_6(%arg0: i32, %arg1: i32) -> (i32, i32) {
    %c0_i32 = arith.constant 0 : i32
    %c0_i32_0 = arith.constant 0 : i32
    %c0_i32_1 = arith.constant 0 : i32
    return %c0_i32, %c0_i32_0 : i32, i32
  }
  func.func @transform_7(%arg0: i32, %arg1: i32) -> (i32, i32) {
    %c0_i32 = arith.constant 0 : i32
    %c0_i32_0 = arith.constant 0 : i32
    %c0_i32_1 = arith.constant 0 : i32
    return %c0_i32, %c0_i32_0 : i32, i32
  }
  func.func @transform_8(%arg0: i32, %arg1: i32) -> (i32, i32, i32, i32) {
    %c0_i32 = arith.constant 0 : i32
    %c0_i32_0 = arith.constant 0 : i32
    %c0_i32_1 = arith.constant 0 : i32
    return %arg0, %arg1, %c0_i32, %c0_i32_0 : i32, i32, i32, i32
  }
}

</mosaic_0001>

<bundles_post_ra>
// kernel: up_forward.1
= control target key start
LH: loop header
LB: loop body
LE: loop exit
PB: predicated region body
PF: predicated region fallthrough
CT: control target
= control target key end

     0   :  { %s4835_s27 = smov 0   ;;  %s4837_s28 = smov 0   ;;  %s6150_s0 = inlined_call_operand.vmem [shape: bf16[2,20,18,8], index: 0, kind: input, shape index: {}, may-alias: {0,1}]   ;;  %s6151_s1 = inlined_call_operand.vmem [shape: bf16[2,20,18,8], index: 1, kind: input, shape index: {}, may-alias: {0,1}]   ;;  %s6152_s2 = inlined_call_operand.vmem [shape: bf16[3,24,4], index: 2, kind: input, shape index: {}]   ;;  %s6153_s3 = inlined_call_operand.vmem [shape: f32[1,4], index: 3, kind: input, shape index: {}]   ;;  %s6154_s4 = inlined_call_operand.vmem [shape: f32[1,4], index: 4, kind: input, shape index: {}]   ;;  %s6155_s5 = inlined_call_operand.vmem [shape: bf16[3,12,8], index: 5, kind: input, shape index: {}]   ;;  %s6156_s6 = inlined_call_operand.vmem [shape: f32[1,8], index: 6, kind: input, shape index: {}]   ;;  %s6157_s7 = inlined_call_operand.vmem [shape: f32[1,8], index: 7, kind: input, shape index: {}]   ;;  %s6158_s8 = inlined_call_operand.vmem [shape: bf16[2,16,16,8], index: 8, kind: output, shape index: {}]  }
   0x1   :  { %s4839_s29 = smov 0  }
   0x2 LB: > { %s30_s30 = sadd.s32 1, %s4778_s28  ;;  %p4038_p0 = scmp.ge.s32.totalorder %s4782_s29, 1  ;;  %s4782_s29 = sphi %s4839_s29, %s18_s29   ;;  %s4778_s28 = sphi %s4837_s28, %s6162_s28   ;;  %s4774_s27 = sphi %s4835_s27, %s6161_s27  }
   0x3   : > { %p32_p1 = scmp.ge.s32.totalorder %s30_s30, 2  ;;  %p320_p2 = scmp.lt.s32.totalorder %s4782_s29, 3 }
   0x5   : > { %s6164_s30 = smov (%p32_p1, %s30_s30), 0  ;;  %p321_p3 = pnand %p4038_p0, %p320_p2 }
   0x6   : > { %p387_p4 = scmp.lt.s32.totalorder (!%p321_p3), %s4774_s27, 1  ;;  %s4784_s17 = smov (!%p321_p3), 16  }
   0x7   : > { %324 = sbr.rel (%p321_p3) target bundleno = 961 (0x3c1), region = 52  ;;  %s4785_s19 = smov (!%p321_p3), 8  }
   0x8   : > { %s4788_s20 = smov (!%p321_p3), 4  }
   0xc   : > { %vm1158_vm0 = vcmask 1043456   ;;  %v4747_v0 = vld [vmem:[%s6152_s2 + $0x8] ss:$0 sps:$4 sm:$0xff]   ;;  %s6166_s27 = smov (!%p387_p4, %s4774_s27), 1  ;;  %vm842_vm1 = vcmask 1046528   ;;  %v4868_v2 = vld [vmem:[%s6152_s2] sm:$0xff]  }
   0xd   : > { %4669 = vmatprep.subr.msk.bf16.mxu1 %vm1158_vm0, %v4747_v0  ;;  %v4860_v1 = vsel %vm1158_vm0, %v4747_v0, 0  ;;  %4668 = vmatprep.subr.msk.bf16.mxu0 %vm1158_vm0, %v4747_v0  ;;  %s4676_s11 = smul.u32 240, %s6166_s27  ;;  %vm617_vm2 = vsmask.f32 7424  ;;  %vm923_vm3 = vcmask 64512   ;;  %vm956_vm4 = vcmask 130048  }
   0xe   : > { %4666 = vmatpush3.bf16.msra.mxu1 %v4860_v1  ;;  %4395 = vmatpush3.bf16.msra.mxu0 %v4860_v1  ;;  %vm1125_vm5 = vcmask 195584   ;;  %vm4787_vm6 = vmmov 0   ;;  %vm1376_vm7 = vcmask 31744   ;;  %vm3104_vm8 = vcmask 1045504   ;;  %s4244_s14 = sshll.u32 %s6166_s27, 7 }
   0xf   : > { %s4876_s16 = scalar_lea.vmem %s6150_s0, %s4676_s11  ;;  %4665 = vmatprep.subr.bf16.mxu1 %v4868_v2  ;;  %4396 = vmatprep.subr.bf16.mxu0 %v4868_v2  ;;  %s4916_s18 = sadd.s32 192, %s4676_s11  ;;  %vm2572_vm9 = vcmask 1040384   ;;  %vm2573_vm10 = vsmask.f32 256  ;;  %vm3071_vm12 = vcmask 97280   ;;  %vm3884_vm13 = vcmask 60416  }
  0x10   : > { %v4881_v3 = vld [vmem:[%s4876_s16 + $0x60] sm:$0xff]   ;;  %v4710_v4 = vld [vmem:[%s4876_s16 + $0x68] ss:$0 sps:$4 sm:$0x11]   ;;  %v4887_v5 = vld [vmem:[%s4876_s16 + $0x6c] sm:$0xff]   ;;  %s4949_s22 = scalar_lea.vmem %s6151_s1, %s4916_s18 }
  0x11   : > { %v867_v6 = vrot.slane %v4881_v3, 1  ;;  %v868_v7 = vrot.slane %v4710_v4, 1  ;;  %v715_v8 = vshrl.u32 %v4881_v3, 16  ;;  %v717_v9 = vshll.u32 %v4881_v3, 16  ;;  %v4900_v20 = vld [vmem:[%s4876_s16 + $0x84] sm:$0xff]   ;;  %v4907_v28 = vld [vmem:[%s4876_s16 + $0x78] sm:$0xff]   ;;  %vm5438_vm11 = vmand %vm2572_vm9, %vm2573_vm10 }
  0x12   : > { %4667 = vmatpush3.bf16.msra.mxu1 %v4868_v2  ;;  %4397 = vmatpush3.bf16.msra.mxu0 %v4868_v2  ;;  %v722_v10 = vshll.u32 %v4710_v4, 16  ;;  %v4712_v11 = vld [vmem:[%s4876_s16 + $0x74] ss:$0 sps:$4 sm:$0x11]   ;;  %v870_v12 = vrot.slane %v4887_v5, 1  ;;  %v727_v13 = vshrl.u32 %v4887_v5, 16 }
  0x13   : > { %4670 = vmatprep.subr.msk.bf16.mxu1 %vm1158_vm0, %v4747_v0  ;;  %v869_v14 = vsel %vm842_vm1, %v867_v6, %v868_v7  ;;  %v719_v15 = vrot.slane %v717_v9, 1  ;;  %v729_v16 = vshll.u32 %v4887_v5, 16  ;;  %v871_v18 = vrot.slane %v4712_v11, 1  ;;  %v4714_v23 = vld [vmem:[%s4876_s16 + $0x8c] ss:$0 sps:$4 sm:$0x11]  }
  0x14   : > { %907 = vrot.lane.b32.xlu1 %v869_v14, %s4784_s17  ;;  %v724_v17 = vrot.slane %v722_v10, 1  ;;  %v734_v19 = vshll.u32 %v4712_v11, 16  ;;  %v751_v26 = vshrl.u32 %v4900_v20, 16  ;;  %v753_v27 = vshll.u32 %v4900_v20, 16  ;;  %v4912_v33 = vld [vmem:[%s4876_s16 + $0x9c] sm:$0xff]   ;;  %v4925_v42 = vld [vmem:[%s4876_s16 + $0x90] sm:$0xff]  }
  0x15   : > { %v720_v21 = vor.u32 %v719_v15, %v715_v8  ;;  %v731_v22 = vrot.slane %v729_v16, 1  ;;  %v872_v24 = vsel %vm842_vm1, %v870_v12, %v871_v18  ;;  %v758_v31 = vshll.u32 %v4714_v23, 16  ;;  %v4716_v32 = vld [vmem:[%s4876_s16 + $0x80] ss:$0 sps:$4 sm:$0x11]   ;;  %v4940_v60 = vld [vmem:[%s4876_s16 + $0xb4] sm:$0xff]  }
  0x16   : > { %v736_v25 = vrot.slane %v734_v19, 1  ;;  %v755_v34 = vrot.slane %v753_v27, 1  ;;  %v739_v35 = vshrl.u32 %v4907_v28, 16  ;;  %v741_v36 = vshll.u32 %v4907_v28, 16  ;;  %v4943_v4 = vld [vmem:[%s4876_s16 + $0xa8] sm:$0xff]  }
  0x17   : > { %v725_v29 = vsel %vm617_vm2, %v720_v21, %v724_v17  ;;  %v732_v30 = vor.u32 %v731_v22, %v727_v13  ;;  %v876_v37 = vrot.slane %v4900_v20, 1  ;;  %v760_v39 = vrot.slane %v758_v31, 1  ;;  %v4718_v47 = vld [vmem:[%s4876_s16 + $0xa4] ss:$0 sps:$4 sm:$0x11]   ;;  %v4960_v16 = vld [vmem:[%s4949_s22 + $0xc] sm:$0xff]  }
  0x18   : > { %826 = vrot.lane.b32.xlu0 %v725_v29, %s4785_s19  ;;  %909 = vrot.lane.b32.xlu1 %v872_v24, %s4784_s17  ;;  %v746_v40 = vshll.u32 %v4716_v32, 16  ;;  %v877_v41 = vrot.slane %v4714_v23, 1  ;;  %v756_v43 = vor.u32 %v755_v34, %v751_v26  ;;  %v743_v44 = vrot.slane %v741_v36, 1  ;;  %v4720_v56 = vld [vmem:[%s4876_s16 + $0x98] ss:$0 sps:$4 sm:$0x11]  }
  0x19   : > { %v737_v38 = vsel %vm617_vm2, %v732_v30, %v736_v25  ;;  %v873_v45 = vrot.slane %v4907_v28, 1  ;;  %v775_v48 = vshrl.u32 %v4912_v33, 16  ;;  %v777_v49 = vshll.u32 %v4912_v33, 16  ;;  %v4722_v7 = vld [vmem:[%s4876_s16 + $0xbc] ss:$0 sps:$4 sm:$0x11]  }
  0x1a   : > { %v748_v46 = vrot.slane %v746_v40, 1  ;;  %v761_v50 = vsel %vm617_vm2, %v756_v43, %v760_v39  ;;  %v744_v51 = vor.u32 %v743_v44, %v739_v35  ;;  %v874_v52 = vrot.slane %v4716_v32, 1  ;;  %v4724_v17 = vld [vmem:[%s4876_s16 + $0xb0] ss:$0 sps:$4 sm:$0x11]   ;;  %v4970_v29 = vld [vmem:[%s4949_s22] sm:$0xff]  }
  0x1b   : > { %v763_v53 = vshrl.u32 %v4925_v42, 16  ;;  %v779_v54 = vrot.slane %v777_v49, 1  ;;  %v782_v55 = vshll.u32 %v4718_v47, 16  ;;  %v765_v57 = vshll.u32 %v4925_v42, 16 }
  0x1c   : > { %828 = vrot.lane.b32.xlu0 %v737_v38, %s4785_s19  ;;  %832 = vrot.lane.b32.xlu1 %v761_v50, %s4785_s19  ;;  %v749_v58 = vsel %vm617_vm2, %v744_v51, %v748_v46  ;;  %v878_v59 = vsel %vm842_vm1, %v876_v37, %v877_v41  ;;  %v770_v0 = vshll.u32 %v4720_v56, 16  ;;  %v882_v6 = vrot.slane %v4912_v33, 1  ;;  %v4726_v32 = vld [vmem:[%s4949_s22 + $0x14] ss:$0 sps:$4 sm:$0x11]   ;;  %v4987_v50 = vld [vmem:[%s4876_s16 + $0xc] sm:$0xff]  }
  0x1d   : > { %v780_v61 = vor.u32 %v779_v54, %v775_v48  ;;  %v784_v62 = vrot.slane %v782_v55, 1  ;;  %v767_v63 = vrot.slane %v765_v57, 1  ;;  %v875_v8 = vsel %vm842_vm1, %v873_v45, %v874_v52  ;;  %v4728_v41 = vld [vmem:[%s4949_s22 + $0x8] ss:$0 sps:$4 sm:$0x11]   ;;  %v4993_v57 = vld [vmem:[%s4876_s16 + $0x18] sm:$0xff]  }
  0x1e   : > { %v772_v10 = vrot.slane %v770_v0, 1  ;;  %v883_v11 = vrot.slane %v4718_v47, 1  ;;  %v799_v13 = vshrl.u32 %v4940_v60, 16  ;;  %v801_v14 = vshll.u32 %v4940_v60, 16 }
  0x1f   : > { %v768_v9 = vor.u32 %v767_v63, %v763_v53  ;;  %v785_v12 = vsel %vm617_vm2, %v780_v61, %v784_v62  ;;  %v806_v15 = vshll.u32 %v4722_v7, 16  ;;  %v789_v18 = vshll.u32 %v4943_v4, 16  ;;  %v5000_v62 = vld [vmem:[%s4876_s16] sm:$0xff]  }
  0x20   : > { %830 = vrot.lane.b32.xlu0 %v749_v58, %s4785_s19  ;;  %913 = vrot.lane.b32.xlu1 %v878_v59, %s4784_s17  ;;  %v879_v19 = vrot.slane %v4925_v42, 1  ;;  %v880_v21 = vrot.slane %v4720_v56, 1  ;;  %v803_v22 = vrot.slane %v801_v14, 1  ;;  %v787_v23 = vshrl.u32 %v4943_v4, 16 }
  0x21   : > { %v773_v24 = vsel %vm617_vm2, %v768_v9, %v772_v10  ;;  %v808_v25 = vrot.slane %v806_v15, 1  ;;  %v791_v26 = vrot.slane %v789_v18, 1  ;;  %v794_v27 = vshll.u32 %v4724_v17, 16  ;;  %v4730_v58 = vld [vmem:[%s4876_s16 + $0x14] ss:$0 sps:$4 sm:$0x11]  }
  0x22   : > { %v884_v30 = vsel %vm842_vm1, %v882_v6, %v883_v11  ;;  %v804_v31 = vor.u32 %v803_v22, %v799_v13  ;;  %v1036_v34 = vshll.u32 %v4960_v16, 16  ;;  %v881_v35 = vsel %vm842_vm1, %v879_v19, %v880_v21  ;;  %v4732_v15 = vld [vmem:[%s4876_s16 + $0x8] ss:$0 sps:$4 sm:$0x11]  }
  0x23   : > { %v888_v36 = vrot.slane %v4940_v60, 1  ;;  %v889_v37 = vrot.slane %v4722_v7, 1  ;;  %v792_v38 = vor.u32 %v791_v26, %v787_v23  ;;  %v796_v39 = vrot.slane %v794_v27, 1 }
  0x24   : > { %911 = vrot.lane.b32.xlu0 %v875_v8, %s4784_s17  ;;  %836 = vrot.lane.b32.xlu1 %v785_v12, %s4785_s19  ;;  %v1034_v40 = vshrl.u32 %v4960_v16, 16  ;;  %v1024_v43 = vshll.u32 %v4970_v29, 16  ;;  %v809_v44 = vsel %vm617_vm2, %v804_v31, %v808_v25  ;;  %v1038_v45 = vrot.slane %v1036_v34, 1  ;;  %v4734_v8 = vld [vmem:[%s4876_s16 + $0x20] ss:$0 sps:$4 sm:$0x11]  }
  0x25   : > { %v1041_v46 = vshll.u32 %v4726_v32, 16  ;;  %v885_v47 = vrot.slane %v4943_v4, 1  ;;  %v886_v48 = vrot.slane %v4724_v17, 1  ;;  %v1022_v49 = vshrl.u32 %v4970_v29, 16 }
  0x26   : > { %v797_v51 = vsel %vm617_vm2, %v792_v38, %v796_v39  ;;  %v1026_v52 = vrot.slane %v1024_v43, 1  ;;  %v1029_v53 = vshll.u32 %v4728_v41, 16  ;;  %v890_v54 = vsel %vm842_vm1, %v888_v36, %v889_v37 }
  0x27   : > { %v1039_v55 = vor.u32 %v1038_v45, %v1034_v40  ;;  %v1043_v56 = vrot.slane %v1041_v46, 1  ;;  %v887_v59 = vsel %vm842_vm1, %v885_v47, %v886_v48  ;;  %v1080_v61 = vrot.slane %v4960_v16, 1  ;;  %v5026_v40 = vld [vmem:[%s4876_s16 + $0x3c] sm:$0xff]   ;;  %v5032_v46 = vld [vmem:[%s4876_s16 + $0x30] sm:$0xff]  }
  0x28   : > { %834 = vrot.lane.b32.xlu0 %v773_v24, %s4785_s19  ;;  %917 = vrot.lane.b32.xlu1 %v884_v30, %s4784_s17  ;;  %v1027_v63 = vor.u32 %v1026_v52, %v1022_v49  ;;  %v1031_v0 = vrot.slane %v1029_v53, 1  ;;  %v1081_v6 = vrot.slane %v4726_v32, 1  ;;  %v633_v7 = vshll.u32 %v4987_v50, 16  ;;  %v5019_v30 = vld [vmem:[%s4876_s16 + $0x24] sm:$0xff]  }
  0x29   : > { %v1044_v9 = vsel %vm617_vm2, %v1039_v55, %v1043_v56  ;;  %v645_v10 = vshll.u32 %v4993_v57, 16  ;;  %v1077_v11 = vrot.slane %v4970_v29, 1  ;;  %v1078_v12 = vrot.slane %v4728_v41, 1  ;;  %v4736_v41 = vld [vmem:[%s4876_s16 + $0x2c] ss:$0 sps:$4 sm:$0x11]  }
  0x2a   : > { %v631_v13 = vshrl.u32 %v4987_v50, 16  ;;  %v846_v14 = vrot.slane %v4987_v50, 1  ;;  %v621_v17 = vshll.u32 %v5000_v62, 16  ;;  %v1032_v18 = vsel %vm617_vm2, %v1027_v63, %v1031_v0  ;;  %v5035_v47 = vld [vmem:[%s4876_s16 + $0x44] ss:$0 sps:$4 sm:$0x11]  }
  0x2b   : > { %v1082_v19 = vsel %vm842_vm1, %v1080_v61, %v1081_v6  ;;  %v635_v21 = vrot.slane %v633_v7, 1  ;;  %v638_v22 = vshll.u32 %v4730_v58, 16  ;;  %v847_v23 = vrot.slane %v4730_v58, 1  ;;  %v4738_v55 = vld [vmem:[%s4876_s16 + $0x38] ss:$0 sps:$4 sm:$0x11]  }
  0x2c   : > { %915 = vrot.lane.b32.xlu0 %v881_v35, %s4784_s17  ;;  %840 = vrot.lane.b32.xlu1 %v809_v44, %s4785_s19  ;;  %v643_v24 = vshrl.u32 %v4993_v57, 16  ;;  %v647_v25 = vrot.slane %v645_v10, 1  ;;  %v650_v26 = vshll.u32 %v4734_v8, 16  ;;  %v619_v27 = vshrl.u32 %v5000_v62, 16 }
  0x2d   : > { %v623_v31 = vrot.slane %v621_v17, 1  ;;  %v626_v32 = vshll.u32 %v4732_v15, 16  ;;  %v1079_v34 = vsel %vm842_vm1, %v1077_v11, %v1078_v12  ;;  %v636_v35 = vor.u32 %v635_v21, %v631_v13  ;;  %v5054_v12 = vld [vmem:[%s4876_s16 + $0x54] sm:$0xff]  }
  0x2e   : > { %v640_v36 = vrot.slane %v638_v22, 1  ;;  %v848_v37 = vsel %vm842_vm1, %v846_v14, %v847_v23  ;;  %v648_v38 = vor.u32 %v647_v25, %v643_v24  ;;  %v652_v39 = vrot.slane %v650_v26, 1  ;;  %v5062_v23 = vld [vmem:[%s4876_s16 + $0x48] sm:$0xff]   ;;  %v4744_v26 = vld [vmem:[%s4876_s16 + $0x5c] ss:$0 sps:$4 sm:$0x11]  }
  0x2f   : > { %v624_v43 = vor.u32 %v623_v31, %v619_v27  ;;  %v628_v44 = vrot.slane %v626_v32, 1  ;;  %v657_v45 = vshll.u32 %v5019_v30, 16  ;;  %v850_v52 = vrot.slane %v4734_v8, 1 }
  0x30   : > { %838 = vrot.lane.b32.xlu0 %v797_v51, %s4785_s19  ;;  %921 = vrot.lane.b32.xlu1 %v890_v54, %s4784_s17  ;;  %v641_v48 = vsel %vm617_vm2, %v636_v35, %v640_v36  ;;  %v653_v49 = vsel %vm617_vm2, %v648_v38, %v652_v39  ;;  %v849_v51 = vrot.slane %v4993_v57, 1  ;;  %v681_v53 = vshll.u32 %v5026_v40, 16 }
  0x31   : > { %v843_v54 = vrot.slane %v5000_v62, 1  ;;  %v629_v56 = vsel %vm617_vm2, %v624_v43, %v628_v44  ;;  %v844_v58 = vrot.slane %v4732_v15, 1  ;;  %v852_v61 = vrot.slane %v5019_v30, 1 }
  0x32   : > { %v659_v63 = vrot.slane %v657_v45, 1  ;;  %v662_v0 = vshll.u32 %v4736_v41, 16  ;;  %v669_v6 = vshll.u32 %v5032_v46, 16  ;;  %v686_v7 = vshll.u32 %v5035_v47, 16 }
  0x33   : > { %v851_v8 = vsel %vm842_vm1, %v849_v51, %v850_v52  ;;  %v679_v10 = vshrl.u32 %v5026_v40, 16  ;;  %v683_v11 = vrot.slane %v681_v53, 1  ;;  %v674_v13 = vshll.u32 %v4738_v55, 16  ;;  %v5082_v53 = vld [vmem:[%s4949_s22 + $0x18] sm:$0xff]  }
  0x34   : > { %919 = vrot.lane.b32.xlu0 %v887_v59, %s4784_s17  ;;  %1071 = vrot.lane.b32.xlu1 %v1044_v9, %s4785_s19  ;;  %v655_v59 = vshrl.u32 %v5019_v30, 16  ;;  %v853_v9 = vrot.slane %v4736_v41, 1  ;;  %v845_v14 = vsel %vm842_vm1, %v843_v54, %v844_v58  ;;  %v667_v15 = vshrl.u32 %v5032_v46, 16 }
  0x35   : > { %v4786_v17 = vmov 0.0   ;;  %v671_v21 = vrot.slane %v669_v6, 1  ;;  %v688_v22 = vrot.slane %v686_v7, 1  ;;  %v684_v25 = vor.u32 %v683_v11, %v679_v10  ;;  %v5091_v6 = vld [vmem:[%s4949_s22 + $0x24] sm:$0xff]  }
  0x36   : > { %4502 = vmatprep.subr.bf16.mxu0 %v4786_v17  ;;  %v854_v24 = vsel %vm842_vm1, %v852_v61, %v853_v9  ;;  %v705_v27 = vshll.u32 %v5054_v12, 16  ;;  %v676_v31 = vrot.slane %v674_v13, 1  ;;  %v858_v32 = vrot.slane %v5026_v40, 1 }
  0x37   : > { %v672_v36 = vor.u32 %v671_v21, %v667_v15  ;;  %v693_v38 = vshll.u32 %v5062_v23, 16  ;;  %v689_v39 = vsel %vm617_vm2, %v684_v25, %v688_v22  ;;  %v703_v41 = vshrl.u32 %v5054_v12, 16 }
  0x38   : > { %1069 = vrot.lane.b32.xlu0 %v1032_v18, %s4785_s19  ;;  %1091 = vrot.lane.b32.xlu1 %v1082_v19, %s4784_s17  ;;  %v660_v18 = vor.u32 %v659_v63, %v655_v59  ;;  %v664_v19 = vrot.slane %v662_v0, 1  ;;  %v707_v43 = vrot.slane %v705_v27, 1  ;;  %v710_v44 = vshll.u32 %v4744_v26, 16  ;;  %v4746_v59 = vld [vmem:[%s4949_s22 + $0x20] ss:$0 sps:$4 sm:$0x11]  }
  0x39   : > { %v855_v45 = vrot.slane %v5032_v46, 1  ;;  %v695_v51 = vrot.slane %v693_v38, 1  ;;  %v1048_v0 = vshll.u32 %v5082_v53, 16  ;;  %v865_v9 = vrot.slane %v4744_v26, 1 }
  0x3a   : > { %v665_v35 = vsel %vm617_vm2, %v660_v18, %v664_v19  ;;  %v712_v58 = vrot.slane %v710_v44, 1  ;;  %v861_v10 = vrot.slane %v5062_v23, 1  ;;  %v1053_v13 = vshll.u32 %v4746_v59, 16  ;;  %v4753_v19 = vld [vmem:[%s4949_s22 + $0x2c] ss:$0 sps:$4 sm:$0x11]  }
  0x3b   : > { %v1046_v15 = vshrl.u32 %v5082_v53, 16  ;;  %v1050_v18 = vrot.slane %v1048_v0, 1  ;;  %v1060_v21 = vshll.u32 %v5091_v6, 16  ;;  %v1084_v25 = vrot.slane %v4746_v59, 1 }
  0x3c   : > { %1089 = vrot.lane.b32.xlu0 %v1079_v34, %s4784_s17  ;;  %893 = vrot.lane.b32.xlu1 %v848_v37, %s4784_s17  ;;  %v859_v34 = vrot.slane %v5035_v47, 1  ;;  %v4742_v37 = vld [vmem:[%s4876_s16 + $0x50] ss:$0 sps:$4 sm:$0x11]   ;;  %v856_v47 = vrot.slane %v4738_v55, 1  ;;  %v1055_v27 = vrot.slane %v1053_v13, 1 }
  0x3d   : > { %v698_v52 = vshll.u32 %v4742_v37, 16  ;;  %v862_v11 = vrot.slane %v4742_v37, 1  ;;  %v1086_v37 = vrot.slane %v5091_v6, 1  ;;  %v1087_v38 = vrot.slane %v4753_v19, 1 }
  0x3e   : > { %v860_v54 = vsel %vm842_vm1, %v858_v32, %v859_v34  ;;  %v857_v55 = vsel %vm842_vm1, %v855_v45, %v856_v47  ;;  %v1058_v32 = vshrl.u32 %v5091_v6, 16  ;;  %v1062_v34 = vrot.slane %v1060_v21, 1 }
  0x3f   : > { %v700_v63 = vrot.slane %v698_v52, 1  ;;  %v863_v26 = vsel %vm842_vm1, %v861_v10, %v862_v11  ;;  %v1088_v44 = vsel %vm842_vm1, %v1086_v37, %v1087_v38  ;;  %v4751_v38 = vld [vmem:[%s6152_s2 + $0x20] ss:$0 sps:$4 sm:$0xff]  }
  0x40   : > { %812 = vrot.lane.b32.xlu0 %v641_v48, %s4785_s19  ;;  %814 = vrot.lane.b32.xlu1 %v653_v49, %s4785_s19  ;;  %v677_v48 = vsel %vm617_vm2, %v672_v36, %v676_v31  ;;  %v691_v49 = vshrl.u32 %v5062_v23, 16  ;;  %v1051_v31 = vor.u32 %v1050_v18, %v1046_v15 }
  0x42   : > { %v696_v61 = vor.u32 %v695_v51, %v691_v49 }
  0x44   : > { %810 = vrot.lane.b32.xlu0 %v629_v56, %s4785_s19  ;;  %895 = vrot.lane.b32.xlu1 %v851_v8, %s4784_s17  ;;  %v708_v56 = vor.u32 %v707_v43, %v703_v41  ;;  %v864_v8 = vrot.slane %v5054_v12, 1  ;;  %v1063_v41 = vor.u32 %v1062_v34, %v1058_v32 }
  0x46   : > { %v713_v7 = vsel %vm617_vm2, %v708_v56, %v712_v58  ;;  %v866_v22 = vsel %vm842_vm1, %v864_v8, %v865_v9 }
  0x48   : > { %891 = vrot.lane.b32.xlu0 %v845_v14, %s4784_s17  ;;  %897 = vrot.lane.b32.xlu1 %v854_v24, %s4784_s17  ;;  %v701_v14 = vsel %vm617_vm2, %v696_v61, %v700_v63  ;;  %v1083_v24 = vrot.slane %v5082_v53, 1 }
  0x4a   : > { %v1085_v36 = vsel %vm842_vm1, %v1083_v24, %v1084_v25 }
  0x4c   : > { %816 = vrot.lane.b32.xlu0 %v665_v35, %s4785_s19  ;;  %820 = vrot.lane.b32.xlu1 %v689_v39, %s4785_s19  ;;  %v1065_v35 = vshll.u32 %v4753_v19, 16  ;;  %v1056_v39 = vsel %vm617_vm2, %v1051_v31, %v1055_v27 }
  0x4e   : > { %v1067_v43 = vrot.slane %v1065_v35, 1 }
  0x50   : > { %818 = vrot.lane.b32.xlu0 %v677_v48, %s4785_s19  ;;  %901 = vrot.lane.b32.xlu1 %v860_v54, %s4784_s17  ;;  %v1068_v45 = vsel %vm617_vm2, %v1063_v41, %v1067_v43 }
  0x54   : > { %899 = vrot.lane.b32.xlu0 %v857_v55, %s4784_s17  ;;  %824 = vrot.lane.b32.xlu1 %v713_v7, %s4785_s19 }
  0x58   : > { %822 = vrot.lane.b32.xlu0 %v701_v14, %s4785_s19  ;;  %905 = vrot.lane.b32.xlu1 %v866_v22, %s4784_s17 }
  0x5c   : > { %903 = vrot.lane.b32.xlu0 %v863_v26, %s4784_s17  ;;  %1093 = vrot.lane.b32.xlu1 %v1085_v36, %s4784_s17 }
  0x60   : > { %1073 = vrot.lane.b32.xlu0 %v1056_v39, %s4785_s19  ;;  %1095 = vrot.lane.b32.xlu1 %v1088_v44, %s4784_s17  ;;  %s5990_s17 = scalar_lea.vmem %s6158_s8, %s4244_s14 }
  0x64   : > { %1075 = vrot.lane.b32.xlu0 %v1068_v45, %s4785_s19  ;;  %v1765_v45 = vsel %vm1158_vm0, %v4751_v38, 0 }
  0x86   : > { %v908_v47 = vpop.permute.xlu1 %907 }
  0x8a   : > { %v827_v48 = vpop.permute.xlu0 %826  ;;  %v910_v49 = vpop.permute.xlu1 %909 }
  0x8b   : > { %v941_v51 = vsel %vm923_vm3, %v4881_v3, %v827_v48 }
  0x8c   : > { %v5121_v52 = vsel %vm956_vm4, %v941_v51, %v908_v47  ;;  %v4754_v47 = vld [vmem:[%s6152_s2 + $0x18] sm:$0xff]  }
  0x8d   : > { %4414 = vmatprep.mubr.msk.bf16.mxu1 %vm1125_vm5, %v5121_v52 }
  0x8e   : > { %v829_v54 = vpop.permute.xlu0 %828  ;;  %v833_v58 = vpop.permute.xlu1 %832 }
  0x8f   : > { %v943_v56 = vsel %vm923_vm3, %v4887_v5, %v829_v54  ;;  %v947_v61 = vsel %vm923_vm3, %v4900_v20, %v833_v58 }
  0x90   : > { %v5128_v59 = vsel %vm956_vm4, %v943_v56, %v910_v49 }
  0x91   : > { %4415 = vmatmul.mubr.msk.bf16.vlgmr.msra.gmra.mxu1 %vm1125_vm5, %v5128_v59 }
  0x92   : > { %4431 = vmatpush3.bf16.msra.mxu1 %v4860_v1  ;;  %v831_v3 = vpop.permute.xlu0 %830  ;;  %v914_v55 = vpop.permute.xlu1 %913 }
  0x93   : > { %4432 = vmatprep.subr.bf16.mxu1 %v4868_v2  ;;  %v945_v63 = vsel %vm923_vm3, %v4907_v28, %v831_v3  ;;  %v5144_v1 = vsel %vm956_vm4, %v947_v61, %v914_v55 }
  0x96   : > { %v912_v5 = vpop.permute.xlu0 %911  ;;  %4433 = vmatpush3.bf16.msra.mxu1 %v4868_v2  ;;  %v837_v7 = vpop.permute.xlu1 %836 }
  0x97   : > { %v5140_v0 = vsel %vm956_vm4, %v945_v63, %v912_v5  ;;  %4438 = vmatprep.subr.bf16.mxu1 %v4786_v17  ;;  %v951_v2 = vsel %vm923_vm3, %v4912_v33, %v837_v7 }
  0x98   : > { %4418 = vmatprep.mubr.msk.bf16.mxu1 %vm1125_vm5, %v5140_v0 }
  0x99   : > { %4419 = vmatmul.mubr.msk.bf16.gmra.mxu1 %vm1125_vm5, %v5144_v1 }
  0x9a   : > { %v835_v20 = vpop.permute.xlu0 %834  ;;  %v918_v28 = vpop.permute.xlu1 %917 }
  0x9b   : > { %v949_v8 = vsel %vm923_vm3, %v4925_v42, %v835_v20  ;;  %v5158_v13 = vsel %vm956_vm4, %v951_v2, %v918_v28 }
  0x9e   : > { %v916_v9 = vpop.permute.xlu0 %915  ;;  %v841_v11 = vpop.permute.xlu1 %840 }
  0x9f   : > { %v5155_v10 = vsel %vm956_vm4, %v949_v8, %v916_v9  ;;  %v955_v33 = vsel %vm923_vm3, %v4940_v60, %v841_v11  ;;  %v4749_v60 = vld [vmem:[%s6152_s2 + $0x14] ss:$0 sps:$4 sm:$0xff]  }
  0xa0   : > { %4422 = vmatprep.mubr.msk.bf16.mxu1 %vm1125_vm5, %v5155_v10  ;;  %v1428_v32 = vsel %vm1158_vm0, %v4749_v60, 0 }
  0xa1   : > { %4423 = vmatmul.mubr.msk.bf16.gmra.mxu1 %vm1125_vm5, %v5158_v13 }
  0xa2   : > { %v839_v14 = vpop.permute.xlu0 %838  ;;  %v922_v15 = vpop.permute.xlu1 %921 }
  0xa3   : > { %v953_v42 = vsel %vm923_vm3, %v4943_v4, %v839_v14  ;;  %v5172_v22 = vsel %vm956_vm4, %v955_v33, %v922_v15 }
  0xa6   : > { %v920_v18 = vpop.permute.xlu0 %919  ;;  %v1072_v21 = vpop.permute.xlu1 %1071 }
  0xa7   : > { %v5169_v19 = vsel %vm956_vm4, %v953_v42, %v920_v18  ;;  %v1100_v4 = vsel %vm923_vm3, %v4960_v16, %v1072_v21 }
  0xa8   : > { %4426 = vmatprep.mubr.msk.bf16.mxu1 %vm1125_vm5, %v5169_v19 }
  0xa9   : > { %4427 = vmatmul.mubr.msk.bf16.gmra.mxu1 %vm1125_vm5, %v5172_v22 }
  0xaa   : > { %v1070_v24 = vpop.permute.xlu0 %1069  ;;  %v1092_v25 = vpop.permute.xlu1 %1091 }
  0xab   : > { %v1098_v26 = vsel %vm923_vm3, %v4970_v29, %v1070_v24  ;;  %v5190_v35 = vsel %vm956_vm4, %v1100_v4, %v1092_v25  ;;  %v4750_v29 = vld [vmem:[%s6152_s2 + $0xc] sm:$0xff]  }
  0xae   : > { %v1090_v27 = vpop.permute.xlu0 %1089  ;;  %v894_v34 = vpop.permute.xlu1 %893 }
  0xaf   : > { %v5186_v31 = vsel %vm956_vm4, %v1098_v26, %v1090_v27 }
  0xb0   : > { %4434 = vmatprep.mubr.msk.bf16.mxu1 %vm1125_vm5, %v5186_v31 }
  0xb1   : > { %4435 = vmatmul.mubr.msk.bf16.vlgmr.msra.gmra.mxu1 %vm1125_vm5, %v5190_v35 }
  0xb2   : > { %4439 = vmatpush3.bf16.msra.mxu1 %v1428_v32  ;;  %v813_v16 = vpop.permute.xlu0 %812  ;;  %4442 = vmatprep.mubr.msk.bf16.mxu1 %vm4787_vm6, %v4786_v17  ;;  %v815_v37 = vpop.permute.xlu1 %814 }
  0xb3   : > { %v927_v36 = vsel %vm923_vm3, %v4987_v50, %v813_v16  ;;  %4440 = vmatprep.subr.bf16.mxu1 %v4786_v17  ;;  %v929_v50 = vsel %vm923_vm3, %v4993_v57, %v815_v37 }
  0xb4   : > { %v960_v39 = vsel %vm956_vm4, %v927_v36, %v894_v34 }
  0xb6   : > { %4441 = vmatpush3.bf16.msra.mxu1 %v4750_v29  ;;  %v811_v41 = vpop.permute.xlu0 %810  ;;  %v896_v43 = vpop.permute.xlu1 %895 }
  0xb7   : > { %4672 = vmatprep.subr.msk.bf16.mxu1 %vm1158_vm0, %v4751_v38  ;;  %v925_v44 = vsel %vm923_vm3, %v5000_v62, %v811_v41  ;;  %v962_v49 = vsel %vm956_vm4, %v929_v50, %v896_v43 }
  0xb9   : > { %4443 = vmatmul.mubr.msk.bf16.vlgmr.msra.gmra.mxu1 %vm1125_vm5, %v960_v39 }
  0xba   : > { %4551 = vmatpush3.bf16.msra.mxu1 %v1765_v45  ;;  %v892_v48 = vpop.permute.xlu0 %891  ;;  %4446 = vmatprep.mubr.msk.bf16.mxu1 %vm4787_vm6, %v4786_v17  ;;  %v898_v51 = vpop.permute.xlu1 %897 }
  0xbb   : > { %v958_v62 = vsel %vm956_vm4, %v925_v44, %v892_v48  ;;  %4552 = vmatprep.subr.bf16.mxu1 %v4754_v47 }
  0xbc   : > { %4398 = vmatprep.mubr.msk.bf16.mxu0 %vm1125_vm5, %v958_v62 }
  0xbd   : > { %4399 = vmatmul.mubr.msk.bf16.vlgmr.msra.gmra.mxu0 %vm1125_vm5, %v960_v39 }
  0xbe   : > { %4402 = vmatprep.mubr.msk.bf16.mxu0 %vm1125_vm5, %v962_v49  ;;  %4503 = vmatpush3.bf16.msra.mxu0 %v1428_v32  ;;  %v817_v57 = vpop.permute.xlu0 %816  ;;  %v821_v56 = vpop.permute.xlu1 %820 }
  0xbf   : > { %v931_v54 = vsel %vm923_vm3, %v5019_v30, %v817_v57  ;;  %4504 = vmatprep.subr.bf16.mxu0 %v4786_v17  ;;  %4553 = vmatpush3.bf16.msra.mxu1 %v4754_v47  ;;  %v935_v63 = vsel %vm923_vm3, %v5026_v40, %v821_v56 }
  0xc0   : > { %v964_v58 = vsel %vm956_vm4, %v931_v54, %v898_v51 }
  0xc1   : > { %4447 = vmatmul.mubr.msk.bf16.gmra.mxu1 %vm1125_vm5, %v962_v49 }
  0xc2   : > { %v819_v3 = vpop.permute.xlu0 %818  ;;  %4450 = vmatprep.mubr.msk.bf16.mxu1 %vm4787_vm6, %v4786_v17  ;;  %4505 = vmatpush3.bf16.msra.mxu0 %v4750_v29  ;;  %v902_v55 = vpop.permute.xlu1 %901 }
  0xc3   : > { %4671 = vmatprep.subr.msk.bf16.mxu0 %vm1158_vm0, %v4751_v38  ;;  %v933_v61 = vsel %vm923_vm3, %v5032_v46, %v819_v3  ;;  %v968_v20 = vsel %vm956_vm4, %v935_v63, %v902_v55 }
  0xc5   : > { %4403 = vmatmul.mubr.msk.bf16.gmra.mxu0 %vm1125_vm5, %v964_v58 }
  0xc6   : > { %v900_v30 = vpop.permute.xlu0 %899  ;;  %v825_v7 = vpop.permute.xlu1 %824 }
  0xc7   : > { %v966_v5 = vsel %vm956_vm4, %v933_v61, %v900_v30  ;;  %v939_v40 = vsel %vm923_vm3, %v5054_v12, %v825_v7 }
  0xc8   : > { %4406 = vmatprep.mubr.msk.bf16.mxu0 %vm1125_vm5, %v966_v5 }
  0xc9   : > { %4451 = vmatmul.mubr.msk.bf16.gmra.mxu1 %vm1125_vm5, %v964_v58 }
  0xca   : > { %v823_v28 = vpop.permute.xlu0 %822  ;;  %4454 = vmatprep.mubr.msk.bf16.mxu1 %vm4787_vm6, %v4786_v17  ;;  %v906_v9 = vpop.permute.xlu1 %905 }
  0xcb   : > { %v937_v46 = vsel %vm923_vm3, %v5062_v23, %v823_v28  ;;  %v972_v11 = vsel %vm956_vm4, %v939_v40, %v906_v9 }
  0xcd   : > { %4407 = vmatmul.mubr.msk.bf16.gmra.mxu0 %vm1125_vm5, %v968_v20 }
  0xce   : > { %v904_v2 = vpop.permute.xlu0 %903  ;;  %v1094_v14 = vpop.permute.xlu1 %1093 }
  0xcf   : > { %v970_v8 = vsel %vm956_vm4, %v937_v46, %v904_v2 }
  0xd0   : > { %4410 = vmatprep.mubr.msk.bf16.mxu0 %vm1125_vm5, %v970_v8 }
  0xd1   : > { %4455 = vmatmul.mubr.msk.bf16.gmra.mxu1 %vm1125_vm5, %v966_v5 }
  0xd2   : > { %4458 = vmatprep.mubr.msk.bf16.mxu1 %vm4787_vm6, %v4786_v17  ;;  %v1074_v12 = vpop.permute.xlu0 %1073 }
  0xd3   : > { %v1102_v23 = vsel %vm923_vm3, %v5082_v53, %v1074_v12 }
  0xd4   : > { %v1110_v15 = vsel %vm956_vm4, %v1102_v23, %v1094_v14 }
  0xd5   : > { %4411 = vmatmul.mubr.msk.bf16.gmra.mxu0 %vm1125_vm5, %v972_v11 }
  0xd6   : > { %4506 = vmatprep.mubr.msk.bf16.mxu0 %vm4787_vm6, %v4786_v17  ;;  %v1076_v53 = vpop.permute.xlu0 %1075 }
  0xd9   : > { %4459 = vmatmul.mubr.msk.bf16.gmra.mxu1 %vm1125_vm5, %v968_v20 }
  0xda   : > { %4462 = vmatprep.mubr.msk.bf16.mxu1 %vm4787_vm6, %v4786_v17 }
  0xdd   : > { %4507 = vmatmul.mubr.msk.bf16.vlgmr.msra.gmra.mxu0 %vm1125_vm5, %v5186_v31 }
  0xde   : > { %4519 = vmatpush3.bf16.msra.mxu0 %v1765_v45  ;;  %4510 = vmatprep.mubr.msk.bf16.mxu0 %vm4787_vm6, %v4786_v17 }
  0xdf   : > { %4520 = vmatprep.subr.bf16.mxu0 %v4754_v47 }
  0xe1   : > { %4463 = vmatmul.mubr.msk.bf16.gmra.mxu1 %vm1125_vm5, %v970_v8 }
  0xe2   : > { %4466 = vmatprep.mubr.msk.bf16.mxu1 %vm4787_vm6, %v4786_v17  ;;  %4521 = vmatpush3.bf16.msra.mxu0 %v4754_v47 }
  0xe5   : > { %4511 = vmatmul.mubr.msk.bf16.gmra.mxu0 %vm1125_vm5, %v5190_v35 }
  0xe6   : > { %4514 = vmatprep.mubr.msk.bf16.mxu0 %vm4787_vm6, %v4786_v17 }
  0xe9   : > { %4467 = vmatmul.mubr.msk.bf16.gmra.mxu1 %vm1125_vm5, %v972_v11 }
  0xea   : > { %4470 = vmatprep.mubr.msk.bf16.mxu1 %vm4787_vm6, %v4786_v17 }
  0xed   : > { %4515 = vmatmul.mubr.msk.bf16.gmra.mxu0 %vm1125_vm5, %v1110_v15 }
  0xee   : > { %4522 = vmatprep.mubr.msk.bf16.mxu0 %vm1125_vm5, %v962_v49 }
  0xf1   : > { %4471 = vmatmul.mubr.msk.bf16.gmra.mxu1 %vm1125_vm5, %v5121_v52 }
  0xf2   : > { %4474 = vmatprep.mubr.msk.bf16.mxu1 %vm4787_vm6, %v4786_v17 }
  0xf5   : > { %4523 = vmatmul.mubr.msk.bf16.vlgmr.msra.gmra.mxu0 %vm1125_vm5, %v964_v58 }
  0xf6   : > { %4526 = vmatprep.mubr.msk.bf16.mxu0 %vm1125_vm5, %v966_v5 }
  0xf9   : > { %4475 = vmatmul.mubr.msk.bf16.gmra.mxu1 %vm1125_vm5, %v5128_v59 }
  0xfa   : > { %4478 = vmatprep.mubr.msk.bf16.mxu1 %vm4787_vm6, %v4786_v17 }
  0xfd   : > { %4527 = vmatmul.mubr.msk.bf16.gmra.mxu0 %vm1125_vm5, %v968_v20 }
  0xfe   : > { %4530 = vmatprep.mubr.msk.bf16.mxu0 %vm1125_vm5, %v970_v8 }
 0x101   : > { %4479 = vmatmul.mubr.msk.bf16.gmra.mxu1 %vm1125_vm5, %v5140_v0 }
 0x102   : > { %4482 = vmatprep.mubr.msk.bf16.mxu1 %vm4787_vm6, %v4786_v17 }
 0x105   : > { %4531 = vmatmul.mubr.msk.bf16.gmra.mxu0 %vm1125_vm5, %v972_v11 }
 0x106   : > { %4534 = vmatprep.mubr.msk.bf16.mxu0 %vm1125_vm5, %v5121_v52  ;;  %v1104_v52 = vsel %vm923_vm3, %v5091_v6, %v1076_v53 }
 0x109   : > { %4483 = vmatmul.mubr.msk.bf16.gmra.mxu1 %vm1125_vm5, %v5144_v1 }
 0x10a   : > { %4486 = vmatprep.mubr.msk.bf16.mxu1 %vm4787_vm6, %v4786_v17 }
 0x10d   : > { %4535 = vmatmul.mubr.msk.bf16.gmra.mxu0 %vm1125_vm5, %v5128_v59  ;;  %v1096_v59 = vpop.permute.xlu1 %1095 }
 0x10e   : > { %4538 = vmatprep.mubr.msk.bf16.mxu0 %vm1125_vm5, %v5140_v0 }
 0x111   : > { %4487 = vmatmul.mubr.msk.bf16.gmra.mxu1 %vm1125_vm5, %v5155_v10 }
 0x112   : > { %4490 = vmatprep.mubr.msk.bf16.mxu1 %vm4787_vm6, %v4786_v17 }
 0x115   : > { %4539 = vmatmul.mubr.msk.bf16.gmra.mxu0 %vm1125_vm5, %v5144_v1 }
 0x116   : > { %4542 = vmatprep.mubr.msk.bf16.mxu0 %vm1125_vm5, %v5155_v10 }
 0x119   : > { %4491 = vmatmul.mubr.msk.bf16.gmra.mxu1 %vm1125_vm5, %v5158_v13 }
 0x11a   : > { %4494 = vmatprep.mubr.msk.bf16.mxu1 %vm4787_vm6, %v4786_v17 }
 0x11d   : > { %4543 = vmatmul.mubr.msk.bf16.gmra.mxu0 %vm1125_vm5, %v5158_v13 }
 0x11e   : > { %4546 = vmatprep.mubr.msk.bf16.mxu0 %vm1125_vm5, %v5169_v19 }
 0x121   : > { %4495 = vmatmul.mubr.msk.bf16.gmra.mxu1 %vm1125_vm5, %v5169_v19 }
 0x122   : > { %4498 = vmatprep.mubr.msk.bf16.mxu1 %vm4787_vm6, %v4786_v17  ;;  %v1112_v17 = vsel %vm956_vm4, %v1104_v52, %v1096_v59 }
 0x125   : > { %4547 = vmatmul.mubr.msk.bf16.gmra.mxu0 %vm1125_vm5, %v5172_v22 }
 0x129   : > { %4499 = vmatmul.mubr.msk.bf16.gmra.mxu1 %vm1125_vm5, %v5172_v22 }
 0x12a   : > { %4554 = vmatprep.mubr.msk.bf16.mxu1 %vm1125_vm5, %v5186_v31 }
 0x131   : > { %4555 = vmatmul.mubr.msk.bf16.vlgmr.msra.gmra.mxu1 %vm1125_vm5, %v5190_v35 }
 0x132   : > { %4558 = vmatprep.mubr.msk.bf16.mxu1 %vm1125_vm5, %v1110_v15 }
 0x139   : > { %4559 = vmatmul.mubr.msk.bf16.gmra.mxu1 %vm1125_vm5, %v1112_v17 }
 0x151   : > { %v4416_v0 = vpop.f32.mrf.mxu1 }
 0x152   : > { %1395 = vst.msk [vmem:[#allocation2 + $0x90] sm:$0xff] %vm1376_vm7, %v4416_v0 }
 0x153   : > { %v1260_v1 = vpop.f32.mrf.mxu1 }
 0x154   : > { %1393 = vst.msk [vmem:[#allocation2 + $0x80] sm:$0xff] %vm1376_vm7, %v1260_v1 }
 0x155   : > { %v4417_v10 = vpop.f32.mrf.mxu1 }
 0x156   : > { %1396 = vst.msk [vmem:[#allocation2 + $0x98] sm:$0xff] %vm1376_vm7, %v4417_v10 }
 0x157   : > { %v1263_v13 = vpop.f32.mrf.mxu1 }
 0x158   : > { %1394 = vst.msk [vmem:[#allocation2 + $0x88] sm:$0xff] %vm1376_vm7, %v1263_v13 }
 0x159   : > { %v4420_v33 = vpop.f32.mrf.mxu1 }
 0x15a   : > { %1399 = vst.msk [vmem:[#allocation2 + $0xb0] sm:$0xff] %vm1376_vm7, %v4420_v33 }
 0x15b   : > { %v1276_v6 = vpop.f32.mrf.mxu1 }
 0x15c   : > { %1397 = vst.msk [vmem:[#allocation2 + $0xa0] sm:$0xff] %vm1376_vm7, %v1276_v6 }
 0x15d   : > { %v4421_v42 = vpop.f32.mrf.mxu1 }
 0x15e   : > { %1400 = vst.msk [vmem:[#allocation2 + $0xb8] sm:$0xff] %vm1376_vm7, %v4421_v42 }
 0x15f   : > { %v1279_v18 = vpop.f32.mrf.mxu1 }
 0x160   : > { %1398 = vst.msk [vmem:[#allocation2 + $0xa8] sm:$0xff] %vm1376_vm7, %v1279_v18 }
 0x161   : > { %v4424_v19 = vpop.f32.mrf.mxu1 }
 0x162   : > { %1403 = vst.msk [vmem:[#allocation2 + $0xd0] sm:$0xff] %vm1376_vm7, %v4424_v19 }
 0x163   : > { %v1292_v21 = vpop.f32.mrf.mxu1 }
 0x164   : > { %1401 = vst.msk [vmem:[#allocation2 + $0xc0] sm:$0xff] %vm1376_vm7, %v1292_v21 }
 0x165   : > { %v4425_v22 = vpop.f32.mrf.mxu1 }
 0x166   : > { %1404 = vst.msk [vmem:[#allocation2 + $0xd8] sm:$0xff] %vm1376_vm7, %v4425_v22 }
 0x167   : > { %v1295_v24 = vpop.f32.mrf.mxu1 }
 0x168   : > { %1402 = vst.msk [vmem:[#allocation2 + $0xc8] sm:$0xff] %vm1376_vm7, %v1295_v24 }
 0x169   : > { %v4428_v25 = vpop.f32.mrf.mxu1 }
 0x16a   : > { %1407 = vst.msk [vmem:[#allocation2 + $0xf0] sm:$0xff] %vm1376_vm7, %v4428_v25 }
 0x16b   : > { %v1308_v60 = vpop.f32.mrf.mxu1 }
 0x16c   : > { %1405 = vst.msk [vmem:[#allocation2 + $0xe0] sm:$0xff] %vm1376_vm7, %v1308_v60 }
 0x16d   : > { %v4429_v4 = vpop.f32.mrf.mxu1 }
 0x16e   : > { %1408 = vst.msk [vmem:[#allocation2 + $0xf8] sm:$0xff] %vm1376_vm7, %v4429_v4 }
 0x16f   : > { %v1311_v26 = vpop.f32.mrf.mxu1 }
 0x170   : > { %1406 = vst.msk [vmem:[#allocation2 + $0xe8] sm:$0xff] %vm1376_vm7, %v1311_v26 }
 0x171   : > { %v4436_v27 = vpop.f32.mrf.mxu1  ;;  %v1733_v24 = vld [vmem:[#allocation2 + $0xf0] sm:$0xff] }
 0x172   : > { %1412 = vst.msk [vmem:[#allocation2 + $0x110] sm:$0xff] %vm1376_vm7, %v4436_v27 }
 0x173   : > { %v1361_v31 = vpop.f32.mrf.mxu1 }
 0x174   : > { %1410 = vst.msk [vmem:[#allocation2 + $0x100] sm:$0xff] %vm1376_vm7, %v1361_v31 }
 0x175   : > { %v4437_v32 = vpop.f32.mrf.mxu1 }
 0x176   : > { %1413 = vst.msk [vmem:[#allocation2 + $0x118] sm:$0xff] %vm1376_vm7, %v4437_v32 }
 0x177   : > { %v1364_v34 = vpop.f32.mrf.mxu1 }
 0x178   : > { %1411 = vst.msk [vmem:[#allocation2 + $0x108] sm:$0xff] %vm1376_vm7, %v1364_v34  ;;  %v1734_v34 = vld [vmem:[#allocation2 + $0xf8] sm:$0xff] }
 0x179   : > { %v1464_v35 = vpop.f32.mrf.mxu1 }
 0x17b   : > { %v4444_v16 = vpop.f32.mrf.mxu1 }
 0x17d   : > { %v4400_v29 = vpop.f32.mrf.mxu0  ;;  %v1467_v36 = vpop.f32.mrf.mxu1 }
 0x17e   : > { %1379 = vst.msk [vmem:[#allocation2 + $0x10] sm:$0xff] %vm1376_vm7, %v4400_v29 }
 0x17f   : > { %v1196_v37 = vpop.f32.mrf.mxu0  ;;  %v4445_v38 = vpop.f32.mrf.mxu1 }
 0x180   : > { %1377 = vst.msk [vmem:[#allocation2] sm:$0xff] %vm1376_vm7, %v1196_v37 }
 0x181   : > { %v4401_v39 = vpop.f32.mrf.mxu0  ;;  %v1472_v41 = vpop.f32.mrf.mxu1 }
 0x182   : > { %1380 = vst.msk [vmem:[#allocation2 + $0x18] sm:$0xff] %vm1376_vm7, %v4401_v39 }
 0x183   : > { %v1199_v43 = vpop.f32.mrf.mxu0  ;;  %v4448_v44 = vpop.f32.mrf.mxu1 }
 0x184   : > { %1378 = vst.msk [vmem:[#allocation2 + $0x8] sm:$0xff] %vm1376_vm7, %v1199_v43 }
 0x185   : > { %v1644_v50 = vld [vmem:[#allocation2 + $0x10] sm:$0xff]  ;;  %v4404_v45 = vpop.f32.mrf.mxu0  ;;  %v1475_v47 = vpop.f32.mrf.mxu1 }
 0x186   : > { %v1674_v48 = vadd.f32 %v1644_v50, %v1472_v41  ;;  %1383 = vst.msk [vmem:[#allocation2 + $0x30] sm:$0xff] %vm1376_vm7, %v4404_v45  ;;  %v1735_v41 = vld [vmem:[#allocation2 + $0x100] sm:$0xff] }
 0x187   : > { %v1642_v49 = vld [vmem:[#allocation2] sm:$0xff]  ;;  %v1212_v62 = vpop.f32.mrf.mxu0  ;;  %v4449_v51 = vpop.f32.mrf.mxu1 }
 0x188   : > { %v1672_v57 = vadd.f32 %v1642_v49, %v1464_v35  ;;  %1704 = vst.msk [vmem:[#allocation2 + $0x10] sm:$0xff] %vm1376_vm7, %v1674_v48  ;;  %1381 = vst.msk [vmem:[#allocation2 + $0x20] sm:$0xff] %vm1376_vm7, %v1212_v62  ;;  %v1736_v62 = vld [vmem:[#allocation2 + $0x108] sm:$0xff] }
 0x189   : > { %v1645_v54 = vld [vmem:[#allocation2 + $0x18] sm:$0xff]  ;;  %v4405_v56 = vpop.f32.mrf.mxu0  ;;  %v1480_v58 = vpop.f32.mrf.mxu1 }
 0x18a   : > { %1702 = vst.msk [vmem:[#allocation2] sm:$0xff] %vm1376_vm7, %v1672_v57  ;;  %v1675_v3 = vadd.f32 %v1645_v54, %v1475_v47  ;;  %1384 = vst.msk [vmem:[#allocation2 + $0x38] sm:$0xff] %vm1376_vm7, %v4405_v56 }
 0x18b   : > { %v1643_v55 = vld [vmem:[#allocation2 + $0x8] sm:$0xff]  ;;  %v1215_v61 = vpop.f32.mrf.mxu0  ;;  %v4452_v30 = vpop.f32.mrf.mxu1 }
 0x18c   : > { %v1673_v63 = vadd.f32 %v1643_v55, %v1467_v36  ;;  %1705 = vst.msk [vmem:[#allocation2 + $0x18] sm:$0xff] %vm1376_vm7, %v1675_v3  ;;  %1382 = vst.msk [vmem:[#allocation2 + $0x28] sm:$0xff] %vm1376_vm7, %v1215_v61  ;;  %v1737_v61 = vld [vmem:[#allocation2 + $0x110] sm:$0xff] }
 0x18d   : > { %v4408_v5 = vpop.f32.mrf.mxu0  ;;  %v1483_v7 = vpop.f32.mrf.mxu1  ;;  %v1648_v2 = vld [vmem:[#allocation2 + $0x30] sm:$0xff] }
 0x18e   : > { %1703 = vst.msk [vmem:[#allocation2 + $0x8] sm:$0xff] %vm1376_vm7, %v1673_v63  ;;  %1387 = vst.msk [vmem:[#allocation2 + $0x50] sm:$0xff] %vm1376_vm7, %v4408_v5 }
 0x18f   : > { %v1646_v20 = vld [vmem:[#allocation2 + $0x20] sm:$0xff]  ;;  %v1228_v28 = vpop.f32.mrf.mxu0  ;;  %v4453_v46 = vpop.f32.mrf.mxu1 }
 0x190   : > { %v1676_v40 = vadd.f32 %v1646_v20, %v1480_v58  ;;  %1385 = vst.msk [vmem:[#allocation2 + $0x40] sm:$0xff] %vm1376_vm7, %v1228_v28 }
 0x191   : > { %v4409_v8 = vpop.f32.mrf.mxu0  ;;  %v1488_v9 = vpop.f32.mrf.mxu1  ;;  %v1649_v59 = vld [vmem:[#allocation2 + $0x38] sm:$0xff] }
 0x192   : > { %1706 = vst.msk [vmem:[#allocation2 + $0x20] sm:$0xff] %vm1376_vm7, %v1676_v40  ;;  %1388 = vst.msk [vmem:[#allocation2 + $0x58] sm:$0xff] %vm1376_vm7, %v4409_v8  ;;  %v1678_v11 = vadd.f32 %v1648_v2, %v1488_v9  ;;  %v1738_v2 = vld [vmem:[#allocation2 + $0x118] sm:$0xff] }
 0x193   : > { %v1647_v12 = vld [vmem:[#allocation2 + $0x28] sm:$0xff]  ;;  %v1231_v23 = vpop.f32.mrf.mxu0  ;;  %v4456_v14 = vpop.f32.mrf.mxu1 }
 0x194   : > { %v1677_v15 = vadd.f32 %v1647_v12, %v1483_v7  ;;  %1708 = vst.msk [vmem:[#allocation2 + $0x30] sm:$0xff] %vm1376_vm7, %v1678_v11  ;;  %1386 = vst.msk [vmem:[#allocation2 + $0x48] sm:$0xff] %vm1376_vm7, %v1231_v23 }
 0x195   : > { %v4412_v53 = vpop.f32.mrf.mxu0  ;;  %v1491_v52 = vpop.f32.mrf.mxu1  ;;  %v1652_v31 = vld [vmem:[#allocation2 + $0x50] sm:$0xff] }
 0x196   : > { %1707 = vst.msk [vmem:[#allocation2 + $0x28] sm:$0xff] %vm1376_vm7, %v1677_v15  ;;  %1391 = vst.msk [vmem:[#allocation2 + $0x70] sm:$0xff] %vm1376_vm7, %v4412_v53  ;;  %v1679_v17 = vadd.f32 %v1649_v59, %v1491_v52  ;;  %v1981_v15 = vld [vmem:[#allocation2 + $0x10] sm:$0xff] }
 0x197   : > { %v1244_v0 = vpop.f32.mrf.mxu0  ;;  %v4457_v1 = vpop.f32.mrf.mxu1  ;;  %v1650_v33 = vld [vmem:[#allocation2 + $0x40] sm:$0xff] }
 0x198   : > { %1709 = vst.msk [vmem:[#allocation2 + $0x38] sm:$0xff] %vm1376_vm7, %v1679_v17  ;;  %1389 = vst.msk [vmem:[#allocation2 + $0x60] sm:$0xff] %vm1376_vm7, %v1244_v0  ;;  %v1979_v0 = vld [vmem:[#allocation2] sm:$0xff] }
 0x199   : > { %v4413_v10 = vpop.f32.mrf.mxu0  ;;  %v1496_v13 = vpop.f32.mrf.mxu1  ;;  %v1653_v38 = vld [vmem:[#allocation2 + $0x58] sm:$0xff] }
 0x19a   : > { %1392 = vst.msk [vmem:[#allocation2 + $0x78] sm:$0xff] %vm1376_vm7, %v4413_v10  ;;  %v1680_v6 = vadd.f32 %v1650_v33, %v1496_v13  ;;  %v1658_v13 = vld [vmem:[#allocation2 + $0x80] sm:$0xff] }
 0x19b   : > { %v1247_v42 = vpop.f32.mrf.mxu0  ;;  %v4460_v18 = vpop.f32.mrf.mxu1  ;;  %v1651_v21 = vld [vmem:[#allocation2 + $0x48] sm:$0xff] }
 0x19c   : > { %1710 = vst.msk [vmem:[#allocation2 + $0x40] sm:$0xff] %vm1376_vm7, %v1680_v6  ;;  %1390 = vst.msk [vmem:[#allocation2 + $0x68] sm:$0xff] %vm1376_vm7, %v1247_v42  ;;  %v1982_v6 = vld [vmem:[#allocation2 + $0x18] sm:$0xff] }
 0x19d   : > { %v1499_v19 = vpop.f32.mrf.mxu1  ;;  %v1619_v22 = vpop.f32.mrf.mxu0  ;;  %v1656_v28 = vld [vmem:[#allocation2 + $0x70] sm:$0xff] }
 0x19e   : > { %v1681_v25 = vadd.f32 %v1651_v21, %v1499_v19  ;;  %v1739_v60 = vadd.f32 %v1733_v24, %v1619_v22  ;;  %v1980_v22 = vld [vmem:[#allocation2 + $0x8] sm:$0xff] }
 0x19f   : > { %v4461_v4 = vpop.f32.mrf.mxu1  ;;  %v4508_v26 = vpop.f32.mrf.mxu0  ;;  %v1654_v48 = vld [vmem:[#allocation2 + $0x60] sm:$0xff] }
 0x1a0   : > { %1711 = vst.msk [vmem:[#allocation2 + $0x48] sm:$0xff] %vm1376_vm7, %v1681_v25  ;;  %1745 = vst.msk [vmem:[#allocation2 + $0xf0] sm:$0xff] %vm1376_vm7, %v1739_v60  ;;  %v4755_v25 = vld [vmem:[%s6155_s5 + $0x8] sm:$0x3f]  }
 0x1a1   : > { %v1504_v27 = vpop.f32.mrf.mxu1  ;;  %v1622_v32 = vpop.f32.mrf.mxu0  ;;  %v1657_v23 = vld [vmem:[#allocation2 + $0x78] sm:$0xff]  ;;  %v1659_v4 = vld [vmem:[#allocation2 + $0x88] sm:$0xff]  ;;  %4673 = vmatprep.subr.msk.bf16.mxu0 %vm3104_vm8, %v4755_v25 }
 0x1a2   : > { %v1682_v35 = vadd.f32 %v1652_v31, %v1504_v27  ;;  %v1740_v16 = vadd.f32 %v1734_v34, %v1622_v32  ;;  %v1985_v27 = vld [vmem:[#allocation2 + $0x30] sm:$0xff]  ;;  %v5408_v31 = vld [vmem:[%s6153_s3] ss:$0 sm:$0xff] }
 0x1a3   : > { %v4464_v29 = vpop.f32.mrf.mxu1  ;;  %v4509_v36 = vpop.f32.mrf.mxu0  ;;  %v1655_v3 = vld [vmem:[#allocation2 + $0x68] sm:$0xff] }
 0x1a4   : > { %1712 = vst.msk [vmem:[#allocation2 + $0x50] sm:$0xff] %vm1376_vm7, %v1682_v35  ;;  %1746 = vst.msk [vmem:[#allocation2 + $0xf8] sm:$0xff] %vm1376_vm7, %v1740_v16  ;;  %v3106_v35 = vsel %vm3104_vm8, %v4755_v25, 0  ;;  %v1983_v36 = vld [vmem:[#allocation2 + $0x20] sm:$0xff] }
 0x1a5   : > { %v1507_v37 = vpop.f32.mrf.mxu1  ;;  %v1627_v39 = vpop.f32.mrf.mxu0  ;;  %4563 = vmatpush3.bf16.msra.mxu0 %v3106_v35 }
 0x1a6   : > { %v1683_v43 = vadd.f32 %v1653_v38, %v1507_v37  ;;  %v1741_v44 = vadd.f32 %v1735_v41, %v1627_v39 }
 0x1a7   : > { %v4465_v50 = vpop.f32.mrf.mxu1  ;;  %v4512_v45 = vpop.f32.mrf.mxu0 }
 0x1a8   : > { %1713 = vst.msk [vmem:[#allocation2 + $0x58] sm:$0xff] %vm1376_vm7, %v1683_v43  ;;  %1747 = vst.msk [vmem:[#allocation2 + $0x100] sm:$0xff] %vm1376_vm7, %v1741_v44  ;;  %v1660_v43 = vld [vmem:[#allocation2 + $0x90] sm:$0xff]  ;;  %v1986_v50 = vld [vmem:[#allocation2 + $0x38] sm:$0xff] }
 0x1a9   : > { %v1512_v47 = vpop.f32.mrf.mxu1  ;;  %v1630_v49 = vpop.f32.mrf.mxu0  ;;  %v5419_v45 = vld [vmem:[%s6154_s4] ss:$0 sm:$0xff] }
 0x1aa   : > { %v1684_v51 = vadd.f32 %v1654_v48, %v1512_v47  ;;  %v1742_v57 = vadd.f32 %v1736_v62, %v1630_v49 }
 0x1ab   : > { %v4468_v54 = vpop.f32.mrf.mxu1  ;;  %v4513_v56 = vpop.f32.mrf.mxu0 }
 0x1ac   : > { %1714 = vst.msk [vmem:[#allocation2 + $0x60] sm:$0xff] %vm1376_vm7, %v1684_v51  ;;  %1748 = vst.msk [vmem:[#allocation2 + $0x108] sm:$0xff] %vm1376_vm7, %v1742_v57  ;;  %v1984_v51 = vld [vmem:[#allocation2 + $0x28] sm:$0xff] }
 0x1ad   : > { %v1515_v58 = vpop.f32.mrf.mxu1  ;;  %v1635_v55 = vpop.f32.mrf.mxu0 }
 0x1ae   : > { %v1685_v30 = vadd.f32 %v1655_v3, %v1515_v58  ;;  %v1743_v63 = vadd.f32 %v1737_v61, %v1635_v55  ;;  %v1661_v55 = vld [vmem:[#allocation2 + $0x98] sm:$0xff] }
 0x1af   : > { %v4469_v5 = vpop.f32.mrf.mxu1  ;;  %v4516_v7 = vpop.f32.mrf.mxu0 }
 0x1b0   : > { %1715 = vst.msk [vmem:[#allocation2 + $0x68] sm:$0xff] %vm1376_vm7, %v1685_v30  ;;  %1749 = vst.msk [vmem:[#allocation2 + $0x110] sm:$0xff] %vm1376_vm7, %v1743_v63  ;;  %v1989_v30 = vld [vmem:[#allocation2 + $0x50] sm:$0xff] }
 0x1b1   : > { %v1520_v20 = vpop.f32.mrf.mxu1  ;;  %v1638_v46 = vpop.f32.mrf.mxu0 }
 0x1b2   : > { %v1686_v40 = vadd.f32 %v1656_v28, %v1520_v20  ;;  %v1744_v8 = vadd.f32 %v1738_v2, %v1638_v46  ;;  %v1987_v46 = vld [vmem:[#allocation2 + $0x40] sm:$0xff] }
 0x1b3   : > { %v4472_v9 = vpop.f32.mrf.mxu1  ;;  %v4517_v11 = vpop.f32.mrf.mxu0 }
 0x1b4   : > { %1716 = vst.msk [vmem:[#allocation2 + $0x70] sm:$0xff] %vm1376_vm7, %v1686_v40  ;;  %1750 = vst.msk [vmem:[#allocation2 + $0x118] sm:$0xff] %vm1376_vm7, %v1744_v8 }
 0x1b5   : > { %v1523_v12 = vpop.f32.mrf.mxu1  ;;  %v4524_v14 = vpop.f32.mrf.mxu0 }
 0x1b6   : > { %v1687_v53 = vadd.f32 %v1657_v23, %v1523_v12  ;;  %v2009_v52 = vadd.f32 %v4524_v14, %v1981_v15  ;;  %v1662_v23 = vld [vmem:[#allocation2 + $0xa0] sm:$0xff]  ;;  %v1990_v15 = vld [vmem:[#allocation2 + $0x58] sm:$0xff] }
 0x1b7   : > { %v4473_v59 = vpop.f32.mrf.mxu1  ;;  %v1801_v17 = vpop.f32.mrf.mxu0 }
 0x1b8   : > { %1717 = vst.msk [vmem:[#allocation2 + $0x78] sm:$0xff] %vm1376_vm7, %v1687_v53  ;;  %2037 = vst.msk [vmem:[#allocation2 + $0x10] sm:$0xff] %vm1376_vm7, %v2009_v52  ;;  %v2007_v1 = vadd.f32 %v1979_v0, %v1801_v17 }
 0x1b9   : > { %v1528_v10 = vpop.f32.mrf.mxu1  ;;  %v4525_v33 = vpop.f32.mrf.mxu0 }
 0x1ba   : > { %2035 = vst.msk [vmem:[#allocation2] sm:$0xff] %vm1376_vm7, %v2007_v1  ;;  %v1688_v42 = vadd.f32 %v1658_v13, %v1528_v10  ;;  %v2010_v18 = vadd.f32 %v4525_v33, %v1982_v6  ;;  %v1988_v10 = vld [vmem:[#allocation2 + $0x48] sm:$0xff] }
 0x1bb   : > { %v4476_v19 = vpop.f32.mrf.mxu1  ;;  %v1804_v21 = vpop.f32.mrf.mxu0 }
 0x1bc   : > { %1718 = vst.msk [vmem:[#allocation2 + $0x80] sm:$0xff] %vm1376_vm7, %v1688_v42  ;;  %2038 = vst.msk [vmem:[#allocation2 + $0x18] sm:$0xff] %vm1376_vm7, %v2010_v18  ;;  %v2008_v24 = vadd.f32 %v1980_v22, %v1804_v21 }
 0x1bd   : > { %v1531_v60 = vpop.f32.mrf.mxu1  ;;  %v4528_v26 = vpop.f32.mrf.mxu0 }
 0x1be   : > { %2036 = vst.msk [vmem:[#allocation2 + $0x8] sm:$0xff] %vm1376_vm7, %v2008_v24  ;;  %v1689_v32 = vadd.f32 %v1659_v4, %v1531_v60  ;;  %v2013_v34 = vadd.f32 %v4528_v26, %v1985_v27  ;;  %v1663_v24 = vld [vmem:[#allocation2 + $0xa8] sm:$0xff]  ;;  %v1993_v60 = vld [vmem:[#allocation2 + $0x70] sm:$0xff] }
 0x1bf   : > { %v4477_v16 = vpop.f32.mrf.mxu1  ;;  %v1817_v29 = vpop.f32.mrf.mxu0  ;;  %v2090_v37 = vld [vmem:[#allocation2 + $0x10] sm:$0xff] }
 0x1c0   : > { %1719 = vst.msk [vmem:[#allocation2 + $0x88] sm:$0xff] %vm1376_vm7, %v1689_v32  ;;  %2041 = vst.msk [vmem:[#allocation2 + $0x30] sm:$0xff] %vm1376_vm7, %v2013_v34  ;;  %v2011_v38 = vadd.f32 %v1983_v36, %v1817_v29  ;;  %v2133_v39 = vmul.f32 %v5408_v31, %v2090_v37  ;;  %v1991_v37 = vld [vmem:[#allocation2 + $0x60] sm:$0xff] }
 0x1c1   : > { %v1536_v41 = vpop.f32.mrf.mxu1  ;;  %v4529_v44 = vpop.f32.mrf.mxu0 }
 0x1c2   : > { %2039 = vst.msk [vmem:[#allocation2 + $0x20] sm:$0xff] %vm1376_vm7, %v2011_v38  ;;  %v1690_v47 = vadd.f32 %v1660_v43, %v1536_v41  ;;  %v2014_v48 = vadd.f32 %v4529_v44, %v1986_v50  ;;  %v2176_v58 = vadd.f32 %v5419_v45, %v2133_v39 }
 0x1c3   : > { %v4480_v49 = vpop.f32.mrf.mxu1  ;;  %v1820_v62 = vpop.f32.mrf.mxu0  ;;  %v2091_v57 = vld [vmem:[#allocation2 + $0x18] sm:$0xff] }
 0x1c4   : > { %1720 = vst.msk [vmem:[#allocation2 + $0x90] sm:$0xff] %vm1376_vm7, %v1690_v47  ;;  %2042 = vst.msk [vmem:[#allocation2 + $0x38] sm:$0xff] %vm1376_vm7, %v2014_v48  ;;  %v2012_v54 = vadd.f32 %v1984_v51, %v1820_v62  ;;  %v2134_v56 = vmul.f32 %v5408_v31, %v2091_v57  ;;  %v2212_v8 = vmax.f32 %v2176_v58, 0.0  ;;  %v1664_v49 = vld [vmem:[#allocation2 + $0xb0] sm:$0xff]  ;;  %v1994_v51 = vld [vmem:[#allocation2 + $0x78] sm:$0xff] }
 0x1c5   : > { %v1539_v3 = vpop.f32.mrf.mxu1  ;;  %v4532_v61 = vpop.f32.mrf.mxu0 }
 0x1c6   : > { %2040 = vst.msk [vmem:[#allocation2 + $0x28] sm:$0xff] %vm1376_vm7, %v2012_v54  ;;  %v1691_v63 = vadd.f32 %v1661_v55, %v1539_v3  ;;  %v2017_v5 = vadd.f32 %v4532_v61, %v1989_v30  ;;  %v2177_v7 = vadd.f32 %v5419_v45, %v2134_v56 }
 0x1c7   : > { %v4481_v20 = vpop.f32.mrf.mxu1  ;;  %v1833_v28 = vpop.f32.mrf.mxu0  ;;  %v2094_v2 = vld [vmem:[#allocation2 + $0x30] sm:$0xff] }
 0x1c8   : > { %1721 = vst.msk [vmem:[#allocation2 + $0x98] sm:$0xff] %vm1376_vm7, %v1691_v63  ;;  %2045 = vst.msk [vmem:[#allocation2 + $0x50] sm:$0xff] %vm1376_vm7, %v2017_v5  ;;  %v2015_v40 = vadd.f32 %v1987_v46, %v1833_v28  ;;  %v2213_v9 = vmax.f32 %v2177_v7, 0.0  ;;  %v2137_v11 = vmul.f32 %v5408_v31, %v2094_v2  ;;  %v1992_v5 = vld [vmem:[#allocation2 + $0x68] sm:$0xff] }
 0x1c9   : > { %v1544_v12 = vpop.f32.mrf.mxu1  ;;  %v4533_v14 = vpop.f32.mrf.mxu0  ;;  %v2092_v53 = vld [vmem:[#allocation2 + $0x20] sm:$0xff] }
 0x1ca   : > { %2043 = vst.msk [vmem:[#allocation2 + $0x40] sm:$0xff] %vm1376_vm7, %v2015_v40  ;;  %v1692_v52 = vadd.f32 %v1662_v23, %v1544_v12  ;;  %v2018_v59 = vadd.f32 %v4533_v14, %v1990_v15  ;;  %v2393_v17 = vpack.c.bf16 %v2213_v9, %v2212_v8  ;;  %v2180_v33 = vadd.f32 %v5419_v45, %v2137_v11  ;;  %v1665_v23 = vld [vmem:[#allocation2 + $0xb8] sm:$0xff] }
 0x1cb   : > { %v4484_v0 = vpop.f32.mrf.mxu1  ;;  %v1836_v1 = vpop.f32.mrf.mxu0  ;;  %v2095_v13 = vld [vmem:[#allocation2 + $0x38] sm:$0xff]  ;;  %v2135_v6 = vmul.f32 %v5408_v31, %v2092_v53  ;;  %v1997_v15 = vld [vmem:[#allocation2 + $0x90] sm:$0xff] }
 0x1cc   : > { %1722 = vst.msk [vmem:[#allocation2 + $0xa0] sm:$0xff] %vm1376_vm7, %v1692_v52  ;;  %2046 = vst.msk [vmem:[#allocation2 + $0x58] sm:$0xff] %vm1376_vm7, %v2018_v59  ;;  %v2016_v42 = vadd.f32 %v1988_v10, %v1836_v1  ;;  %v2418_v18 = vshrl.u32 %v2393_v17, 16  ;;  %v2138_v21 = vmul.f32 %v5408_v31, %v2095_v13  ;;  %v2421_v4 = vshll.u32 %v2393_v17, 16 }
 0x1cd   : > { %v1547_v22 = vpop.f32.mrf.mxu1  ;;  %v4536_v25 = vpop.f32.mrf.mxu0  ;;  %v2093_v26 = vld [vmem:[#allocation2 + $0x28] sm:$0xff]  ;;  %v2178_v27 = vadd.f32 %v5419_v45, %v2135_v6  ;;  %v2216_v38 = vmax.f32 %v2180_v33, 0.0 }
 0x1ce   : > { %2044 = vst.msk [vmem:[#allocation2 + $0x48] sm:$0xff] %vm1376_vm7, %v2016_v42  ;;  %v1693_v32 = vadd.f32 %v1663_v24, %v1547_v22  ;;  %v2021_v34 = vadd.f32 %v4536_v25, %v1993_v60  ;;  %v2420_v35 = vrot.slane %v2418_v18, 7  ;;  %v2181_v16 = vadd.f32 %v5419_v45, %v2138_v21  ;;  %v1995_v42 = vld [vmem:[#allocation2 + $0x80] sm:$0xff] }
 0x1cf   : > { %v4485_v29 = vpop.f32.mrf.mxu1  ;;  %v1849_v36 = vpop.f32.mrf.mxu0  ;;  %v2136_v39 = vmul.f32 %v5408_v31, %v2093_v26  ;;  %v2098_v41 = vld [vmem:[#allocation2 + $0x50] sm:$0xff]  ;;  %v2214_v54 = vmax.f32 %v2178_v27, 0.0 }
 0x1d0   : > { %1723 = vst.msk [vmem:[#allocation2 + $0xa8] sm:$0xff] %vm1376_vm7, %v1693_v32  ;;  %2049 = vst.msk [vmem:[#allocation2 + $0x70] sm:$0xff] %vm1376_vm7, %v2021_v34  ;;  %v2019_v43 = vadd.f32 %v1991_v37, %v1849_v36  ;;  %v2423_v44 = vor.u32 %v2421_v4, %v2420_v35  ;;  %v2594_v50 = vsel %vm5438_vm11, %v2420_v35, 0  ;;  %v2217_v47 = vmax.f32 %v2181_v16, 0.0  ;;  %v1666_v34 = vld [vmem:[#allocation2 + $0xc0] sm:$0xff]  ;;  %v1998_v16 = vld [vmem:[#allocation2 + $0x98] sm:$0xff] }
 0x1d1   : > { %v1552_v48 = vpop.f32.mrf.mxu1  ;;  %v4537_v62 = vpop.f32.mrf.mxu0  ;;  %v2179_v57 = vadd.f32 %v5419_v45, %v2136_v39  ;;  %v2141_v56 = vmul.f32 %v5408_v31, %v2098_v41  ;;  %v2631_v20 = vshll.u32 %v2594_v50, 16  ;;  %v2903_v46 = vrot.slane %v2594_v50, 1  ;;  %v2096_v27 = vld [vmem:[#allocation2 + $0x40] sm:$0xff] }
 0x1d2   : > { %2047 = vst.msk [vmem:[#allocation2 + $0x60] sm:$0xff] %vm1376_vm7, %v2019_v43  ;;  %v1694_v58 = vadd.f32 %v1664_v49, %v1552_v48  ;;  %v2022_v3 = vadd.f32 %v4537_v62, %v1994_v51  ;;  %v5456_v55 = vsel %vm5438_vm11, 0, %v2423_v44  ;;  %v2395_v61 = vpack.c.bf16 %v2217_v47, %v2216_v38  ;;  %v1996_v48 = vld [vmem:[#allocation2 + $0x88] sm:$0xff] }
 0x1d3   : > { %v4488_v30 = vpop.f32.mrf.mxu1  ;;  %v1852_v63 = vpop.f32.mrf.mxu0  ;;  %v2626_v7 = vshll.u32 %v5456_v55, 16  ;;  %v2902_v28 = vrot.slane %v5456_v55, 1  ;;  %v2099_v2 = vld [vmem:[#allocation2 + $0x58] sm:$0xff]  ;;  %v2624_v8 = vshrl.u32 %v5456_v55, 16  ;;  %v2215_v11 = vmax.f32 %v2179_v57, 0.0 }
 0x1d4   : > { %1724 = vst.msk [vmem:[#allocation2 + $0xb0] sm:$0xff] %vm1376_vm7, %v1694_v58  ;;  %2050 = vst.msk [vmem:[#allocation2 + $0x78] sm:$0xff] %vm1376_vm7, %v2022_v3  ;;  %v2020_v40 = vadd.f32 %v1992_v5, %v1852_v63  ;;  %v2432_v9 = vshrl.u32 %v2395_v61, 16  ;;  %v2435_v52 = vshll.u32 %v2395_v61, 16  ;;  %v2142_v59 = vmul.f32 %v5408_v31, %v2099_v2  ;;  %v1667_v30 = vld [vmem:[#allocation2 + $0xc8] sm:$0xff] }
 0x1d5   : > { %v1555_v12 = vpop.f32.mrf.mxu1  ;;  %v4540_v14 = vpop.f32.mrf.mxu0  ;;  %v2628_v53 = vrot.slane %v2626_v7, 1  ;;  %v2184_v17 = vadd.f32 %v5419_v45, %v2141_v56  ;;  %v2394_v13 = vpack.c.bf16 %v2215_v11, %v2214_v54  ;;  %v2633_v21 = vrot.slane %v2631_v20, 1  ;;  %v2097_v11 = vld [vmem:[#allocation2 + $0x48] sm:$0xff] }
 0x1d6   : > { %2048 = vst.msk [vmem:[#allocation2 + $0x68] sm:$0xff] %vm1376_vm7, %v2020_v40  ;;  %v1695_v0 = vadd.f32 %v1665_v23, %v1555_v12  ;;  %v2025_v1 = vadd.f32 %v4540_v14, %v1997_v15  ;;  %v2434_v10 = vrot.slane %v2432_v9, 7  ;;  %v2904_v22 = vsel %vm842_vm1, %v2902_v28, %v2903_v46  ;;  %v1999_v14 = vld [vmem:[#allocation2 + $0xa0] sm:$0xff] }
 0x1d7   : > { %v4489_v33 = vpop.f32.mrf.mxu1  ;;  %v1865_v6 = vpop.f32.mrf.mxu0  ;;  %v2629_v18 = vor.u32 %v2628_v53, %v2624_v8  ;;  %v2185_v24 = vadd.f32 %v5419_v45, %v2142_v59  ;;  %v2425_v26 = vshrl.u32 %v2394_v13, 16  ;;  %v2428_v37 = vshll.u32 %v2394_v13, 16  ;;  %v2102_v13 = vld [vmem:[#allocation2 + $0x70] sm:$0xff] }
 0x1d8   : > { %1725 = vst.msk [vmem:[#allocation2 + $0xb8] sm:$0xff] %vm1376_vm7, %v1695_v0  ;;  %2053 = vst.msk [vmem:[#allocation2 + $0x90] sm:$0xff] %vm1376_vm7, %v2025_v1  ;;  %v2023_v25 = vadd.f32 %v1995_v42, %v1865_v6  ;;  %v2437_v60 = vor.u32 %v2435_v52, %v2434_v10  ;;  %v2596_v4 = vsel %vm5438_vm11, %v2434_v10, 0  ;;  %v2220_v38 = vmax.f32 %v2184_v17, 0.0  ;;  %v1668_v6 = vld [vmem:[#allocation2 + $0xd0] sm:$0xff] }
 0x1d9   : > { %v1560_v32 = vpop.f32.mrf.mxu1  ;;  %v4541_v35 = vpop.f32.mrf.mxu0  ;;  %v2634_v29 = vsel %vm617_vm2, %v2629_v18, %v2633_v21  ;;  %v2655_v36 = vshll.u32 %v2596_v4, 16  ;;  %v2427_v44 = vrot.slane %v2425_v26, 7  ;;  %v2909_v51 = vrot.slane %v2596_v4, 1 }
 0x1da   : > { %2051 = vst.msk [vmem:[#allocation2 + $0x80] sm:$0xff] %vm1376_vm7, %v2023_v25  ;;  %v1696_v39 = vadd.f32 %v1666_v34, %v1560_v32  ;;  %v2026_v41 = vadd.f32 %v4541_v35, %v1998_v16  ;;  %2829 = vrot.lane.b32.xlu0 %v2634_v29, %s4788_s20  ;;  %v5477_v43 = vsel %vm5438_vm11, 0, %v2437_v60  ;;  %v2139_v57 = vmul.f32 %v5408_v31, %v2096_v27  ;;  %v2000_v16 = vld [vmem:[#allocation2 + $0xa8] sm:$0xff] }
 0x1db   : > { %v4492_v50 = vpop.f32.mrf.mxu1  ;;  %v1868_v47 = vpop.f32.mrf.mxu0  ;;  %v2650_v49 = vshll.u32 %v5477_v43, 16  ;;  %v2908_v62 = vrot.slane %v5477_v43, 1  ;;  %v2430_v56 = vor.u32 %v2428_v37, %v2427_v44  ;;  %v5486_v58 = vsel %vm5438_vm11, %v2427_v44, 0  ;;  %v2001_v5 = vld [vmem:[#allocation2 + $0xb0] sm:$0xff]  ;;  %v2103_v60 = vld [vmem:[#allocation2 + $0x78] sm:$0xff] }
 0x1dc   : > { %1726 = vst.msk [vmem:[#allocation2 + $0xc0] sm:$0xff] %vm1376_vm7, %v1696_v39  ;;  %2054 = vst.msk [vmem:[#allocation2 + $0x98] sm:$0xff] %vm1376_vm7, %v2026_v41  ;;  %v2024_v54 = vadd.f32 %v1996_v48, %v1868_v47  ;;  %v2221_v3 = vmax.f32 %v2185_v24, 0.0  ;;  %v2648_v7 = vshrl.u32 %v5477_v43, 16  ;;  %v2657_v28 = vrot.slane %v2655_v36, 1 }
 0x1dd   : > { %v1563_v61 = vpop.f32.mrf.mxu1  ;;  %v4544_v63 = vpop.f32.mrf.mxu0  ;;  %v2652_v20 = vrot.slane %v2650_v49, 1  ;;  %v2643_v46 = vshll.u32 %v5486_v58, 16  ;;  %v5494_v8 = vsel %vm5438_vm11, 0, %v2430_v56  ;;  %v2910_v52 = vsel %vm842_vm1, %v2908_v62, %v2909_v51  ;;  %v1669_v49 = vld [vmem:[#allocation2 + $0xd8] sm:$0xff] }
 0x1de   : > { %2052 = vst.msk [vmem:[#allocation2 + $0x88] sm:$0xff] %vm1376_vm7, %v2024_v54  ;;  %v1697_v2 = vadd.f32 %v1667_v30, %v1563_v61  ;;  %v2029_v40 = vadd.f32 %v4544_v63, %v2001_v5  ;;  %2955 = vrot.lane.b32.xlu0 %v2904_v22, %s4785_s19  ;;  %v2397_v9 = vpack.c.bf16 %v2221_v3, %v2220_v38  ;;  %v2638_v53 = vshll.u32 %v5494_v8, 16  ;;  %v2100_v30 = vld [vmem:[#allocation2 + $0x60] sm:$0xff] }
 0x1df   : > { %v4493_v12 = vpop.f32.mrf.mxu1  ;;  %v1881_v23 = vpop.f32.mrf.mxu0  ;;  %v2653_v15 = vor.u32 %v2652_v20, %v2648_v7  ;;  %v2906_v59 = vrot.slane %v5486_v58, 1  ;;  %v2636_v0 = vshrl.u32 %v5494_v8, 16  ;;  %v2645_v1 = vrot.slane %v2643_v46, 1  ;;  %v2002_v18 = vld [vmem:[#allocation2 + $0xb8] sm:$0xff] }
 0x1e0   : > { %1727 = vst.msk [vmem:[#allocation2 + $0xc8] sm:$0xff] %vm1376_vm7, %v1697_v2  ;;  %2057 = vst.msk [vmem:[#allocation2 + $0xb0] sm:$0xff] %vm1376_vm7, %v2029_v40  ;;  %v2027_v17 = vadd.f32 %v1999_v14, %v1881_v23  ;;  %v2446_v10 = vshrl.u32 %v2397_v9, 16  ;;  %v2640_v22 = vrot.slane %v2638_v53, 1  ;;  %v2140_v24 = vmul.f32 %v5408_v31, %v2097_v11  ;;  %v2101_v40 = vld [vmem:[#allocation2 + $0x68] sm:$0xff] }
 0x1e1   : > { %v1568_v33 = vpop.f32.mrf.mxu1  ;;  %v4545_v42 = vpop.f32.mrf.mxu0  ;;  %v2658_v21 = vsel %vm617_vm2, %v2653_v15, %v2657_v28  ;;  %v2182_v25 = vadd.f32 %v5419_v45, %v2139_v57  ;;  %v2449_v32 = vshll.u32 %v2397_v9, 16  ;;  %v2905_v36 = vrot.slane %v5494_v8, 1  ;;  %v1670_v15 = vld [vmem:[#allocation2 + $0xe0] sm:$0xff] }
 0x1e2   : > { %2055 = vst.msk [vmem:[#allocation2 + $0xa0] sm:$0xff] %vm1376_vm7, %v2027_v17  ;;  %v1698_v4 = vadd.f32 %v1668_v6, %v1568_v33  ;;  %v2030_v26 = vadd.f32 %v4545_v42, %v2002_v18  ;;  %2833 = vrot.lane.b32.xlu0 %v2658_v21, %s4788_s20  ;;  %v2448_v27 = vrot.slane %v2446_v10, 7  ;;  %v2641_v29 = vor.u32 %v2640_v22, %v2636_v0  ;;  %v5537_v6 = vld [vmem:[%s6155_s5 + $0x10] sm:$0x3f]  }
 0x1e3   : > { %v4496_v34 = vpop.f32.mrf.mxu1  ;;  %v1884_v35 = vpop.f32.mrf.mxu0  ;;  %v2183_v37 = vadd.f32 %v5419_v45, %v2140_v24  ;;  %v2145_v38 = vmul.f32 %v5408_v31, %v2102_v13  ;;  %v2146_v50 = vmul.f32 %v5408_v31, %v2103_v60  ;;  %v2218_v57 = vmax.f32 %v2182_v25, 0.0  ;;  %v2003_v7 = vld [vmem:[#allocation2 + $0xc0] sm:$0xff]  ;;  %4675 = vmatprep.subr.msk.bf16.mxu0 %vm3104_vm8, %v5537_v6 }
 0x1e4   : > { %1728 = vst.msk [vmem:[#allocation2 + $0xd0] sm:$0xff] %vm1376_vm7, %v1698_v4  ;;  %2058 = vst.msk [vmem:[#allocation2 + $0xb8] sm:$0xff] %vm1376_vm7, %v2030_v26  ;;  %v2028_v39 = vadd.f32 %v2000_v16, %v1884_v35  ;;  %v2451_v41 = vor.u32 %v2449_v32, %v2448_v27  ;;  %v2598_v44 = vsel %vm5438_vm11, %v2448_v27, 0  ;;  %v2646_v47 = vsel %vm617_vm2, %v2641_v29, %v2645_v1  ;;  %v2106_v26 = vld [vmem:[#allocation2 + $0x90] sm:$0xff] }
 0x1e5   : > { %v1571_v48 = vpop.f32.mrf.mxu1  ;;  %v4548_v62 = vpop.f32.mrf.mxu0  ;;  %v2679_v51 = vshll.u32 %v2598_v44, 16  ;;  %v2219_v54 = vmax.f32 %v2183_v37, 0.0  ;;  %2831 = vrot.lane.b32.xlu1 %v2646_v47, %s4788_s20  ;;  %v2188_v3 = vadd.f32 %v5419_v45, %v2145_v38  ;;  %v2189_v61 = vadd.f32 %v5419_v45, %v2146_v50  ;;  %v1671_v38 = vld [vmem:[#allocation2 + $0xe8] sm:$0xff] }
 0x1e6   : > { %2056 = vst.msk [vmem:[#allocation2 + $0xa8] sm:$0xff] %vm1376_vm7, %v2028_v39  ;;  %v1699_v56 = vadd.f32 %v1669_v49, %v1571_v48  ;;  %2959 = vrot.lane.b32.xlu0 %v2910_v52, %s4785_s19  ;;  %v5521_v58 = vsel %vm5438_vm11, 0, %v2451_v41  ;;  %v2907_v20 = vsel %vm842_vm1, %v2905_v36, %v2906_v59  ;;  %v2915_v2 = vrot.slane %v2598_v44, 1  ;;  %v2107_v41 = vld [vmem:[#allocation2 + $0x98] sm:$0xff] }
 0x1e7   : > { %v4497_v63 = vpop.f32.mrf.mxu1  ;;  %v1897_v5 = vpop.f32.mrf.mxu0  ;;  %v2674_v28 = vshll.u32 %v5521_v58, 16  ;;  %v2396_v46 = vpack.c.bf16 %v2219_v54, %v2218_v57  ;;  %v2914_v11 = vrot.slane %v5521_v58, 1  ;;  %v2224_v12 = vmax.f32 %v2188_v3, 0.0  ;;  %v2004_v24 = vld [vmem:[#allocation2 + $0xc8] sm:$0xff] }
 0x1e8   : > { %1729 = vst.msk [vmem:[#allocation2 + $0xd8] sm:$0xff] %vm1376_vm7, %v1699_v56  ;;  %v2031_v9 = vadd.f32 %v2003_v7, %v1897_v5  ;;  %v2225_v23 = vmax.f32 %v2189_v61, 0.0  ;;  %v2672_v52 = vshrl.u32 %v5521_v58, 16  ;;  %v2143_v59 = vmul.f32 %v5408_v31, %v2100_v30 }
 0x1e9   : > { %v1576_v14 = vpop.f32.mrf.mxu1  ;;  %v4549_v53 = vpop.f32.mrf.mxu0  ;;  %v2676_v17 = vrot.slane %v2674_v28, 1  ;;  %v2439_v0 = vshrl.u32 %v2396_v46, 16  ;;  %2957 = vrot.lane.b32.xlu1 %v2907_v20, %s4785_s19  ;;  %v2681_v10 = vrot.slane %v2679_v51, 1  ;;  %v2144_v33 = vmul.f32 %v5408_v31, %v2101_v40  ;;  %v2066_v20 = vld [vmem:[#allocation2 + $0xf0] sm:$0xff] }
 0x1ea   : > { %2059 = vst.msk [vmem:[#allocation2 + $0xc0] sm:$0xff] %vm1376_vm7, %v2031_v9  ;;  %v1700_v1 = vadd.f32 %v1670_v15, %v1576_v14  ;;  %v2399_v13 = vpack.c.bf16 %v2225_v23, %v2224_v12  ;;  %v2442_v60 = vshll.u32 %v2396_v46, 16  ;;  %v2186_v4 = vadd.f32 %v5419_v45, %v2143_v59 }
 0x1eb   : > { %v2005_v42 = vld [vmem:[#allocation2 + $0xd0] sm:$0xff]  ;;  %v2677_v18 = vor.u32 %v2676_v17, %v2672_v52  ;;  %v4500_v21 = vpop.f32.mrf.mxu1  ;;  %v1900_v22 = vpop.f32.mrf.mxu0  ;;  %v2441_v25 = vrot.slane %v2439_v0, 7  ;;  %v2916_v34 = vsel %vm842_vm1, %v2914_v11, %v2915_v2  ;;  %v2187_v39 = vadd.f32 %v5419_v45, %v2144_v33 }
 0x1ec   : > { %v2033_v27 = vadd.f32 %v4548_v62, %v2005_v42  ;;  %1730 = vst.msk [vmem:[#allocation2 + $0xe0] sm:$0xff] %vm1376_vm7, %v1700_v1  ;;  %v2032_v32 = vadd.f32 %v2004_v24, %v1900_v22  ;;  %v2460_v35 = vshrl.u32 %v2399_v13, 16  ;;  %v2149_v48 = vmul.f32 %v5408_v31, %v2106_v26  ;;  %v2104_v26 = vld [vmem:[#allocation2 + $0x80] sm:$0xff] }
 0x1ed   : > { %v2682_v16 = vsel %vm617_vm2, %v2677_v18, %v2681_v10  ;;  %v2444_v29 = vor.u32 %v2442_v60, %v2441_v25  ;;  %v2597_v36 = vsel %vm5438_vm11, %v2441_v25, 0  ;;  %v1579_v37 = vpop.f32.mrf.mxu1  ;;  %v2463_v57 = vshll.u32 %v2399_v13, 16  ;;  %v2067_v18 = vld [vmem:[#allocation2 + $0xf8] sm:$0xff] }
 0x1ee   : > { %2061 = vst.msk [vmem:[#allocation2 + $0xd0] sm:$0xff] %vm1376_vm7, %v2033_v27  ;;  %2837 = vrot.lane.b32.xlu0 %v2682_v16, %s4788_s20  ;;  %2060 = vst.msk [vmem:[#allocation2 + $0xc8] sm:$0xff] %vm1376_vm7, %v2032_v32  ;;  %v2667_v44 = vshll.u32 %v2597_v36, 16  ;;  %v1701_v50 = vadd.f32 %v1671_v38, %v1579_v37  ;;  %v2462_v47 = vrot.slane %v2460_v35, 7  ;;  %v2222_v54 = vmax.f32 %v2186_v4, 0.0  ;;  %v2105_v27 = vld [vmem:[#allocation2 + $0x88] sm:$0xff] }
 0x1ef   : > { %v2006_v49 = vld [vmem:[#allocation2 + $0xd8] sm:$0xff]  ;;  %v5554_v62 = vsel %vm5438_vm11, 0, %v2444_v29  ;;  %v4501_v51 = vpop.f32.mrf.mxu1  ;;  %v2223_v56 = vmax.f32 %v2187_v39, 0.0  ;;  %v2912_v30 = vrot.slane %v2597_v36, 1  ;;  %v2150_v63 = vmul.f32 %v5408_v31, %v2107_v41 }
 0x1f0   : > { %v2034_v3 = vadd.f32 %v4549_v53, %v2006_v49  ;;  %v2662_v61 = vshll.u32 %v5554_v62, 16  ;;  %1731 = vst.msk [vmem:[#allocation2 + $0xe8] sm:$0xff] %vm1376_vm7, %v1701_v50  ;;  %v2660_v5 = vshrl.u32 %v5554_v62, 16  ;;  %v2465_v28 = vor.u32 %v2463_v57, %v2462_v47  ;;  %v2110_v51 = vld [vmem:[#allocation2 + $0xb0] sm:$0xff] }
 0x1f1   : > { %v4556_v7 = vpop.f32.mrf.mxu1  ;;  %v2600_v46 = vsel %vm5438_vm11, %v2462_v47, 0  ;;  %v2398_v2 = vpack.c.bf16 %v2223_v56, %v2222_v54  ;;  %v2669_v9 = vrot.slane %v2667_v44, 1  ;;  %v2911_v11 = vrot.slane %v5554_v62, 1 }
 0x1f2   : > { %2062 = vst.msk [vmem:[#allocation2 + $0xd8] sm:$0xff] %vm1376_vm7, %v2034_v3  ;;  %v2664_v40 = vrot.slane %v2662_v61, 1  ;;  %2963 = vrot.lane.b32.xlu0 %v2916_v34, %s4785_s19  ;;  %v2074_v12 = vadd.f32 %v4556_v7, %v2066_v20  ;;  %v5567_v23 = vsel %vm5438_vm11, 0, %v2465_v28  ;;  %v2703_v14 = vshll.u32 %v2600_v46, 16  ;;  %v2070_v61 = vld [vmem:[#allocation2 + $0x110] sm:$0xff]  ;;  %v2068_v20 = vld [vmem:[#allocation2 + $0x100] sm:$0xff] }
 0x1f3   : > { %v1948_v15 = vpop.f32.mrf.mxu1  ;;  %v2064_v53 = vld [vmem:[#allocation2 + $0xe0] sm:$0xff]  ;;  %v2453_v52 = vshrl.u32 %v2398_v2, 16  ;;  %v2921_v17 = vrot.slane %v2600_v46, 1  ;;  %v2696_v59 = vshrl.u32 %v5567_v23, 16  ;;  %v2698_v1 = vshll.u32 %v5567_v23, 16  ;;  %v2111_v46 = vld [vmem:[#allocation2 + $0xb8] sm:$0xff] }
 0x1f4   : > { %v2665_v0 = vor.u32 %v2664_v40, %v2660_v5  ;;  %2082 = vst.msk [vmem:[#allocation2 + $0xf0] sm:$0xff] %vm1376_vm7, %v2074_v12  ;;  %v2456_v10 = vshll.u32 %v2398_v2, 16  ;;  %v2072_v13 = vadd.f32 %v2064_v53, %v1948_v15  ;;  %v2920_v21 = vrot.slane %v5567_v23, 1  ;;  %v2108_v12 = vld [vmem:[#allocation2 + $0xa0] sm:$0xff] }
 0x1f5   : > { %v2455_v33 = vrot.slane %v2453_v52, 7  ;;  %v4557_v42 = vpop.f32.mrf.mxu1  ;;  %v2192_v22 = vadd.f32 %v5419_v45, %v2149_v48  ;;  %v2700_v25 = vrot.slane %v2698_v1, 1  ;;  %v2193_v4 = vadd.f32 %v5419_v45, %v2150_v63 }
 0x1f6   : > { %v2670_v24 = vsel %vm617_vm2, %v2665_v0, %v2669_v9  ;;  %v2075_v60 = vadd.f32 %v4557_v42, %v2067_v18  ;;  %v2913_v32 = vsel %vm842_vm1, %v2911_v11, %v2912_v30  ;;  %v2705_v34 = vrot.slane %v2703_v14, 1  ;;  %2080 = vst.msk [vmem:[#allocation2 + $0xe0] sm:$0xff] %vm1376_vm7, %v2072_v13  ;;  %v2109_v14 = vld [vmem:[#allocation2 + $0xa8] sm:$0xff] }
 0x1f7   : > { %2835 = vrot.lane.b32.xlu1 %v2670_v24, %s4788_s20  ;;  %v2458_v35 = vor.u32 %v2456_v10, %v2455_v33  ;;  %v5581_v16 = vsel %vm5438_vm11, %v2455_v33, 0  ;;  %v1951_v29 = vpop.f32.mrf.mxu1  ;;  %v2065_v36 = vld [vmem:[#allocation2 + $0xe8] sm:$0xff]  ;;  %v2701_v37 = vor.u32 %v2700_v25, %v2696_v59  ;;  %v2228_v41 = vmax.f32 %v2192_v22, 0.0  ;;  %v2071_v59 = vld [vmem:[#allocation2 + $0x118] sm:$0xff] }
 0x1f8   : > { %v2691_v38 = vshll.u32 %v5581_v16, 16  ;;  %2083 = vst.msk [vmem:[#allocation2 + $0xf8] sm:$0xff] %vm1376_vm7, %v2075_v60  ;;  %v2073_v39 = vadd.f32 %v2065_v36, %v1951_v29  ;;  %v2229_v47 = vmax.f32 %v2193_v4, 0.0  ;;  %v2147_v48 = vmul.f32 %v5408_v31, %v2104_v26 }
 0x1f9   : > { %v5587_v44 = vsel %vm5438_vm11, 0, %v2458_v35  ;;  %v4560_v50 = vpop.f32.mrf.mxu1  ;;  %v2148_v49 = vmul.f32 %v5408_v31, %v2105_v27  ;;  %v2706_v57 = vsel %vm617_vm2, %v2701_v37, %v2705_v34  ;;  %v2922_v3 = vsel %vm842_vm1, %v2920_v21, %v2921_v17  ;;  %v2069_v21 = vld [vmem:[#allocation2 + $0x108] sm:$0xff] }
 0x1fa   : > { %v2684_v54 = vshrl.u32 %v5587_v44, 16  ;;  %v2686_v56 = vshll.u32 %v5587_v44, 16  ;;  %2081 = vst.msk [vmem:[#allocation2 + $0xe8] sm:$0xff] %vm1376_vm7, %v2073_v39  ;;  %2841 = vrot.lane.b32.xlu0 %v2706_v57, %s4788_s20  ;;  %v2693_v30 = vrot.slane %v2691_v38, 1  ;;  %v2078_v63 = vadd.f32 %v4560_v50, %v2070_v61  ;;  %v2113_v57 = vld [vmem:[#allocation2 + $0xc8] sm:$0xff]  ;;  %v2112_v61 = vld [vmem:[#allocation2 + $0xc0] sm:$0xff] }
 0x1fb   : > { %2961 = vrot.lane.b32.xlu1 %v2913_v32, %s4785_s19  ;;  %v2401_v5 = vpack.c.bf16 %v2229_v47, %v2228_v41  ;;  %v1964_v7 = vpop.f32.mrf.mxu1  ;;  %v2190_v28 = vadd.f32 %v5419_v45, %v2147_v48  ;;  %v2191_v9 = vadd.f32 %v5419_v45, %v2148_v49  ;;  %v2153_v11 = vmul.f32 %v5408_v31, %v2110_v51 }
 0x1fc   : > { %v2688_v2 = vrot.slane %v2686_v56, 1  ;;  %v2076_v40 = vadd.f32 %v2068_v20, %v1964_v7  ;;  %v2917_v15 = vrot.slane %v5587_v44, 1  ;;  %2086 = vst.msk [vmem:[#allocation2 + $0x110] sm:$0xff] %vm1376_vm7, %v2078_v63  ;;  %v2154_v33 = vmul.f32 %v5408_v31, %v2111_v46 }
 0x1fd   : > { %v2474_v53 = vshrl.u32 %v2401_v5, 16  ;;  %v2477_v52 = vshll.u32 %v2401_v5, 16  ;;  %v2226_v17 = vmax.f32 %v2190_v28, 0.0  ;;  %v4561_v0 = vpop.f32.mrf.mxu1  ;;  %v2227_v10 = vmax.f32 %v2191_v9, 0.0 }
 0x1fe   : > { %v2689_v1 = vor.u32 %v2688_v2, %v2684_v54  ;;  %2084 = vst.msk [vmem:[#allocation2 + $0x100] sm:$0xff] %vm1376_vm7, %v2076_v40  ;;  %v2079_v13 = vadd.f32 %v4561_v0, %v2071_v59  ;;  %2967 = vrot.lane.b32.xlu0 %v2922_v3, %s4785_s19  ;;  %v2196_v22 = vadd.f32 %v5419_v45, %v2153_v11  ;;  %v2918_v29 = vrot.slane %v5581_v16, 1 }
 0x1ff   : > { %v2476_v42 = vrot.slane %v2474_v53, 7  ;;  %v1967_v18 = vpop.f32.mrf.mxu1  ;;  %v2151_v24 = vmul.f32 %v5408_v31, %v2108_v12  ;;  %v2152_v25 = vmul.f32 %v5408_v31, %v2109_v14  ;;  %v2400_v4 = vpack.c.bf16 %v2227_v10, %v2226_v17 }
 0x200   : > { %v2694_v60 = vsel %vm617_vm2, %v2689_v1, %v2693_v30  ;;  %2087 = vst.msk [vmem:[#allocation2 + $0x118] sm:$0xff] %vm1376_vm7, %v2079_v13  ;;  %v2077_v26 = vadd.f32 %v2069_v21, %v1967_v18  ;;  %v2197_v27 = vadd.f32 %v5419_v45, %v2154_v33  ;;  %v2232_v37 = vmax.f32 %v2196_v22, 0.0 }
 0x201   : > { %2839 = vrot.lane.b32.xlu1 %v2694_v60, %s4788_s20  ;;  %v2479_v32 = vor.u32 %v2477_v52, %v2476_v42  ;;  %v2602_v34 = vsel %vm5438_vm11, %v2476_v42, 0  ;;  %v2194_v35 = vadd.f32 %v5419_v45, %v2151_v24  ;;  %v2467_v36 = vshrl.u32 %v2400_v4, 16 }
 0x202   : > { %2085 = vst.msk [vmem:[#allocation2 + $0x108] sm:$0xff] %vm1376_vm7, %v2077_v26  ;;  %v2727_v39 = vshll.u32 %v2602_v34, 16  ;;  %v2233_v41 = vmax.f32 %v2197_v27, 0.0  ;;  %v2195_v50 = vadd.f32 %v5419_v45, %v2152_v25  ;;  %v2919_v47 = vsel %vm842_vm1, %v2917_v15, %v2918_v29  ;;  %v2114_v25 = vld [vmem:[#allocation2 + $0xd0] sm:$0xff] }
 0x203   : > { %v5620_v38 = vsel %vm5438_vm11, 0, %v2479_v32  ;;  %v2469_v49 = vrot.slane %v2467_v36, 7  ;;  %v2470_v51 = vshll.u32 %v2400_v4, 16  ;;  %v2230_v56 = vmax.f32 %v2194_v35, 0.0 }
 0x204   : > { %v2722_v48 = vshll.u32 %v5620_v38, 16  ;;  %v2926_v16 = vrot.slane %v5620_v38, 1  ;;  %v2403_v54 = vpack.c.bf16 %v2233_v41, %v2232_v37  ;;  %v2231_v3 = vmax.f32 %v2195_v50, 0.0  ;;  %v2115_v41 = vld [vmem:[#allocation2 + $0xd8] sm:$0xff] }
 0x205   : > { %2965 = vrot.lane.b32.xlu1 %v2919_v47, %s4785_s19  ;;  %v2720_v30 = vshrl.u32 %v5620_v38, 16  ;;  %v2472_v5 = vor.u32 %v2470_v51, %v2469_v49  ;;  %v2601_v7 = vsel %vm5438_vm11, %v2469_v49, 0  ;;  %v2729_v20 = vrot.slane %v2727_v39, 1 }
 0x206   : > { %v2724_v63 = vrot.slane %v2722_v48, 1  ;;  %v2927_v28 = vrot.slane %v2602_v34, 1  ;;  %v2488_v46 = vshrl.u32 %v2403_v54, 16  ;;  %v2156_v2 = vmul.f32 %v5408_v31, %v2113_v57 }
 0x207   : > { %v5633_v9 = vsel %vm5438_vm11, 0, %v2472_v5  ;;  %v2402_v11 = vpack.c.bf16 %v2231_v3, %v2230_v56  ;;  %v2155_v12 = vmul.f32 %v5408_v31, %v2112_v61  ;;  %v2715_v15 = vshll.u32 %v2601_v7, 16  ;;  %v2118_v3 = vld [vmem:[#allocation2 + $0xf0] sm:$0xff] }
 0x208   : > { %v2725_v40 = vor.u32 %v2724_v63, %v2720_v30  ;;  %v2710_v14 = vshll.u32 %v5633_v9, 16  ;;  %v2928_v53 = vsel %vm842_vm1, %v2926_v16, %v2927_v28  ;;  %v2491_v52 = vshll.u32 %v2403_v54, 16 }
 0x209   : > { %v2708_v0 = vshrl.u32 %v5633_v9, 16  ;;  %v2490_v59 = vrot.slane %v2488_v46, 7  ;;  %v2481_v1 = vshrl.u32 %v2402_v11, 16  ;;  %v2923_v13 = vrot.slane %v5633_v9, 1 }
 0x20a   : > { %v2730_v17 = vsel %vm617_vm2, %v2725_v40, %v2729_v20  ;;  %v2712_v10 = vrot.slane %v2710_v14, 1  ;;  %v2484_v33 = vshll.u32 %v2402_v11, 16  ;;  %v2199_v42 = vadd.f32 %v5419_v45, %v2156_v2  ;;  %v2116_v40 = vld [vmem:[#allocation2 + $0xe0] sm:$0xff] }
 0x20b   : > { %2845 = vrot.lane.b32.xlu0 %v2730_v17, %s4788_s20  ;;  %v2493_v18 = vor.u32 %v2491_v52, %v2490_v59  ;;  %v5645_v21 = vsel %vm5438_vm11, %v2490_v59, 0  ;;  %v2483_v22 = vrot.slane %v2481_v1, 7  ;;  %v2198_v24 = vadd.f32 %v5419_v45, %v2155_v12  ;;  %v4758_v59 = vld [vmem:[%s6153_s3] ss:$0 sm:$0xff] }
 0x20c   : > { %v2713_v60 = vor.u32 %v2712_v10, %v2708_v0  ;;  %v2717_v4 = vrot.slane %v2715_v15, 1  ;;  %v2924_v26 = vrot.slane %v2601_v7, 1  ;;  %v2751_v27 = vshll.u32 %v5645_v21, 16  ;;  %v2119_v7 = vld [vmem:[#allocation2 + $0xf8] sm:$0xff] }
 0x20d   : > { %v5651_v32 = vsel %vm5438_vm11, 0, %v2493_v18  ;;  %v2486_v34 = vor.u32 %v2484_v33, %v2483_v22  ;;  %v5655_v35 = vsel %vm5438_vm11, %v2483_v22, 0  ;;  %v2235_v29 = vmax.f32 %v2199_v42, 0.0 }
 0x20e   : > { %v2718_v36 = vsel %vm617_vm2, %v2713_v60, %v2717_v4  ;;  %v2925_v37 = vsel %vm842_vm1, %v2923_v13, %v2924_v26  ;;  %v2746_v39 = vshll.u32 %v5651_v32, 16  ;;  %v2157_v50 = vmul.f32 %v5408_v31, %v2114_v25  ;;  %v2120_v26 = vld [vmem:[#allocation2 + $0x100] sm:$0xff] }
 0x20f   : > { %2971 = vrot.lane.b32.xlu0 %v2928_v53, %s4785_s19  ;;  %2843 = vrot.lane.b32.xlu1 %v2718_v36, %s4788_s20  ;;  %v5665_v47 = vsel %vm5438_vm11, 0, %v2486_v34  ;;  %v2739_v48 = vshll.u32 %v5655_v35, 16  ;;  %v2933_v49 = vrot.slane %v5645_v21, 1  ;;  %v2234_v51 = vmax.f32 %v2198_v24, 0.0  ;;  %v2117_v53 = vld [vmem:[#allocation2 + $0xe8] sm:$0xff] }
 0x210   : > { %v2744_v57 = vshrl.u32 %v5651_v32, 16  ;;  %v2748_v16 = vrot.slane %v2746_v39, 1  ;;  %v2753_v54 = vrot.slane %v2751_v27, 1  ;;  %v2734_v56 = vshll.u32 %v5665_v47, 16  ;;  %v4759_v36 = vld [vmem:[%s6154_s4] ss:$0 sm:$0xff] }
 0x211   : > { %v2732_v61 = vshrl.u32 %v5665_v47, 16  ;;  %v2932_v30 = vrot.slane %v5651_v32, 1  ;;  %v2404_v63 = vpack.c.bf16 %v2235_v29, %v2234_v51  ;;  %v2158_v5 = vmul.f32 %v5408_v31, %v2115_v41 }
 0x212   : > { %v2749_v20 = vor.u32 %v2748_v16, %v2744_v57  ;;  %v2736_v28 = vrot.slane %v2734_v56, 1  ;;  %v2741_v46 = vrot.slane %v2739_v48, 1  ;;  %v2200_v2 = vadd.f32 %v5419_v45, %v2157_v50  ;;  %v2121_v50 = vld [vmem:[#allocation2 + $0x108] sm:$0xff] }
 0x213   : > { %2969 = vrot.lane.b32.xlu1 %v2925_v37, %s4785_s19  ;;  %v2495_v11 = vshrl.u32 %v2404_v63, 16  ;;  %v2498_v12 = vshll.u32 %v2404_v63, 16  ;;  %v2201_v14 = vadd.f32 %v5419_v45, %v2158_v5  ;;  %v2161_v15 = vmul.f32 %v5408_v31, %v2118_v3 }
 0x214   : > { %v2754_v52 = vsel %vm617_vm2, %v2749_v20, %v2753_v54  ;;  %v2737_v17 = vor.u32 %v2736_v28, %v2732_v61  ;;  %v2236_v0 = vmax.f32 %v2200_v2, 0.0  ;;  %v2162_v1 = vmul.f32 %v4758_v59, %v2119_v7 }
 0x215   : > { %2849 = vrot.lane.b32.xlu0 %v2754_v52, %s4788_s20  ;;  %v2497_v10 = vrot.slane %v2495_v11, 7  ;;  %v2237_v13 = vmax.f32 %v2201_v14, 0.0  ;;  %v2204_v33 = vadd.f32 %v5419_v45, %v2161_v15  ;;  %v2159_v42 = vmul.f32 %v4758_v59, %v2116_v40 }
 0x216   : > { %v2742_v18 = vsel %vm617_vm2, %v2737_v17, %v2741_v46  ;;  %v2929_v31 = vrot.slane %v5665_v47, 1  ;;  %v2205_v21 = vadd.f32 %v5419_v45, %v2162_v1  ;;  %v2160_v22 = vmul.f32 %v4758_v59, %v2117_v53 }
 0x217   : > { %2847 = vrot.lane.b32.xlu1 %v2742_v18, %s4788_s20  ;;  %v2930_v24 = vrot.slane %v5655_v35, 1  ;;  %v2500_v25 = vor.u32 %v2498_v12, %v2497_v10  ;;  %v2605_v60 = vsel %vm5438_vm11, %v2497_v10, 0  ;;  %v2405_v4 = vpack.c.bf16 %v2237_v13, %v2236_v0 }
 0x218   : > { %v2934_v27 = vsel %vm842_vm1, %v2932_v30, %v2933_v49  ;;  %v2240_v34 = vmax.f32 %v2204_v33, 0.0  ;;  %v2241_v29 = vmax.f32 %v2205_v21, 0.0  ;;  %v2202_v45 = vadd.f32 %v4759_v36, %v2159_v42 }
 0x219   : > { %2975 = vrot.lane.b32.xlu0 %v2934_v27, %s4785_s19  ;;  %v5698_v35 = vsel %vm5438_vm11, 0, %v2500_v25  ;;  %v2763_v37 = vshll.u32 %v2605_v60, 16  ;;  %v2502_v39 = vshrl.u32 %v2405_v4, 16  ;;  %v2203_v41 = vadd.f32 %v4759_v36, %v2160_v22 }
 0x21a   : > { %v2931_v48 = vsel %vm842_vm1, %v2929_v31, %v2930_v24  ;;  %v2758_v49 = vshll.u32 %v5698_v35, 16  ;;  %v2163_v51 = vmul.f32 %v4758_v59, %v2120_v26  ;;  %v4789_v57 = vmov 0   ;;  %v4757_v24 = vld [vmem:[%s6155_s5] sm:$0x3f]  }
 0x21b   : > { %v2413_v16 = vrot.slane %v4789_v57, 7  ;;  %2973 = vrot.lane.b32.xlu1 %v2931_v48, %s4785_s19  ;;  %v2504_v54 = vrot.slane %v2502_v39, 7  ;;  %v2505_v56 = vshll.u32 %v2405_v4, 16  ;;  %v2407_v3 = vpack.c.bf16 %v2241_v29, %v2240_v34  ;;  %4674 = vmatprep.subr.msk.bf16.mxu1 %vm3104_vm8, %v4757_v24 }
 0x21c   : > { %v2239_v61 = vmax.f32 %v2203_v41, 0.0  ;;  %v2756_v30 = vshrl.u32 %v5698_v35, 16  ;;  %v2760_v63 = vrot.slane %v2758_v49, 1  ;;  %v2238_v5 = vmax.f32 %v2202_v45, 0.0 }
 0x21d   : > { %v2164_v7 = vmul.f32 %v4758_v59, %v2121_v50  ;;  %v2765_v20 = vrot.slane %v2763_v37, 1  ;;  %v2507_v28 = vor.u32 %v2505_v56, %v2504_v54  ;;  %v2606_v46 = vsel %vm5438_vm11, %v2504_v54, 0 }
 0x21e   : > { %v2516_v2 = vshrl.u32 %v2407_v3, 16  ;;  %v2761_v40 = vor.u32 %v2760_v63, %v2756_v30  ;;  %v2935_v11 = vrot.slane %v5698_v35, 1  ;;  %v2406_v12 = vpack.c.bf16 %v2239_v61, %v2238_v5 }
 0x21f   : > { %v2206_v14 = vadd.f32 %v4759_v36, %v2163_v51  ;;  %v5709_v15 = vsel %vm5438_vm11, 0, %v2507_v28  ;;  %v2519_v52 = vshll.u32 %v2407_v3, 16  ;;  %v2207_v17 = vadd.f32 %v4759_v36, %v2164_v7 }
 0x220   : > { %v2518_v53 = vrot.slane %v2516_v2, 7  ;;  %v2766_v0 = vsel %vm617_vm2, %v2761_v40, %v2765_v20  ;;  %v2770_v59 = vshll.u32 %v5709_v15, 16  ;;  %v2775_v1 = vshll.u32 %v2606_v46, 16 }
 0x221   : > { %v2936_v10 = vrot.slane %v2605_v60, 1  ;;  %2851 = vrot.lane.b32.xlu1 %v2766_v0, %s4788_s20  ;;  %v2509_v33 = vshrl.u32 %v2406_v12, 16  ;;  %v5716_v42 = vsel %vm5438_vm11, 0, %v2413_v16  ;;  %v2768_v18 = vshrl.u32 %v5709_v15, 16 }
 0x222   : > { %v2521_v13 = vor.u32 %v2519_v52, %v2518_v53  ;;  %v2772_v31 = vrot.slane %v2770_v59, 1  ;;  %v2242_v22 = vmax.f32 %v2206_v14, 0.0  ;;  %v2512_v4 = vshll.u32 %v2406_v12, 16 }
 0x223   : > { %v2937_v21 = vsel %vm842_vm1, %v2935_v11, %v2936_v10  ;;  %v2511_v60 = vrot.slane %v2509_v33, 7  ;;  %v2243_v26 = vmax.f32 %v2207_v17, 0.0  ;;  %v2777_v34 = vrot.slane %v2775_v1, 1 }
 0x224   : > { %v5725_v25 = vsel %vm5438_vm11, 0, %v2521_v13  ;;  %v2773_v27 = vor.u32 %v2772_v31, %v2768_v18  ;;  %v2938_v29 = vrot.slane %v5709_v15, 1  ;;  %v2608_v45 = vsel %vm5438_vm11, %v2518_v53, 0 }
 0x225   : > { %v2794_v36 = vshll.u32 %v5725_v25, 16  ;;  %2977 = vrot.lane.b32.xlu1 %v2937_v21, %s4785_s19  ;;  %v2514_v37 = vor.u32 %v2512_v4, %v2511_v60  ;;  %v2607_v39 = vsel %vm5438_vm11, %v2511_v60, 0  ;;  %v2408_v41 = vpack.c.bf16 %v2243_v26, %v2242_v22 }
 0x226   : > { %v2778_v50 = vsel %vm617_vm2, %v2773_v27, %v2777_v34  ;;  %v2614_v49 = vshll.u32 %v5716_v42, 16  ;;  %v2939_v51 = vrot.slane %v2606_v46, 1  ;;  %v2593_v56 = vsel %vm5438_vm11, %v2413_v16, 0 }
 0x227   : > { %v2796_v48 = vrot.slane %v2794_v36, 1  ;;  %2853 = vrot.lane.b32.xlu0 %v2778_v50, %s4788_s20  ;;  %v5740_v57 = vsel %vm5438_vm11, 0, %v2514_v37  ;;  %v2523_v54 = vshrl.u32 %v2408_v41, 16  ;;  %v2792_v3 = vshrl.u32 %v5725_v25, 16 }
 0x228   : > { %v2799_v61 = vshll.u32 %v2608_v45, 16  ;;  %v2782_v30 = vshll.u32 %v5740_v57, 16  ;;  %v2787_v63 = vshll.u32 %v2607_v39, 16  ;;  %v2940_v5 = vsel %vm842_vm1, %v2938_v29, %v2939_v51 }
 0x229   : > { %v2525_v7 = vrot.slane %v2523_v54, 7  ;;  %v2526_v20 = vshll.u32 %v2408_v41, 16  ;;  %v2612_v28 = vshrl.u32 %v5716_v42, 16  ;;  %v2797_v46 = vor.u32 %v2796_v48, %v2792_v3 }
 0x22a   : > { %v2780_v2 = vshrl.u32 %v5740_v57, 16  ;;  %v2784_v40 = vrot.slane %v2782_v30, 1  ;;  %v3277_v11 = vsel %vm3104_vm8, %v4757_v24, 0  ;;  %v2616_v14 = vrot.slane %v2614_v49, 1 }
 0x22b   : > { %2979 = vrot.lane.b32.xlu0 %v2940_v5, %s4785_s19  ;;  %v2528_v16 = vor.u32 %v2526_v20, %v2525_v7  ;;  %v2609_v12 = vsel %vm5438_vm11, %v2525_v7, 0  ;;  %v2619_v53 = vshll.u32 %v2593_v56, 16  ;;  %4597 = vmatpush3.bf16.msra.mxu1 %v3277_v11  ;;  %v2801_v52 = vrot.slane %v2799_v61, 1 }
 0x22c   : > { %v2785_v17 = vor.u32 %v2784_v40, %v2780_v2  ;;  %v2789_v0 = vrot.slane %v2787_v63, 1  ;;  %v2944_v59 = vrot.slane %v5725_v25, 1  ;;  %v2941_v1 = vrot.slane %v5740_v57, 1 }
 0x22d   : > { %v5757_v10 = vsel %vm5438_vm11, 0, %v2528_v16  ;;  %v2802_v13 = vsel %vm617_vm2, %v2797_v46, %v2801_v52  ;;  %v2811_v31 = vshll.u32 %v2609_v12, 16  ;;  %v2617_v21 = vor.u32 %v2616_v14, %v2612_v28 }
 0x22e   : > { %v2790_v33 = vsel %vm617_vm2, %v2785_v17, %v2789_v0  ;;  %v2806_v18 = vshll.u32 %v5757_v10, 16  ;;  %v2621_v22 = vrot.slane %v2619_v53, 1  ;;  %v2945_v24 = vrot.slane %v2608_v45, 1 }
 0x22f   : > { %2857 = vrot.lane.b32.xlu0 %v2802_v13, %s4788_s20  ;;  %2855 = vrot.lane.b32.xlu1 %v2790_v33, %s4788_s20  ;;  %v2942_v60 = vrot.slane %v2607_v39, 1  ;;  %v2804_v4 = vshrl.u32 %v5757_v10, 16  ;;  %v2813_v29 = vrot.slane %v2811_v31, 1  ;;  %v2947_v45 = vrot.slane %v5757_v10, 1 }
 0x230   : > { %v2808_v19 = vrot.slane %v2806_v18, 1  ;;  %v2946_v26 = vsel %vm842_vm1, %v2944_v59, %v2945_v24  ;;  %v2622_v37 = vsel %vm617_vm2, %v2617_v21, %v2621_v22  ;;  %v2948_v39 = vrot.slane %v2609_v12, 1 }
 0x231   : > { %v2943_v27 = vsel %vm842_vm1, %v2941_v1, %v2942_v60  ;;  %v2899_v41 = vrot.slane %v5716_v42, 1  ;;  %v2900_v50 = vrot.slane %v2593_v56, 1  ;;  %v3451_v20 = vsel %vm3104_vm8, %v5537_v6, 0 }
 0x232   : > { %v2809_v34 = vor.u32 %v2808_v19, %v2804_v4  ;;  %v2949_v48 = vsel %vm842_vm1, %v2947_v45, %v2948_v39 }
 0x233   : > { %2983 = vrot.lane.b32.xlu0 %v2946_v26, %s4785_s19  ;;  %2981 = vrot.lane.b32.xlu1 %v2943_v27, %s4785_s19  ;;  %v2901_v49 = vsel %vm842_vm1, %v2899_v41, %v2900_v50 }
 0x234   : > { %v2814_v36 = vsel %vm617_vm2, %v2809_v34, %v2813_v29 }
 0x237   : > { %2859 = vrot.lane.b32.xlu1 %v2814_v36, %s4788_s20  ;;  %2827 = vrot.lane.b32.xlu0 %v2622_v37, %s4788_s20 }
 0x23b   : > { %2985 = vrot.lane.b32.xlu1 %v2949_v48, %s4785_s19  ;;  %2861 = vrot.lane.b32.xlu0 %v2622_v37, %s4788_s20 }
 0x23f   : > { %2953 = vrot.lane.b32.xlu1 %v2901_v49, %s4785_s19 }
 0x243   : > { %2987 = vrot.lane.b32.xlu1 %v2901_v49, %s4785_s19 }
 0x24c   : > { %v2830_v51 = vpop.permute.xlu0 %2829 }
 0x24d   : > { %v2992_v54 = vsel %vm1376_vm7, %v5456_v55, %v2830_v51 }
 0x250   : > { %v2956_v3 = vpop.permute.xlu0 %2955 }
 0x251   : > { %v5784_v56 = vsel %vm923_vm3, %v2992_v54, %v2956_v3 }
 0x252   : > { %4564 = vmatprep.mubr.msk.bf16.mxu0 %vm3071_vm12, %v5784_v56 }
 0x254   : > { %v2834_v61 = vpop.permute.xlu0 %2833 }
 0x255   : > { %v2996_v55 = vsel %vm1376_vm7, %v5477_v43, %v2834_v61 }
 0x257   : > { %v2832_v30 = vpop.permute.xlu1 %2831 }
 0x258   : > { %v2960_v63 = vpop.permute.xlu0 %2959  ;;  %v2994_v5 = vsel %vm1376_vm7, %v5494_v8, %v2832_v30 }
 0x259   : > { %v5798_v46 = vsel %vm923_vm3, %v2996_v55, %v2960_v63 }
 0x25b   : > { %v2958_v7 = vpop.permute.xlu1 %2957 }
 0x25c   : > { %v5795_v28 = vsel %vm923_vm3, %v2994_v5, %v2958_v7 }
 0x25d   : > { %4565 = vmatmul.mubr.msk.bf16.vlgmr.msra.gmra.mxu0 %vm3071_vm12, %v5795_v28 }
 0x25e   : > { %4568 = vmatprep.mubr.msk.bf16.mxu0 %vm3071_vm12, %v5798_v46  ;;  %4631 = vmatpush3.bf16.msra.mxu0 %v3451_v20 }
 0x260   : > { %v2838_v8 = vpop.permute.xlu0 %2837 }
 0x261   : > { %v3000_v11 = vsel %vm1376_vm7, %v5521_v58, %v2838_v8 }
 0x264   : > { %v2964_v40 = vpop.permute.xlu0 %2963 }
 0x265   : > { %v5812_v12 = vsel %vm923_vm3, %v3000_v11, %v2964_v40 }
 0x269   : > { %v2836_v2 = vpop.permute.xlu1 %2835 }
 0x26a   : > { %v2998_v6 = vsel %vm1376_vm7, %v5554_v62, %v2836_v2 }
 0x26c   : > { %v2842_v14 = vpop.permute.xlu0 %2841 }
 0x26d   : > { %v2962_v43 = vpop.permute.xlu1 %2961  ;;  %v3004_v58 = vsel %vm1376_vm7, %v5567_v23, %v2842_v14 }
 0x26e   : > { %v5809_v16 = vsel %vm923_vm3, %v2998_v6, %v2962_v43 }
 0x26f   : > { %4569 = vmatmul.mubr.msk.bf16.gmra.mxu0 %vm3071_vm12, %v5809_v16 }
 0x270   : > { %4572 = vmatprep.mubr.msk.bf16.mxu0 %vm3071_vm12, %v5812_v12  ;;  %v2968_v52 = vpop.permute.xlu0 %2967 }
 0x271   : > { %v5826_v59 = vsel %vm923_vm3, %v3004_v58, %v2968_v52 }
 0x273   : > { %v2840_v53 = vpop.permute.xlu1 %2839 }
 0x274   : > { %v3002_v62 = vsel %vm1376_vm7, %v5587_v44, %v2840_v53 }
 0x277   : > { %v2966_v17 = vpop.permute.xlu1 %2965 }
 0x278   : > { %v5823_v0 = vsel %vm923_vm3, %v3002_v62, %v2966_v17 }
 0x279   : > { %4573 = vmatmul.mubr.msk.bf16.gmra.mxu0 %vm3071_vm12, %v5823_v0 }
 0x27a   : > { %4576 = vmatprep.mubr.msk.bf16.mxu0 %vm3071_vm12, %v5826_v59 }
 0x27d   : > { %v2846_v1 = vpop.permute.xlu0 %2845 }
 0x27e   : > { %v3008_v23 = vsel %vm1376_vm7, %v5620_v38, %v2846_v1 }
 0x281   : > { %v2844_v13 = vpop.permute.xlu1 %2843  ;;  %v2972_v33 = vpop.permute.xlu0 %2971 }
 0x282   : > { %v3006_v44 = vsel %vm1376_vm7, %v5633_v9, %v2844_v13  ;;  %v3044_v21 = vsel %vm923_vm3, %v3008_v23, %v2972_v33 }
 0x285   : > { %v2970_v18 = vpop.permute.xlu1 %2969 }
 0x286   : > { %v3042_v31 = vsel %vm923_vm3, %v3006_v44, %v2970_v18 }
 0x287   : > { %4577 = vmatmul.mubr.msk.bf16.gmra.mxu0 %vm3071_vm12, %v3042_v31  ;;  %v2850_v22 = vpop.permute.xlu0 %2849 }
 0x288   : > { %4580 = vmatprep.mubr.msk.bf16.mxu0 %vm3071_vm12, %v3044_v21  ;;  %v3012_v9 = vsel %vm1376_vm7, %v5651_v32, %v2850_v22 }
 0x289   : > { %v2848_v24 = vpop.permute.xlu1 %2847 }
 0x28a   : > { %v3010_v4 = vsel %vm1376_vm7, %v5665_v47, %v2848_v24 }
 0x28b   : > { %v2976_v60 = vpop.permute.xlu0 %2975 }
 0x28c   : > { %v3048_v26 = vsel %vm923_vm3, %v3012_v9, %v2976_v60 }
 0x28d   : > { %v2974_v19 = vpop.permute.xlu1 %2973 }
 0x28e   : > { %v3046_v38 = vsel %vm923_vm3, %v3010_v4, %v2974_v19 }
 0x28f   : > { %4581 = vmatmul.mubr.msk.bf16.gmra.mxu0 %vm3071_vm12, %v3046_v38 }
 0x290   : > { %4584 = vmatprep.mubr.msk.bf16.mxu0 %vm3071_vm12, %v3048_v26 }
 0x293   : > { %v2852_v27 = vpop.permute.xlu1 %2851 }
 0x294   : > { %v3014_v34 = vsel %vm1376_vm7, %v5698_v35, %v2852_v27 }
 0x297   : > { %v2978_v29 = vpop.permute.xlu1 %2977 }
 0x298   : > { %v3050_v36 = vsel %vm923_vm3, %v3014_v34, %v2978_v29  ;;  %v5974_v34 = vld [vmem:[%s6156_s6] ss:$0 sm:$0xff] }
 0x299   : > { %v2854_v47 = vpop.permute.xlu0 %2853  ;;  %4585 = vmatmul.mubr.msk.bf16.gmra.mxu0 %vm3071_vm12, %v3050_v36 }
 0x29a   : > { %v3016_v32 = vsel %vm1376_vm7, %v5709_v15, %v2854_v47  ;;  %v5979_v47 = vld [vmem:[%s6157_s7] ss:$0 sm:$0xff] }
 0x29d   : > { %v2980_v37 = vpop.permute.xlu0 %2979 }
 0x29e   : > { %v3052_v45 = vsel %vm923_vm3, %v3016_v32, %v2980_v37 }
 0x29f   : > { %4588 = vmatprep.mubr.msk.bf16.mxu0 %vm3071_vm12, %v3052_v45 }
 0x2a1   : > { %v2856_v39 = vpop.permute.xlu1 %2855  ;;  %v2858_v41 = vpop.permute.xlu0 %2857 }
 0x2a2   : > { %v3018_v50 = vsel %vm1376_vm7, %v5740_v57, %v2856_v39  ;;  %v3020_v35 = vsel %vm1376_vm7, %v5725_v25, %v2858_v41 }
 0x2a5   : > { %v2982_v48 = vpop.permute.xlu1 %2981  ;;  %v2984_v49 = vpop.permute.xlu0 %2983 }
 0x2a6   : > { %v3054_v51 = vsel %vm923_vm3, %v3018_v50, %v2982_v48  ;;  %v3056_v54 = vsel %vm923_vm3, %v3020_v35, %v2984_v49 }
 0x2a7   : > { %4589 = vmatmul.mubr.msk.bf16.gmra.mxu0 %vm3071_vm12, %v3054_v51 }
 0x2a8   : > { %4592 = vmatprep.mubr.msk.bf16.mxu0 %vm3071_vm12, %v3056_v54 }
 0x2a9   : > { %v2860_v15 = vpop.permute.xlu1 %2859  ;;  %v2828_v3 = vpop.permute.xlu0 %2827 }
 0x2aa   : > { %v3022_v61 = vsel %vm1376_vm7, %v5757_v10, %v2860_v15  ;;  %v2990_v25 = vsel %vm1376_vm7, %v5716_v42, %v2828_v3 }
 0x2ad   : > { %v2986_v30 = vpop.permute.xlu1 %2985  ;;  %v2862_v10 = vpop.permute.xlu0 %2861 }
 0x2ae   : > { %v3058_v57 = vsel %vm923_vm3, %v3022_v61, %v2986_v30 }
 0x2af   : > { %4593 = vmatmul.mubr.msk.bf16.gmra.mxu0 %vm3071_vm12, %v3058_v57 }
 0x2b0   : > { %4632 = vmatprep.mubr.msk.bf16.mxu0 %vm3071_vm12, %v5795_v28 }
 0x2b1   : > { %v2954_v63 = vpop.permute.xlu1 %2953 }
 0x2b2   : > { %v3026_v5 = vsel %vm923_vm3, %v2990_v25, %v2954_v63 }
 0x2b3   : > { %4598 = vmatprep.mubr.msk.bf16.mxu1 %vm3071_vm12, %v3026_v5 }
 0x2b4   : > { %4599 = vmatmul.mubr.msk.bf16.vlgmr.msra.gmra.mxu1 %vm3071_vm12, %v5784_v56  ;;  %v3024_v56 = vsel %vm1376_vm7, %v5716_v42, %v2862_v10 }
 0x2b5   : > { %4602 = vmatprep.mubr.msk.bf16.mxu1 %vm3071_vm12, %v5795_v28  ;;  %v2988_v7 = vpop.permute.xlu1 %2987 }
 0x2b6   : > { %v3060_v20 = vsel %vm923_vm3, %v3024_v56, %v2988_v7 }
 0x2b7   : > { %4633 = vmatmul.mubr.msk.bf16.vlgmr.msra.gmra.mxu0 %vm3071_vm12, %v5798_v46 }
 0x2b8   : > { %4636 = vmatprep.mubr.msk.bf16.mxu0 %vm3071_vm12, %v5809_v16 }
 0x2bc   : > { %4603 = vmatmul.mubr.msk.bf16.gmra.mxu1 %vm3071_vm12, %v5798_v46 }
 0x2bd   : > { %4606 = vmatprep.mubr.msk.bf16.mxu1 %vm3071_vm12, %v5809_v16 }
 0x2bf   : > { %4637 = vmatmul.mubr.msk.bf16.gmra.mxu0 %vm3071_vm12, %v5812_v12 }
 0x2c0   : > { %4640 = vmatprep.mubr.msk.bf16.mxu0 %vm3071_vm12, %v5823_v0 }
 0x2c4   : > { %4607 = vmatmul.mubr.msk.bf16.gmra.mxu1 %vm3071_vm12, %v5812_v12 }
 0x2c5   : > { %4610 = vmatprep.mubr.msk.bf16.mxu1 %vm3071_vm12, %v5823_v0 }
 0x2c7   : > { %4641 = vmatmul.mubr.msk.bf16.gmra.mxu0 %vm3071_vm12, %v5826_v59 }
 0x2c8   : > { %4644 = vmatprep.mubr.msk.bf16.mxu0 %vm3071_vm12, %v3042_v31 }
 0x2cc   : > { %4611 = vmatmul.mubr.msk.bf16.gmra.mxu1 %vm3071_vm12, %v5826_v59 }
 0x2cd   : > { %4614 = vmatprep.mubr.msk.bf16.mxu1 %vm3071_vm12, %v3042_v31 }
 0x2cf   : > { %4645 = vmatmul.mubr.msk.bf16.gmra.mxu0 %vm3071_vm12, %v3044_v21 }
 0x2d0   : > { %4648 = vmatprep.mubr.msk.bf16.mxu0 %vm3071_vm12, %v3046_v38 }
 0x2d4   : > { %4615 = vmatmul.mubr.msk.bf16.gmra.mxu1 %vm3071_vm12, %v3044_v21 }
 0x2d5   : > { %4618 = vmatprep.mubr.msk.bf16.mxu1 %vm3071_vm12, %v3046_v38 }
 0x2d7   : > { %4649 = vmatmul.mubr.msk.bf16.gmra.mxu0 %vm3071_vm12, %v3048_v26 }
 0x2d8   : > { %4652 = vmatprep.mubr.msk.bf16.mxu0 %vm3071_vm12, %v3050_v36 }
 0x2dc   : > { %4619 = vmatmul.mubr.msk.bf16.gmra.mxu1 %vm3071_vm12, %v3048_v26 }
 0x2dd   : > { %4622 = vmatprep.mubr.msk.bf16.mxu1 %vm3071_vm12, %v3050_v36 }
 0x2df   : > { %4653 = vmatmul.mubr.msk.bf16.gmra.mxu0 %vm3071_vm12, %v3052_v45 }
 0x2e0   : > { %4656 = vmatprep.mubr.msk.bf16.mxu0 %vm3071_vm12, %v3054_v51 }
 0x2e4   : > { %4623 = vmatmul.mubr.msk.bf16.gmra.mxu1 %vm3071_vm12, %v3052_v45 }
 0x2e5   : > { %4626 = vmatprep.mubr.msk.bf16.mxu1 %vm3071_vm12, %v3054_v51 }
 0x2e7   : > { %4657 = vmatmul.mubr.msk.bf16.gmra.mxu0 %vm3071_vm12, %v3056_v54 }
 0x2e8   : > { %4660 = vmatprep.mubr.msk.bf16.mxu0 %vm3071_vm12, %v3058_v57 }
 0x2ec   : > { %4627 = vmatmul.mubr.msk.bf16.gmra.mxu1 %vm3071_vm12, %v3056_v54 }
 0x2ef   : > { %4661 = vmatmul.mubr.msk.bf16.gmra.mxu0 %vm3071_vm12, %v3060_v20 }
 0x31d   : > { %v4566_v55 = vpop.f32.mrf.mxu0 }
 0x31f   : > { %v3142_v28 = vpop.f32.mrf.mxu0 }
 0x321   : > { %v4567_v46 = vpop.f32.mrf.mxu0 }
 0x323   : > { %v3145_v8 = vpop.f32.mrf.mxu0 }
 0x32f   : > { %v4570_v2 = vpop.f32.mrf.mxu0 }
 0x331   : > { %v3158_v40 = vpop.f32.mrf.mxu0 }
 0x333   : > { %v5919_v6 = vpop.f32.mrf.mxu0 }
 0x335   : > { %v5921_v43 = vpop.f32.mrf.mxu0 }
 0x339   : > { %v5923_v11 = vpop.f32.mrf.mxu0 }
 0x33b   : > { %v5925_v42 = vpop.f32.mrf.mxu0 }
 0x33d   : > { %v5927_v16 = vpop.f32.mrf.mxu0 }
 0x33f   : > { %v5929_v12 = vpop.f32.mrf.mxu0 }
 0x347   : > { %v5931_v14 = vpop.f32.mrf.mxu0 }
 0x349   : > { %v5933_v53 = vpop.f32.mrf.mxu0 }
 0x34b   : > { %v5935_v52 = vpop.f32.mrf.mxu0 }
 0x34d   : > { %v5937_v62 = vpop.f32.mrf.mxu0 }
 0x34f   : > { %v5939_v17 = vpop.f32.mrf.mxu0 }
 0x351   : > { %v5941_v58 = vpop.f32.mrf.mxu0 }
 0x353   : > { %v5943_v0 = vpop.f32.mrf.mxu0 }
 0x355   : > { %v5945_v59 = vpop.f32.mrf.mxu0 }
 0x359   : > { %v5947_v1 = vpop.f32.mrf.mxu0 }
 0x35b   : > { %v5949_v13 = vpop.f32.mrf.mxu0 }
 0x35d   : > { %v5951_v33 = vpop.f32.mrf.mxu0 }
 0x35f   : > { %v5953_v44 = vpop.f32.mrf.mxu0 }
 0x367   : > { %v5955_v18 = vpop.f32.mrf.mxu0 }
 0x369   : > { %v5957_v23 = vpop.f32.mrf.mxu0 }
 0x36b   : > { %v5959_v31 = vpop.f32.mrf.mxu0 }
 0x36d   : > { %v5961_v21 = vpop.f32.mrf.mxu0 }
 0x36f   : > { %v5963_v22 = vpop.f32.mrf.mxu0 }
 0x371   : > { %v5965_v24 = vpop.f32.mrf.mxu0 }
 0x373   : > { %v5967_v60 = vpop.f32.mrf.mxu0 }
 0x374   : > { %v4600_v4 = vpop.f32.mrf.mxu1 }
 0x375   : > { %v3322_v19 = vadd.f32 %v4600_v4, %v4566_v55  ;;  %v5969_v9 = vpop.f32.mrf.mxu0 }
 0x376   : > { %v3313_v38 = vpop.f32.mrf.mxu1 }
 0x377   : > { %v3314_v26 = vadd.f32 %v3313_v38, %v3142_v28  ;;  %v4634_v27 = vpop.f32.mrf.mxu0 }
 0x378   : > { %v3616_v29 = vadd.f32 %v4634_v27, %v3322_v19  ;;  %v4601_v36 = vpop.f32.mrf.mxu1 }
 0x379   : > { %v3325_v32 = vadd.f32 %v4601_v36, %v4567_v46  ;;  %v3487_v37 = vpop.f32.mrf.mxu0 }
 0x37a   : > { %v3655_v45 = vmul.f32 %v5974_v34, %v3616_v29  ;;  %v3614_v39 = vadd.f32 %v3487_v37, %v3314_v26  ;;  %v3316_v41 = vpop.f32.mrf.mxu1 }
 0x37b   : > { %v3317_v50 = vadd.f32 %v3316_v41, %v3145_v8  ;;  %v4635_v35 = vpop.f32.mrf.mxu0 }
 0x37c   : > { %v3694_v48 = vadd.f32 %v5979_v47, %v3655_v45  ;;  %v3653_v49 = vmul.f32 %v5974_v34, %v3614_v39  ;;  %v3617_v51 = vadd.f32 %v4635_v35, %v3325_v32  ;;  %v4604_v54 = vpop.f32.mrf.mxu1 }
 0x37d   : > { %v3338_v15 = vadd.f32 %v4604_v54, %v4570_v2  ;;  %v3490_v3 = vpop.f32.mrf.mxu0 }
 0x37e   : > { %v3726_v61 = vmax.f32 %v3694_v48, 0.0  ;;  %v3692_v30 = vadd.f32 %v5979_v47, %v3653_v49  ;;  %v3656_v57 = vmul.f32 %v5974_v34, %v3617_v51  ;;  %v3615_v25 = vadd.f32 %v3490_v3, %v3317_v50  ;;  %v3329_v63 = vpop.f32.mrf.mxu1 }
 0x37f   : > { %v3330_v5 = vadd.f32 %v3329_v63, %v3158_v40  ;;  %v4638_v10 = vpop.f32.mrf.mxu0 }
 0x380   : > { %v4247_v56 = vpack.c.bf16 %v3726_v61, %v3726_v61  ;;  %v3724_v7 = vmax.f32 %v3692_v30, 0.0  ;;  %v3695_v20 = vadd.f32 %v5979_v47, %v3656_v57  ;;  %v3654_v55 = vmul.f32 %v5974_v34, %v3615_v25  ;;  %v4605_v28 = vpop.f32.mrf.mxu1 }
 0x381   : > { %v3620_v46 = vadd.f32 %v4638_v10, %v3338_v15  ;;  %v3341_v8 = vadd.f32 %v4605_v28, %v5919_v6  ;;  %v3503_v2 = vpop.f32.mrf.mxu0 }
 0x382   : > { %3887 = vst.msk [vmem:[%s5990_s17 + $0x8] sm:$0xf] %vm3884_vm13, %v4247_v56  ;;  %v4245_v4 = vpack.c.bf16 %v3724_v7, %v3724_v7  ;;  %v3727_v19 = vmax.f32 %v3695_v20, 0.0  ;;  %v3693_v40 = vadd.f32 %v5979_v47, %v3654_v55  ;;  %v3618_v38 = vadd.f32 %v3503_v2, %v3330_v5  ;;  %v3332_v26 = vpop.f32.mrf.mxu1 }
 0x383   : > { %v3659_v27 = vmul.f32 %v5974_v34, %v3620_v46  ;;  %v3333_v29 = vadd.f32 %v3332_v26, %v5921_v43  ;;  %v4639_v36 = vpop.f32.mrf.mxu0 }
 0x384   : > { %3885 = vst.msk [vmem:[%s5990_s17] sm:$0xf] %vm3884_vm13, %v4245_v4  ;;  %v4248_v32 = vpack.c.bf16 %v3727_v19, %v3727_v19  ;;  %v3725_v37 = vmax.f32 %v3693_v40, 0.0  ;;  %v3657_v6 = vmul.f32 %v5974_v34, %v3618_v38  ;;  %v3621_v45 = vadd.f32 %v4639_v36, %v3341_v8  ;;  %v4608_v39 = vpop.f32.mrf.mxu1 }
 0x385   : > { %v3698_v41 = vadd.f32 %v5979_v47, %v3659_v27  ;;  %v3354_v50 = vadd.f32 %v4608_v39, %v5923_v11  ;;  %v3506_v35 = vpop.f32.mrf.mxu0 }
 0x386   : > { %3888 = vst.msk [vmem:[%s5990_s17 + $0xc] sm:$0xf] %vm3884_vm13, %v4248_v32  ;;  %v4246_v48 = vpack.c.bf16 %v3725_v37, %v3725_v37  ;;  %v3696_v43 = vadd.f32 %v5979_v47, %v3657_v6  ;;  %v3660_v49 = vmul.f32 %v5974_v34, %v3621_v45  ;;  %v3619_v51 = vadd.f32 %v3506_v35, %v3333_v29  ;;  %v3345_v54 = vpop.f32.mrf.mxu1 }
 0x387   : > { %v3730_v15 = vmax.f32 %v3698_v41, 0.0  ;;  %v3346_v3 = vadd.f32 %v3345_v54, %v5925_v42  ;;  %v4642_v61 = vpop.f32.mrf.mxu0 }
 0x388   : > { %3886 = vst.msk [vmem:[%s5990_s17 + $0x4] sm:$0xf] %vm3884_vm13, %v4246_v48  ;;  %v3728_v30 = vmax.f32 %v3696_v43, 0.0  ;;  %v3699_v11 = vadd.f32 %v5979_v47, %v3660_v49  ;;  %v3658_v57 = vmul.f32 %v5974_v34, %v3619_v51  ;;  %v3624_v25 = vadd.f32 %v4642_v61, %v3354_v50  ;;  %v4609_v63 = vpop.f32.mrf.mxu1 }
 0x389   : > { %v4251_v5 = vpack.c.bf16 %v3730_v15, %v3730_v15  ;;  %v3357_v10 = vadd.f32 %v4609_v63, %v5927_v16  ;;  %v3519_v56 = vpop.f32.mrf.mxu0 }
 0x38a   : > { %v4249_v7 = vpack.c.bf16 %v3728_v30, %v3728_v30  ;;  %v3731_v20 = vmax.f32 %v3699_v11, 0.0  ;;  %v3697_v42 = vadd.f32 %v5979_v47, %v3658_v57  ;;  %v3663_v55 = vmul.f32 %v5974_v34, %v3624_v25  ;;  %v3348_v28 = vpop.f32.mrf.mxu1 }
 0x38b   : > { %3891 = vst.msk [vmem:[%s5990_s17 + $0x18] sm:$0xf] %vm3884_vm13, %v4251_v5  ;;  %v3622_v46 = vadd.f32 %v3519_v56, %v3346_v3  ;;  %v3349_v8 = vadd.f32 %v3348_v28, %v5929_v12  ;;  %v4643_v2 = vpop.f32.mrf.mxu0 }
 0x38c   : > { %3889 = vst.msk [vmem:[%s5990_s17 + $0x10] sm:$0xf] %vm3884_vm13, %v4249_v7  ;;  %v4252_v4 = vpack.c.bf16 %v3731_v20, %v3731_v20  ;;  %v3729_v19 = vmax.f32 %v3697_v42, 0.0  ;;  %v3702_v16 = vadd.f32 %v5979_v47, %v3663_v55  ;;  %v3625_v40 = vadd.f32 %v4643_v2, %v3357_v10  ;;  %v4612_v38 = vpop.f32.mrf.mxu1 }
 0x38d   : > { %v3661_v26 = vmul.f32 %v5974_v34, %v3622_v46  ;;  %v3370_v27 = vadd.f32 %v4612_v38, %v5931_v14  ;;  %v3522_v29 = vpop.f32.mrf.mxu0 }
 0x38e   : > { %3892 = vst.msk [vmem:[%s5990_s17 + $0x1c] sm:$0xf] %vm3884_vm13, %v4252_v4  ;;  %v4250_v36 = vpack.c.bf16 %v3729_v19, %v3729_v19  ;;  %v3734_v32 = vmax.f32 %v3702_v16, 0.0  ;;  %v3664_v12 = vmul.f32 %v5974_v34, %v3625_v40  ;;  %v3623_v37 = vadd.f32 %v3522_v29, %v3349_v8  ;;  %v3361_v6 = vpop.f32.mrf.mxu1 }
 0x38f   : > { %v3700_v45 = vadd.f32 %v5979_v47, %v3661_v26  ;;  %v3362_v39 = vadd.f32 %v3361_v6, %v5933_v53  ;;  %v4646_v41 = vpop.f32.mrf.mxu0 }
 0x390   : > { %3890 = vst.msk [vmem:[%s5990_s17 + $0x14] sm:$0xf] %vm3884_vm13, %v4250_v36  ;;  %v4255_v50 = vpack.c.bf16 %v3734_v32, %v3734_v32  ;;  %v3703_v14 = vadd.f32 %v5979_v47, %v3664_v12  ;;  %v3662_v35 = vmul.f32 %v5974_v34, %v3623_v37  ;;  %v3628_v48 = vadd.f32 %v4646_v41, %v3370_v27  ;;  %v4613_v43 = vpop.f32.mrf.mxu1 }
 0x391   : > { %v3732_v49 = vmax.f32 %v3700_v45, 0.0  ;;  %v3373_v51 = vadd.f32 %v4613_v43, %v5935_v52  ;;  %v3535_v54 = vpop.f32.mrf.mxu0 }
 0x392   : > { %3895 = vst.msk [vmem:[%s5990_s17 + $0x28] sm:$0xf] %vm3884_vm13, %v4255_v50  ;;  %v3735_v15 = vmax.f32 %v3703_v14, 0.0  ;;  %v3701_v53 = vadd.f32 %v5979_v47, %v3662_v35  ;;  %v3667_v3 = vmul.f32 %v5974_v34, %v3628_v48  ;;  %v3626_v61 = vadd.f32 %v3535_v54, %v3362_v39  ;;  %v3364_v30 = vpop.f32.mrf.mxu1 }
 0x393   : > { %v4253_v11 = vpack.c.bf16 %v3732_v49, %v3732_v49  ;;  %v3365_v57 = vadd.f32 %v3364_v30, %v5937_v62  ;;  %v4647_v25 = vpop.f32.mrf.mxu0 }
 0x394   : > { %v4256_v63 = vpack.c.bf16 %v3735_v15, %v3735_v15  ;;  %v3733_v5 = vmax.f32 %v3701_v53, 0.0  ;;  %v3706_v52 = vadd.f32 %v5979_v47, %v3667_v3  ;;  %v3665_v10 = vmul.f32 %v5974_v34, %v3626_v61  ;;  %v4616_v56 = vpop.f32.mrf.mxu1 }
 0x395   : > { %3893 = vst.msk [vmem:[%s5990_s17 + $0x20] sm:$0xf] %vm3884_vm13, %v4253_v11  ;;  %v3629_v7 = vadd.f32 %v4647_v25, %v3373_v51  ;;  %v3386_v20 = vadd.f32 %v4616_v56, %v5939_v17  ;;  %v3538_v42 = vpop.f32.mrf.mxu0 }
 0x396   : > { %3896 = vst.msk [vmem:[%s5990_s17 + $0x2c] sm:$0xf] %vm3884_vm13, %v4256_v63  ;;  %v4254_v55 = vpack.c.bf16 %v3733_v5, %v3733_v5  ;;  %v3738_v28 = vmax.f32 %v3706_v52, 0.0  ;;  %v3704_v62 = vadd.f32 %v5979_v47, %v3665_v10  ;;  %v3627_v46 = vadd.f32 %v3538_v42, %v3365_v57  ;;  %v3377_v8 = vpop.f32.mrf.mxu1 }
 0x397   : > { %v3668_v2 = vmul.f32 %v5974_v34, %v3629_v7  ;;  %v3378_v4 = vadd.f32 %v3377_v8, %v5941_v58  ;;  %v4650_v19 = vpop.f32.mrf.mxu0 }
 0x398   : > { %3894 = vst.msk [vmem:[%s5990_s17 + $0x24] sm:$0xf] %vm3884_vm13, %v4254_v55  ;;  %v4259_v16 = vpack.c.bf16 %v3738_v28, %v3738_v28  ;;  %v3736_v40 = vmax.f32 %v3704_v62, 0.0  ;;  %v3666_v17 = vmul.f32 %v5974_v34, %v3627_v46  ;;  %v3632_v38 = vadd.f32 %v4650_v19, %v3386_v20  ;;  %v4617_v26 = vpop.f32.mrf.mxu1 }
 0x399   : > { %v3707_v27 = vadd.f32 %v5979_v47, %v3668_v2  ;;  %v3389_v29 = vadd.f32 %v4617_v26, %v5943_v0  ;;  %v3551_v36 = vpop.f32.mrf.mxu0 }
 0x39a   : > { %3899 = vst.msk [vmem:[%s5990_s17 + $0x38] sm:$0xf] %vm3884_vm13, %v4259_v16  ;;  %v4257_v32 = vpack.c.bf16 %v3736_v40, %v3736_v40  ;;  %v3705_v58 = vadd.f32 %v5979_v47, %v3666_v17  ;;  %v3671_v12 = vmul.f32 %v5974_v34, %v3632_v38  ;;  %v3630_v37 = vadd.f32 %v3551_v36, %v3378_v4  ;;  %v3380_v6 = vpop.f32.mrf.mxu1 }
 0x39b   : > { %v3739_v45 = vmax.f32 %v3707_v27, 0.0  ;;  %v3381_v39 = vadd.f32 %v3380_v6, %v5945_v59  ;;  %v4651_v41 = vpop.f32.mrf.mxu0 }
 0x39c   : > { %3897 = vst.msk [vmem:[%s5990_s17 + $0x30] sm:$0xf] %vm3884_vm13, %v4257_v32  ;;  %v3737_v50 = vmax.f32 %v3705_v58, 0.0  ;;  %v3710_v0 = vadd.f32 %v5979_v47, %v3671_v12  ;;  %v3669_v14 = vmul.f32 %v5974_v34, %v3630_v37  ;;  %v3633_v35 = vadd.f32 %v4651_v41, %v3389_v29  ;;  %v4620_v48 = vpop.f32.mrf.mxu1 }
 0x39d   : > { %v4260_v43 = vpack.c.bf16 %v3739_v45, %v3739_v45  ;;  %v3402_v49 = vadd.f32 %v4620_v48, %v5947_v1  ;;  %v3554_v51 = vpop.f32.mrf.mxu0 }
 0x39e   : > { %v4258_v54 = vpack.c.bf16 %v3737_v50, %v3737_v50  ;;  %v3742_v15 = vmax.f32 %v3710_v0, 0.0  ;;  %v3708_v59 = vadd.f32 %v5979_v47, %v3669_v14  ;;  %v3672_v53 = vmul.f32 %v5974_v34, %v3633_v35  ;;  %v3393_v3 = vpop.f32.mrf.mxu1 }
 0x39f   : > { %3900 = vst.msk [vmem:[%s5990_s17 + $0x3c] sm:$0xf] %vm3884_vm13, %v4260_v43  ;;  %v3631_v61 = vadd.f32 %v3554_v51, %v3381_v39  ;;  %v3394_v30 = vadd.f32 %v3393_v3, %v5949_v13  ;;  %v4654_v11 = vpop.f32.mrf.mxu0 }
 0x3a0   : > { %3898 = vst.msk [vmem:[%s5990_s17 + $0x34] sm:$0xf] %vm3884_vm13, %v4258_v54  ;;  %v4263_v57 = vpack.c.bf16 %v3742_v15, %v3742_v15  ;;  %v3740_v25 = vmax.f32 %v3708_v59, 0.0  ;;  %v3711_v1 = vadd.f32 %v5979_v47, %v3672_v53  ;;  %v3636_v63 = vadd.f32 %v4654_v11, %v3402_v49  ;;  %v4621_v5 = vpop.f32.mrf.mxu1 }
 0x3a1   : > { %v3670_v52 = vmul.f32 %v5974_v34, %v3631_v61  ;;  %v3405_v10 = vadd.f32 %v4621_v5, %v5951_v33  ;;  %v3567_v56 = vpop.f32.mrf.mxu0 }
 0x3a2   : > { %3903 = vst.msk [vmem:[%s5990_s17 + $0x48] sm:$0xf] %vm3884_vm13, %v4263_v57  ;;  %v4261_v7 = vpack.c.bf16 %v3740_v25, %v3740_v25  ;;  %v3743_v20 = vmax.f32 %v3711_v1, 0.0  ;;  %v3675_v13 = vmul.f32 %v5974_v34, %v3636_v63  ;;  %v3634_v42 = vadd.f32 %v3567_v56, %v3394_v30  ;;  %v3396_v55 = vpop.f32.mrf.mxu1 }
 0x3a3   : > { %v3709_v28 = vadd.f32 %v5979_v47, %v3670_v52  ;;  %v3397_v62 = vadd.f32 %v3396_v55, %v5953_v44  ;;  %v4655_v46 = vpop.f32.mrf.mxu0 }
 0x3a4   : > { %3901 = vst.msk [vmem:[%s5990_s17 + $0x40] sm:$0xf] %vm3884_vm13, %v4261_v7  ;;  %v4264_v8 = vpack.c.bf16 %v3743_v20, %v3743_v20  ;;  %v3714_v33 = vadd.f32 %v5979_v47, %v3675_v13  ;;  %v3673_v2 = vmul.f32 %v5974_v34, %v3634_v42  ;;  %v3637_v4 = vadd.f32 %v4655_v46, %v3405_v10  ;;  %v4624_v19 = vpop.f32.mrf.mxu1 }
 0x3a5   : > { %v3741_v16 = vmax.f32 %v3709_v28, 0.0  ;;  %v3418_v40 = vadd.f32 %v4624_v19, %v5955_v18  ;;  %v3570_v17 = vpop.f32.mrf.mxu0 }
 0x3a6   : > { %3904 = vst.msk [vmem:[%s5990_s17 + $0x4c] sm:$0xf] %vm3884_vm13, %v4264_v8  ;;  %v3746_v38 = vmax.f32 %v3714_v33, 0.0  ;;  %v3712_v44 = vadd.f32 %v5979_v47, %v3673_v2  ;;  %v3676_v26 = vmul.f32 %v5974_v34, %v3637_v4  ;;  %v3635_v27 = vadd.f32 %v3570_v17, %v3397_v62  ;;  %v3409_v29 = vpop.f32.mrf.mxu1 }
 0x3a7   : > { %v4262_v36 = vpack.c.bf16 %v3741_v16, %v3741_v16  ;;  %v3410_v32 = vadd.f32 %v3409_v29, %v5957_v23  ;;  %v4658_v58 = vpop.f32.mrf.mxu0 }
 0x3a8   : > { %v4267_v12 = vpack.c.bf16 %v3746_v38, %v3746_v38  ;;  %v3744_v37 = vmax.f32 %v3712_v44, 0.0  ;;  %v3715_v18 = vadd.f32 %v5979_v47, %v3676_v26  ;;  %v3674_v6 = vmul.f32 %v5974_v34, %v3635_v27  ;;  %v4625_v45 = vpop.f32.mrf.mxu1 }
 0x3a9   : > { %3902 = vst.msk [vmem:[%s5990_s17 + $0x44] sm:$0xf] %vm3884_vm13, %v4262_v36  ;;  %v3640_v39 = vadd.f32 %v4658_v58, %v3418_v40  ;;  %v3421_v41 = vadd.f32 %v4625_v45, %v5959_v31  ;;  %v3583_v50 = vpop.f32.mrf.mxu0 }
 0x3aa   : > { %3907 = vst.msk [vmem:[%s5990_s17 + $0x58] sm:$0xf] %vm3884_vm13, %v4267_v12  ;;  %v4265_v0 = vpack.c.bf16 %v3744_v37, %v3744_v37  ;;  %v3747_v14 = vmax.f32 %v3715_v18, 0.0  ;;  %v3713_v23 = vadd.f32 %v5979_v47, %v3674_v6  ;;  %v3638_v35 = vadd.f32 %v3583_v50, %v3410_v32  ;;  %v3412_v48 = vpop.f32.mrf.mxu1 }
 0x3ab   : > { %v3679_v43 = vmul.f32 %v5974_v34, %v3640_v39  ;;  %v3413_v49 = vadd.f32 %v3412_v48, %v5961_v21  ;;  %v4659_v51 = vpop.f32.mrf.mxu0 }
 0x3ac   : > { %3905 = vst.msk [vmem:[%s5990_s17 + $0x50] sm:$0xf] %vm3884_vm13, %v4265_v0  ;;  %v4268_v54 = vpack.c.bf16 %v3747_v14, %v3747_v14  ;;  %v3745_v15 = vmax.f32 %v3713_v23, 0.0  ;;  %v3677_v31 = vmul.f32 %v5974_v34, %v3638_v35  ;;  %v3641_v59 = vadd.f32 %v4659_v51, %v3421_v41  ;;  %v4628_v53 = vpop.f32.mrf.mxu1 }
 0x3ad   : > { %v3718_v3 = vadd.f32 %v5979_v47, %v3679_v43  ;;  %v3434_v61 = vadd.f32 %v4628_v53, %v5963_v22  ;;  %v3586_v30 = vpop.f32.mrf.mxu0 }
 0x3ae   : > { %3908 = vst.msk [vmem:[%s5990_s17 + $0x5c] sm:$0xf] %vm3884_vm13, %v4268_v54  ;;  %v4266_v11 = vpack.c.bf16 %v3745_v15, %v3745_v15  ;;  %v3716_v21 = vadd.f32 %v5979_v47, %v3677_v31  ;;  %v3680_v57 = vmul.f32 %v5974_v34, %v3641_v59  ;;  %v3639_v25 = vadd.f32 %v3586_v30, %v3413_v49  ;;  %v3425_v1 = vpop.f32.mrf.mxu1 }
 0x3af   : > { %v3750_v63 = vmax.f32 %v3718_v3, 0.0  ;;  %v3426_v5 = vadd.f32 %v3425_v1, %v5965_v24  ;;  %v4662_v52 = vpop.f32.mrf.mxu0 }
 0x3b0   : > { %3906 = vst.msk [vmem:[%s5990_s17 + $0x54] sm:$0xf] %vm3884_vm13, %v4266_v11  ;;  %v3748_v10 = vmax.f32 %v3716_v21, 0.0  ;;  %v3719_v22 = vadd.f32 %v5979_v47, %v3680_v57  ;;  %v3678_v56 = vmul.f32 %v5974_v34, %v3639_v25  ;;  %v3644_v7 = vadd.f32 %v4662_v52, %v3434_v61  ;;  %v4629_v20 = vpop.f32.mrf.mxu1 }
 0x3b1   : > { %v4271_v13 = vpack.c.bf16 %v3750_v63, %v3750_v63  ;;  %v3437_v42 = vadd.f32 %v4629_v20, %v5967_v60  ;;  %v3599_v55 = vpop.f32.mrf.mxu0 }
 0x3b2   : > { %v4269_v28 = vpack.c.bf16 %v3748_v10, %v3748_v10  ;;  %v3751_v62 = vmax.f32 %v3719_v22, 0.0  ;;  %v3717_v24 = vadd.f32 %v5979_v47, %v3678_v56  ;;  %v3683_v46 = vmul.f32 %v5974_v34, %v3644_v7  ;;  %v3428_v8 = vpop.f32.mrf.mxu1 }
 0x3b3   : > { %3911 = vst.msk [vmem:[%s5990_s17 + $0x68] sm:$0xf] %vm3884_vm13, %v4271_v13  ;;  %v3642_v33 = vadd.f32 %v3599_v55, %v3426_v5  ;;  %v3429_v2 = vadd.f32 %v3428_v8, %v5969_v9  ;;  %v4663_v4 = vpop.f32.mrf.mxu0 }
 0x3b4   : > { %3909 = vst.msk [vmem:[%s5990_s17 + $0x60] sm:$0xf] %vm3884_vm13, %v4269_v28  ;;  %v4272_v19 = vpack.c.bf16 %v3751_v62, %v3751_v62  ;;  %v3749_v60 = vmax.f32 %v3717_v24, 0.0  ;;  %v3722_v16 = vadd.f32 %v5979_v47, %v3683_v46  ;;  %v3645_v40 = vadd.f32 %v4663_v4, %v3437_v42 }
 0x3b5   : > { %v3681_v17 = vmul.f32 %v5974_v34, %v3642_v33  ;;  %v3602_v38 = vpop.f32.mrf.mxu0 }
 0x3b6   : > { %3912 = vst.msk [vmem:[%s5990_s17 + $0x6c] sm:$0xf] %vm3884_vm13, %v4272_v19  ;;  %v4270_v44 = vpack.c.bf16 %v3749_v60, %v3749_v60  ;;  %v3754_v26 = vmax.f32 %v3722_v16, 0.0  ;;  %v3684_v9 = vmul.f32 %v5974_v34, %v3645_v40  ;;  %v3643_v27 = vadd.f32 %v3602_v38, %v3429_v2 }
 0x3b7   : > { %v3720_v29 = vadd.f32 %v5979_v47, %v3681_v17 }
 0x3b8   : > { %3910 = vst.msk [vmem:[%s5990_s17 + $0x64] sm:$0xf] %vm3884_vm13, %v4270_v44  ;;  %v4275_v36 = vpack.c.bf16 %v3754_v26, %v3754_v26  ;;  %v3723_v32 = vadd.f32 %v5979_v47, %v3684_v9  ;;  %v3682_v58 = vmul.f32 %v5974_v34, %v3643_v27 }
 0x3b9   : > { %v3752_v12 = vmax.f32 %v3720_v29, 0.0 }
 0x3ba   : > { %3915 = vst.msk [vmem:[%s5990_s17 + $0x78] sm:$0xf] %vm3884_vm13, %v4275_v36  ;;  %v3755_v37 = vmax.f32 %v3723_v32, 0.0  ;;  %v3721_v18 = vadd.f32 %v5979_v47, %v3682_v58 }
 0x3bb   : > { %v4273_v6 = vpack.c.bf16 %v3752_v12, %v3752_v12 }
 0x3bc   : > { %v4276_v45 = vpack.c.bf16 %v3755_v37, %v3755_v37  ;;  %v3753_v39 = vmax.f32 %v3721_v18, 0.0 }
 0x3bd   : > { %3913 = vst.msk [vmem:[%s5990_s17 + $0x70] sm:$0xf] %vm3884_vm13, %v4273_v6 }
 0x3be   : > { %3916 = vst.msk [vmem:[%s5990_s17 + $0x7c] sm:$0xf] %vm3884_vm13, %v4276_v45  ;;  %v4274_v41 = vpack.c.bf16 %v3753_v39, %v3753_v39 }
 0x3c0   : > { %3914 = vst.msk [vmem:[%s5990_s17 + $0x74] sm:$0xf] %vm3884_vm13, %v4274_v41 }
 0x3c1 PF: > { %s18_s29 = sadd.s32 1, %s4782_s29   ;;  %s6161_s27 = smov %s4778_s28 }
 0x3c2   : > { %p15_p5 = scmp.ge.s32.totalorder %s18_s29, 4   ;;  %s6162_s28 = smov %s6164_s30 }
 0x3c4   :  { %17 = sbr.rel (!%p15_p5) target bundleno = 2 (0x2), region = 92 }

</bundles_post_ra>
